<compile_context>
chip_gen: v6e
topology: v6e:2x2x1
jax: 0.10.0
libtpu: 0.0.40
codegen_flags: <defaults>
</compile_context>

<pallas_src>
import functools

import jax
import jax.numpy as jnp
from jax import lax
from jax.experimental import pallas as pl
from jax.experimental.pallas import tpu as pltpu

KSIZE = 7
PAD = 3


def _cbam_kernel(params_ref, masks_ref, x_ref, w1_ref, b1_ref, w2_ref, b2_ref,
                 o_ref, fmax_ref, favg_ref, *, W):
    """Fused CBAM forward for one (Bt, C, H*W) batch block.

    params_ref (SMEM f32[100]): [0:49] conv taps for the channel-max map,
      [49:98] taps for the channel-mean map, [98] folded BN scale, [99] BN bias.
    masks_ref  (KSIZE, HW) f32: per-dx column-validity masks for the flat conv.
    x_ref / o_ref: (Bt, C, HW) lane-dense feature blocks.
    fmax_ref / favg_ref: (Bt, lpad) zero-bordered flat stats maps (VMEM scratch),
      one sublane row per batch element.
    """
    Bt, C, HW = x_ref.shape
    lpad = fmax_ref.shape[1]
    inv_hw = 1.0 / float(HW)
    inv_c = 1.0 / float(C)
    nt = KSIZE * KSIZE
    base = PAD * W + PAD                  # flat offset of interior pixel (0, 0)
    tail = lpad - (base + HW)

    bn_scale = params_ref[2 * nt]
    bn_bias = params_ref[2 * nt + 1]

    # ---- channel attention: pool all Bt elements, one MLP per grid step ----
    max_cols = []
    avg_cols = []
    for b in range(Bt):
        xb = x_ref[b].astype(jnp.float32)                        # (C, HW)
        max_cols.append(jnp.max(xb, axis=1, keepdims=True))      # (C, 1)
        avg_cols.append(jnp.sum(xb, axis=1, keepdims=True) * inv_hw)
    pooled = jnp.concatenate(max_cols + avg_cols, axis=1)        # (C, 2*Bt)
    h = jnp.dot(w1_ref[...], pooled,
                preferred_element_type=jnp.float32) + b1_ref[...]
    h = jnp.maximum(h, 0.0)                                      # (hidden, 2*Bt)
    y = jnp.dot(w2_ref[...], h,
                preferred_element_type=jnp.float32) + b2_ref[...]
    scale = jax.nn.sigmoid(y[:, 0:Bt] + y[:, Bt:2 * Bt])         # (C, Bt)

    # ---- zero only the vertical-padding border of the flat stats maps ----
    # Unconditional (NOT guarded by program_id == 0): with a "parallel" grid the
    # scratch is per-TensorCore and step 0 only runs on one core, so a
    # first-step-only init would leave the other core's border uninitialized.
    # The interior [base, base+HW) is fully rewritten below every step.
    zb = jnp.zeros((Bt, base), jnp.float32)
    zt = jnp.zeros((Bt, tail), jnp.float32)
    fmax_ref[:, pl.ds(0, base)] = zb
    favg_ref[:, pl.ds(0, base)] = zb
    fmax_ref[:, pl.ds(base + HW, tail)] = zt
    favg_ref[:, pl.ds(base + HW, tail)] = zt

    # ---- c_out (stored immediately; the output block is the residency) ----
    # Channel stats are computed by re-reading o_ref from VMEM, so no (C, HW)
    # value has to stay live across the whole spatial-attention section.
    ones_c = jnp.ones((1, C), jnp.float32)
    for b in range(Bt):
        o_ref[b] = (x_ref[b].astype(jnp.float32)
                    * scale[:, b:b + 1]).astype(o_ref.dtype)
        cb = o_ref[b].astype(jnp.float32)                        # (C, HW)
        fmax_ref[b:b + 1, pl.ds(base, HW)] = jnp.max(cb, axis=0, keepdims=True)
        # Channel mean via a (1, C) @ (C, HW) matmul: uses the otherwise-idle MXU
        # instead of a cross-sublane VPU/XLU reduction.
        favg_ref[b:b + 1, pl.ds(base, HW)] = (
            jnp.dot(ones_c, cb, preferred_element_type=jnp.float32) * inv_c)

    # ---- 7x7 "same" conv + BN + ReLU + sigmoid, batched over Bt sublanes ----
    # Each tap is a shifted (Bt, HW) load straight from the zero-bordered flat
    # scratch refs; dx-dependent column masks realize the horizontal padding.
    parts = [jnp.zeros((Bt, HW), jnp.float32) for _ in range(KSIZE)]
    for dy in range(KSIZE):
        for dx in range(KSIZE):
            k = dy * W + dx
            wm = params_ref[dy * KSIZE + dx]
            wa = params_ref[nt + dy * KSIZE + dx]
            parts[dx] = (parts[dx]
                         + wm * fmax_ref[:, pl.ds(k, HW)]
                         + wa * favg_ref[:, pl.ds(k, HW)])
    acc = jnp.zeros((Bt, HW), jnp.float32)
    for dx in range(KSIZE):
        acc = acc + parts[dx] * masks_ref[dx:dx + 1, :]
    s = jax.nn.sigmoid(jnp.maximum(acc * bn_scale + bn_bias, 0.0))  # (Bt, HW)

    # ---- final rescale: in-place update of the output block ----
    for b in range(Bt):
        o_ref[b] = (o_ref[b].astype(jnp.float32)
                    * s[b:b + 1, :]).astype(o_ref.dtype)


def _pick_block_b(B, C, HW, lpad, io_bytes, budget):
    """Largest divisor of B (capped at 8 sublane rows) that fits the VMEM budget
    while keeping >= 2 grid steps (pipelining; 2 TensorCores on v7x)."""
    best = 1
    for cand in range(1, min(B, 8) + 1):
        if B % cand:
            continue
        if B > 1 and B // cand < 2:
            continue                               # keep the grid >= 2 steps
        need = (4 * cand * C * HW * io_bytes       # 2x-in + 2x-out double buffers
                + 2 * cand * lpad * 4)             # fmax / favg scratch
        if need <= budget:
            best = cand
    return best


def cbam_pallas(x, w1, b1, w2, b2, conv_w, bn_gamma, bn_beta, bn_mean, bn_var,
                eps=1e-5, block_b=None):
    B, C, H, W = x.shape
    hidden = w1.shape[0]
    HW = H * W
    # TODO(synk): if HW is not a multiple of 128, pad HW (and the column masks)
    # up to the next 128 multiple here so x/o blocks stay lane-dense.
    x_flat = x.reshape(B, C, HW)

    # Folded BN (inference) + conv taps packed into one small SMEM vector.
    bn_scale = bn_gamma / jnp.sqrt(bn_var + eps)
    bn_bias = bn_beta - bn_mean * bn_scale
    params = jnp.concatenate([
        conv_w[0, 0].reshape(-1),        # 49 taps applied to the channel-max map
        conv_w[0, 1].reshape(-1),        # 49 taps applied to the channel-mean map
        jnp.reshape(bn_scale, (1,)),
        jnp.reshape(bn_bias, (1,)),
    ]).astype(jnp.float32)

    # Column-validity masks for the flattened 7x7 conv (depend only on dx).
    col = jnp.arange(HW, dtype=jnp.int32) % W
    masks = jnp.stack(
        [((col >= PAD - dx) & (col < W + PAD - dx)).astype(jnp.float32)
         for dx in range(KSIZE)], axis=0)                      # (KSIZE, HW)

    # Flat zero-bordered stats map length: PAD guard rows + lanes, rounded to 128.
    lpad = ((HW + 2 * PAD * W + 2 * PAD) + 127) // 128 * 128

    # Per-generation VMEM sizing (v5e/v6e: 128 MiB, v7x: 64 MiB per core).
    try:
        vmem_cap = int(pltpu.get_tpu_info().vmem_capacity_bytes)
    except Exception:
        vmem_cap = 64 << 20                        # conservative (v7x-safe) default
    vmem_limit = max(min(vmem_cap * 3 // 4, 100 << 20), 32 << 20)

    io_bytes = x.dtype.itemsize
    if block_b is None:
        block_b = _pick_block_b(B, C, HW, lpad, io_bytes,
                                budget=int(vmem_limit * 0.8))
    assert B % block_b == 0, (B, block_b)

    kernel = functools.partial(_cbam_kernel, W=W)
    out_flat = pl.pallas_call(
        kernel,
        out_shape=jax.ShapeDtypeStruct((B, C, HW), x.dtype),
        grid=(B // block_b,),
        in_specs=[
            pl.BlockSpec(memory_space=pltpu.MemorySpace.SMEM),        # params
            pl.BlockSpec((KSIZE, HW), lambda i: (0, 0)),              # masks
            pl.BlockSpec((block_b, C, HW), lambda i: (i, 0, 0)),      # x
            pl.BlockSpec((hidden, C), lambda i: (0, 0)),              # w1
            pl.BlockSpec((hidden, 1), lambda i: (0, 0)),              # b1
            pl.BlockSpec((C, hidden), lambda i: (0, 0)),              # w2
            pl.BlockSpec((C, 1), lambda i: (0, 0)),                   # b2
        ],
        out_specs=pl.BlockSpec((block_b, C, HW), lambda i: (i, 0, 0)),
        scratch_shapes=[
            pltpu.VMEM((block_b, lpad), jnp.float32),   # flat channel-max maps
            pltpu.VMEM((block_b, lpad), jnp.float32),   # flat channel-mean maps
        ],
        compiler_params=pltpu.CompilerParams(
            dimension_semantics=("parallel",),
            vmem_limit_bytes=int(vmem_limit)),
    )(params, masks, x_flat, w1, b1, w2, b2)
    return out_flat.reshape(B, C, H, W)


def cbam_ref(x, w1, b1, w2, b2, conv_w, bn_gamma, bn_beta, bn_mean, bn_var,
             eps=1e-5):
    """Pure-JAX reference mirroring the PyTorch forward (eval-mode BN)."""
    pmax = jnp.max(x, axis=(2, 3))
    pavg = jnp.mean(x, axis=(2, 3))

    def mlp(v):
        h = jnp.maximum(v @ w1.T + b1.reshape(1, -1), 0.0)
        return h @ w2.T + b2.reshape(1, -1)

    scale = jax.nn.sigmoid(mlp(pmax) + mlp(pavg))
    c = x * scale[:, :, None, None]
    cmax = jnp.max(c, axis=1, keepdims=True)
    cavg = jnp.mean(c, axis=1, keepdims=True)
    inp = jnp.concatenate([cmax, cavg], axis=1)
    conv = lax.conv_general_dilated(inp, conv_w, window_strides=(1, 1),
                                    padding=((PAD, PAD), (PAD, PAD)),
                                    dimension_numbers=('NCHW', 'OIHW', 'NCHW'))
    bn_scale = bn_gamma / jnp.sqrt(bn_var + eps)
    bn_bias = bn_beta - bn_mean * bn_scale
    s = jax.nn.sigmoid(jnp.maximum(conv * bn_scale + bn_bias, 0.0))
    return c * s


if __name__ == "__main__":
    B, C, H, W = 8, 32, 16, 16
    reduction = 16
    hidden = C // reduction                      # 2

    key = jax.random.PRNGKey(0)
    ks = jax.random.split(key, 8)
    x = jax.random.normal(ks[0], (B, C, H, W), jnp.float32)
    # fc = Linear(C, C//r) -> ReLU -> Linear(C//r, C)   (torch Linear: y = x W^T + b)
    w1 = jax.random.normal(ks[1], (hidden, C), jnp.float32) / jnp.sqrt(float(C))
    b1 = 0.1 * jax.random.normal(ks[2], (hidden, 1), jnp.float32)
    w2 = jax.random.normal(ks[3], (C, hidden), jnp.float32) / jnp.sqrt(float(hidden))
    b2 = 0.1 * jax.random.normal(ks[4], (C, 1), jnp.float32)
    # spatial_attention = Conv2d(2, 1, 7, padding=3, bias=False) + BatchNorm2d(1) + ReLU
    conv_w = jax.random.normal(ks[5], (1, 2, KSIZE, KSIZE), jnp.float32) / (
        KSIZE * jnp.sqrt(2.0))
    bn_gamma = jnp.float32(1.0) + 0.1 * jax.random.normal(ks[6], (), jnp.float32)
    bn_beta = 0.1 * jax.random.normal(ks[7], (), jnp.float32)
    bn_mean = jnp.float32(0.0)
    bn_var = jnp.float32(1.0)

    out = jax.block_until_ready(
        cbam_pallas(x, w1, b1, w2, b2, conv_w, bn_gamma, bn_beta, bn_mean, bn_var))
    ref = cbam_ref(x, w1, b1, w2, b2, conv_w, bn_gamma, bn_beta, bn_mean, bn_var)

    assert out.shape == (B, C, H, W), out.shape
    if not jnp.allclose(out, ref, atol=1e-4, rtol=1e-4):
        max_err = float(jnp.max(jnp.abs(out - ref)))
        raise AssertionError(f"Pallas CBAM mismatch vs reference, max_err={max_err}")
    print("KERNEL_OK")
</pallas_src>

<mosaic_0001>
module attributes {stable_mosaic.version = 11 : i64} {
  func.func @_cbam_kernel(%arg0: i32, %arg1: memref<100xf32, #tpu.memory_space<smem>>, %arg2: memref<7x256xf32, #tpu.memory_space<vmem>>, %arg3: memref<4x32x256xf32, #tpu.memory_space<vmem>>, %arg4: memref<2x32xf32, #tpu.memory_space<vmem>>, %arg5: memref<2x1xf32, #tpu.memory_space<vmem>>, %arg6: memref<32x2xf32, #tpu.memory_space<vmem>>, %arg7: memref<32x1xf32, #tpu.memory_space<vmem>>, %arg8: memref<4x32x256xf32, #tpu.memory_space<vmem>>, %arg9: memref<4x384xf32, #tpu.memory_space<vmem>>, %arg10: memref<4x384xf32, #tpu.memory_space<vmem>>) attributes {dimension_semantics = [#tpu.dimension_semantics<parallel>], iteration_bounds = array<i64: 2>, scalar_prefetch = 0 : i64, scratch_operands = 2 : i64, tpu.core_type = #tpu.core_type<tc>, window_params = [{transform_indices = @transform_0, window_bounds = array<i64: 100>}, {pipeline_mode = #tpu.pipeline_mode<synchronous>, transform_indices = @transform_1, window_bounds = array<i64: 7, 256>}, {transform_indices = @transform_2, window_bounds = array<i64: 4, 32, 256>}, {pipeline_mode = #tpu.pipeline_mode<synchronous>, transform_indices = @transform_3, window_bounds = array<i64: 2, 32>}, {pipeline_mode = #tpu.pipeline_mode<synchronous>, transform_indices = @transform_4, window_bounds = array<i64: 2, 1>}, {pipeline_mode = #tpu.pipeline_mode<synchronous>, transform_indices = @transform_5, window_bounds = array<i64: 32, 2>}, {pipeline_mode = #tpu.pipeline_mode<synchronous>, transform_indices = @transform_6, window_bounds = array<i64: 32, 1>}, {transform_indices = @transform_7, window_bounds = array<i64: 4, 32, 256>}]} {
    %c98 = arith.constant 98 : index
    %0 = memref.load %arg1[%c98] : memref<100xf32, #tpu.memory_space<smem>>
    %c99 = arith.constant 99 : index
    %1 = memref.load %arg1[%c99] : memref<100xf32, #tpu.memory_space<smem>>
    %c0 = arith.constant 0 : index
    %c0_0 = arith.constant 0 : index
    %c0_1 = arith.constant 0 : index
    %2 = vector.load %arg3[%c0, %c0_0, %c0_1] : memref<4x32x256xf32, #tpu.memory_space<vmem>>, vector<1x32x256xf32>
    %3 = vector.shape_cast %2 : vector<1x32x256xf32> to vector<32x256xf32>
    %cst = arith.constant dense<0xFF800000> : vector<32xf32>
    %4 = vector.multi_reduction <maximumf>, %3, %cst [1] : vector<32x256xf32> to vector<32xf32>
    %5 = vector.shape_cast %4 : vector<32xf32> to vector<32x1xf32>
    %cst_2 = arith.constant dense<0.000000e+00> : vector<32xf32>
    %6 = vector.multi_reduction <add>, %3, %cst_2 [1] : vector<32x256xf32> to vector<32xf32>
    %7 = vector.shape_cast %6 : vector<32xf32> to vector<32x1xf32>
    %cst_3 = arith.constant 3.906250e-03 : f32
    %8 = vector.broadcast %cst_3 : f32 to vector<32x1xf32>
    %9 = arith.mulf %7, %8 : vector<32x1xf32>
    %c1 = arith.constant 1 : index
    %c0_4 = arith.constant 0 : index
    %c0_5 = arith.constant 0 : index
    %10 = vector.load %arg3[%c1, %c0_4, %c0_5] : memref<4x32x256xf32, #tpu.memory_space<vmem>>, vector<1x32x256xf32>
    %11 = vector.shape_cast %10 : vector<1x32x256xf32> to vector<32x256xf32>
    %cst_6 = arith.constant dense<0xFF800000> : vector<32xf32>
    %12 = vector.multi_reduction <maximumf>, %11, %cst_6 [1] : vector<32x256xf32> to vector<32xf32>
    %13 = vector.shape_cast %12 : vector<32xf32> to vector<32x1xf32>
    %cst_7 = arith.constant dense<0.000000e+00> : vector<32xf32>
    %14 = vector.multi_reduction <add>, %11, %cst_7 [1] : vector<32x256xf32> to vector<32xf32>
    %15 = vector.shape_cast %14 : vector<32xf32> to vector<32x1xf32>
    %cst_8 = arith.constant 3.906250e-03 : f32
    %16 = vector.broadcast %cst_8 : f32 to vector<32x1xf32>
    %17 = arith.mulf %15, %16 : vector<32x1xf32>
    %c2 = arith.constant 2 : index
    %c0_9 = arith.constant 0 : index
    %c0_10 = arith.constant 0 : index
    %18 = vector.load %arg3[%c2, %c0_9, %c0_10] : memref<4x32x256xf32, #tpu.memory_space<vmem>>, vector<1x32x256xf32>
    %19 = vector.shape_cast %18 : vector<1x32x256xf32> to vector<32x256xf32>
    %cst_11 = arith.constant dense<0xFF800000> : vector<32xf32>
    %20 = vector.multi_reduction <maximumf>, %19, %cst_11 [1] : vector<32x256xf32> to vector<32xf32>
    %21 = vector.shape_cast %20 : vector<32xf32> to vector<32x1xf32>
    %cst_12 = arith.constant dense<0.000000e+00> : vector<32xf32>
    %22 = vector.multi_reduction <add>, %19, %cst_12 [1] : vector<32x256xf32> to vector<32xf32>
    %23 = vector.shape_cast %22 : vector<32xf32> to vector<32x1xf32>
    %cst_13 = arith.constant 3.906250e-03 : f32
    %24 = vector.broadcast %cst_13 : f32 to vector<32x1xf32>
    %25 = arith.mulf %23, %24 : vector<32x1xf32>
    %c3 = arith.constant 3 : index
    %c0_14 = arith.constant 0 : index
    %c0_15 = arith.constant 0 : index
    %26 = vector.load %arg3[%c3, %c0_14, %c0_15] : memref<4x32x256xf32, #tpu.memory_space<vmem>>, vector<1x32x256xf32>
    %27 = vector.shape_cast %26 : vector<1x32x256xf32> to vector<32x256xf32>
    %cst_16 = arith.constant dense<0xFF800000> : vector<32xf32>
    %28 = vector.multi_reduction <maximumf>, %27, %cst_16 [1] : vector<32x256xf32> to vector<32xf32>
    %29 = vector.shape_cast %28 : vector<32xf32> to vector<32x1xf32>
    %cst_17 = arith.constant dense<0.000000e+00> : vector<32xf32>
    %30 = vector.multi_reduction <add>, %27, %cst_17 [1] : vector<32x256xf32> to vector<32xf32>
    %31 = vector.shape_cast %30 : vector<32xf32> to vector<32x1xf32>
    %cst_18 = arith.constant 3.906250e-03 : f32
    %32 = vector.broadcast %cst_18 : f32 to vector<32x1xf32>
    %33 = arith.mulf %31, %32 : vector<32x1xf32>
    %34 = tpu.concatenate %5, %13, %21, %29, %9, %17, %25, %33 in 1 : vector<32x1xf32>, vector<32x1xf32>, vector<32x1xf32>, vector<32x1xf32>, vector<32x1xf32>, vector<32x1xf32>, vector<32x1xf32>, vector<32x1xf32> -> vector<32x8xf32>
    %c0_19 = arith.constant 0 : index
    %c0_20 = arith.constant 0 : index
    %35 = vector.load %arg4[%c0_19, %c0_20] : memref<2x32xf32, #tpu.memory_space<vmem>>, vector<2x32xf32>
    %cst_21 = arith.constant dense<0.000000e+00> : vector<2x8xf32>
    %36 = tpu.matmul %35, %34, %cst_21 {dimension_numbers = #tpu.dot_dimension_numbers<[1], [0], [0], [1], [0, 0, 1, 1], [], []>} : vector<2x32xf32>, vector<32x8xf32>, vector<2x8xf32> -> vector<2x8xf32>
    %c0_22 = arith.constant 0 : index
    %c0_23 = arith.constant 0 : index
    %37 = vector.load %arg5[%c0_22, %c0_23] : memref<2x1xf32, #tpu.memory_space<vmem>>, vector<2x1xf32>
    %38 = vector.broadcast %37 : vector<2x1xf32> to vector<2x8xf32>
    %39 = arith.addf %36, %38 : vector<2x8xf32>
    %cst_24 = arith.constant 0.000000e+00 : f32
    %40 = vector.broadcast %cst_24 : f32 to vector<2x8xf32>
    %41 = arith.maximumf %39, %40 : vector<2x8xf32>
    %c0_25 = arith.constant 0 : index
    %c0_26 = arith.constant 0 : index
    %42 = vector.load %arg6[%c0_25, %c0_26] : memref<32x2xf32, #tpu.memory_space<vmem>>, vector<32x2xf32>
    %cst_27 = arith.constant dense<0.000000e+00> : vector<32x8xf32>
    %43 = tpu.matmul %42, %41, %cst_27 {dimension_numbers = #tpu.dot_dimension_numbers<[1], [0], [0], [1], [0, 0, 1, 1], [], []>} : vector<32x2xf32>, vector<2x8xf32>, vector<32x8xf32> -> vector<32x8xf32>
    %c0_28 = arith.constant 0 : index
    %c0_29 = arith.constant 0 : index
    %44 = vector.load %arg7[%c0_28, %c0_29] : memref<32x1xf32, #tpu.memory_space<vmem>>, vector<32x1xf32>
    %45 = vector.broadcast %44 : vector<32x1xf32> to vector<32x8xf32>
    %46 = arith.addf %43, %45 : vector<32x8xf32>
    %47 = vector.extract_strided_slice %46 {offsets = [0, 0], sizes = [32, 4], strides = [1, 1]} : vector<32x8xf32> to vector<32x4xf32>
    %48 = vector.extract_strided_slice %46 {offsets = [0, 4], sizes = [32, 4], strides = [1, 1]} : vector<32x8xf32> to vector<32x4xf32>
    %49 = arith.addf %47, %48 : vector<32x4xf32>
    %50 = arith.negf %49 : vector<32x4xf32>
    %51 = math.exp %50 : vector<32x4xf32>
    %cst_30 = arith.constant 1.000000e+00 : f32
    %52 = vector.broadcast %cst_30 : f32 to vector<32x4xf32>
    %53 = arith.addf %52, %51 : vector<32x4xf32>
    %54 = arith.divf %52, %53 : vector<32x4xf32>
    %cst_31 = arith.constant 0.000000e+00 : f32
    %55 = vector.broadcast %cst_31 : f32 to vector<4x51xf32>
    %cst_32 = arith.constant 0.000000e+00 : f32
    %56 = vector.broadcast %cst_32 : f32 to vector<4x77xf32>
    %c0_33 = arith.constant 0 : index
    %c0_34 = arith.constant 0 : index
    %57 = vector.load %arg9[%c0_33, %c0_34] : memref<4x384xf32, #tpu.memory_space<vmem>>, vector<4x51xf32>
    tpu.vector_store %arg9[%c0_33, %c0_34], %55 {strides = array<i32>} : memref<4x384xf32, #tpu.memory_space<vmem>>, vector<4x51xf32>,
    %c0_35 = arith.constant 0 : index
    %c0_36 = arith.constant 0 : index
    %58 = vector.load %arg10[%c0_35, %c0_36] : memref<4x384xf32, #tpu.memory_space<vmem>>, vector<4x51xf32>
    tpu.vector_store %arg10[%c0_35, %c0_36], %55 {strides = array<i32>} : memref<4x384xf32, #tpu.memory_space<vmem>>, vector<4x51xf32>,
    %c0_37 = arith.constant 0 : index
    %c307 = arith.constant 307 : index
    %59 = vector.load %arg9[%c0_37, %c307] : memref<4x384xf32, #tpu.memory_space<vmem>>, vector<4x77xf32>
    tpu.vector_store %arg9[%c0_37, %c307], %56 {strides = array<i32>} : memref<4x384xf32, #tpu.memory_space<vmem>>, vector<4x77xf32>,
    %c0_38 = arith.constant 0 : index
    %c307_39 = arith.constant 307 : index
    %60 = vector.load %arg10[%c0_38, %c307_39] : memref<4x384xf32, #tpu.memory_space<vmem>>, vector<4x77xf32>
    tpu.vector_store %arg10[%c0_38, %c307_39], %56 {strides = array<i32>} : memref<4x384xf32, #tpu.memory_space<vmem>>, vector<4x77xf32>,
    %cst_40 = arith.constant 1.000000e+00 : f32
    %61 = vector.broadcast %cst_40 : f32 to vector<1x32xf32>
    %c0_41 = arith.constant 0 : index
    %c0_42 = arith.constant 0 : index
    %c0_43 = arith.constant 0 : index
    %62 = vector.load %arg3[%c0_41, %c0_42, %c0_43] : memref<4x32x256xf32, #tpu.memory_space<vmem>>, vector<1x32x256xf32>
    %63 = vector.shape_cast %62 : vector<1x32x256xf32> to vector<32x256xf32>
    %64 = vector.extract_strided_slice %54 {offsets = [0, 0], sizes = [32, 1], strides = [1, 1]} : vector<32x4xf32> to vector<32x1xf32>
    %65 = vector.broadcast %64 : vector<32x1xf32> to vector<32x256xf32>
    %66 = arith.mulf %63, %65 : vector<32x256xf32>
    %c0_44 = arith.constant 0 : index
    %c0_45 = arith.constant 0 : index
    %c0_46 = arith.constant 0 : index
    %67 = vector.load %arg8[%c0_44, %c0_45, %c0_46] : memref<4x32x256xf32, #tpu.memory_space<vmem>>, vector<1x32x256xf32>
    %68 = vector.shape_cast %67 : vector<1x32x256xf32> to vector<32x256xf32>
    %69 = vector.shape_cast %66 : vector<32x256xf32> to vector<1x32x256xf32>
    tpu.vector_store %arg8[%c0_44, %c0_45, %c0_46], %69 {strides = array<i32>} : memref<4x32x256xf32, #tpu.memory_space<vmem>>, vector<1x32x256xf32>,
    %c0_47 = arith.constant 0 : index
    %c0_48 = arith.constant 0 : index
    %c0_49 = arith.constant 0 : index
    %70 = vector.load %arg8[%c0_47, %c0_48, %c0_49] : memref<4x32x256xf32, #tpu.memory_space<vmem>>, vector<1x32x256xf32>
    %71 = vector.shape_cast %70 : vector<1x32x256xf32> to vector<32x256xf32>
    %cst_50 = arith.constant dense<0xFF800000> : vector<256xf32>
    %72 = vector.multi_reduction <maximumf>, %71, %cst_50 [0] : vector<32x256xf32> to vector<256xf32>
    %73 = vector.shape_cast %72 : vector<256xf32> to vector<1x256xf32>
    %c0_51 = arith.constant 0 : index
    %c51 = arith.constant 51 : index
    %74 = vector.load %arg9[%c0_51, %c51] : memref<4x384xf32, #tpu.memory_space<vmem>>, vector<1x256xf32>
    tpu.vector_store %arg9[%c0_51, %c51], %73 {strides = array<i32>} : memref<4x384xf32, #tpu.memory_space<vmem>>, vector<1x256xf32>,
    %cst_52 = arith.constant dense<0.000000e+00> : vector<1x256xf32>
    %75 = tpu.matmul %61, %71, %cst_52 {dimension_numbers = #tpu.dot_dimension_numbers<[1], [0], [0], [1], [0, 0, 1, 1], [], []>} : vector<1x32xf32>, vector<32x256xf32>, vector<1x256xf32> -> vector<1x256xf32>
    %cst_53 = arith.constant 3.125000e-02 : f32
    %76 = vector.broadcast %cst_53 : f32 to vector<1x256xf32>
    %77 = arith.mulf %75, %76 : vector<1x256xf32>
    %c0_54 = arith.constant 0 : index
    %c51_55 = arith.constant 51 : index
    %78 = vector.load %arg10[%c0_54, %c51_55] : memref<4x384xf32, #tpu.memory_space<vmem>>, vector<1x256xf32>
    tpu.vector_store %arg10[%c0_54, %c51_55], %77 {strides = array<i32>} : memref<4x384xf32, #tpu.memory_space<vmem>>, vector<1x256xf32>,
    %c1_56 = arith.constant 1 : index
    %c0_57 = arith.constant 0 : index
    %c0_58 = arith.constant 0 : index
    %79 = vector.load %arg3[%c1_56, %c0_57, %c0_58] : memref<4x32x256xf32, #tpu.memory_space<vmem>>, vector<1x32x256xf32>
    %80 = vector.shape_cast %79 : vector<1x32x256xf32> to vector<32x256xf32>
    %81 = vector.extract_strided_slice %54 {offsets = [0, 1], sizes = [32, 1], strides = [1, 1]} : vector<32x4xf32> to vector<32x1xf32>
    %82 = vector.broadcast %81 : vector<32x1xf32> to vector<32x256xf32>
    %83 = arith.mulf %80, %82 : vector<32x256xf32>
    %c1_59 = arith.constant 1 : index
    %c0_60 = arith.constant 0 : index
    %c0_61 = arith.constant 0 : index
    %84 = vector.load %arg8[%c1_59, %c0_60, %c0_61] : memref<4x32x256xf32, #tpu.memory_space<vmem>>, vector<1x32x256xf32>
    %85 = vector.shape_cast %84 : vector<1x32x256xf32> to vector<32x256xf32>
    %86 = vector.shape_cast %83 : vector<32x256xf32> to vector<1x32x256xf32>
    tpu.vector_store %arg8[%c1_59, %c0_60, %c0_61], %86 {strides = array<i32>} : memref<4x32x256xf32, #tpu.memory_space<vmem>>, vector<1x32x256xf32>,
    %c1_62 = arith.constant 1 : index
    %c0_63 = arith.constant 0 : index
    %c0_64 = arith.constant 0 : index
    %87 = vector.load %arg8[%c1_62, %c0_63, %c0_64] : memref<4x32x256xf32, #tpu.memory_space<vmem>>, vector<1x32x256xf32>
    %88 = vector.shape_cast %87 : vector<1x32x256xf32> to vector<32x256xf32>
    %cst_65 = arith.constant dense<0xFF800000> : vector<256xf32>
    %89 = vector.multi_reduction <maximumf>, %88, %cst_65 [0] : vector<32x256xf32> to vector<256xf32>
    %90 = vector.shape_cast %89 : vector<256xf32> to vector<1x256xf32>
    %c1_66 = arith.constant 1 : index
    %c51_67 = arith.constant 51 : index
    %91 = vector.load %arg9[%c1_66, %c51_67] : memref<4x384xf32, #tpu.memory_space<vmem>>, vector<1x256xf32>
    tpu.vector_store %arg9[%c1_66, %c51_67], %90 {strides = array<i32>} : memref<4x384xf32, #tpu.memory_space<vmem>>, vector<1x256xf32>,
    %cst_68 = arith.constant dense<0.000000e+00> : vector<1x256xf32>
    %92 = tpu.matmul %61, %88, %cst_68 {dimension_numbers = #tpu.dot_dimension_numbers<[1], [0], [0], [1], [0, 0, 1, 1], [], []>} : vector<1x32xf32>, vector<32x256xf32>, vector<1x256xf32> -> vector<1x256xf32>
    %cst_69 = arith.constant 3.125000e-02 : f32
    %93 = vector.broadcast %cst_69 : f32 to vector<1x256xf32>
    %94 = arith.mulf %92, %93 : vector<1x256xf32>
    %c1_70 = arith.constant 1 : index
    %c51_71 = arith.constant 51 : index
    %95 = vector.load %arg10[%c1_70, %c51_71] : memref<4x384xf32, #tpu.memory_space<vmem>>, vector<1x256xf32>
    tpu.vector_store %arg10[%c1_70, %c51_71], %94 {strides = array<i32>} : memref<4x384xf32, #tpu.memory_space<vmem>>, vector<1x256xf32>,
    %c2_72 = arith.constant 2 : index
    %c0_73 = arith.constant 0 : index
    %c0_74 = arith.constant 0 : index
    %96 = vector.load %arg3[%c2_72, %c0_73, %c0_74] : memref<4x32x256xf32, #tpu.memory_space<vmem>>, vector<1x32x256xf32>
    %97 = vector.shape_cast %96 : vector<1x32x256xf32> to vector<32x256xf32>
    %98 = vector.extract_strided_slice %54 {offsets = [0, 2], sizes = [32, 1], strides = [1, 1]} : vector<32x4xf32> to vector<32x1xf32>
    %99 = vector.broadcast %98 : vector<32x1xf32> to vector<32x256xf32>
    %100 = arith.mulf %97, %99 : vector<32x256xf32>
    %c2_75 = arith.constant 2 : index
    %c0_76 = arith.constant 0 : index
    %c0_77 = arith.constant 0 : index
    %101 = vector.load %arg8[%c2_75, %c0_76, %c0_77] : memref<4x32x256xf32, #tpu.memory_space<vmem>>, vector<1x32x256xf32>
    %102 = vector.shape_cast %101 : vector<1x32x256xf32> to vector<32x256xf32>
    %103 = vector.shape_cast %100 : vector<32x256xf32> to vector<1x32x256xf32>
    tpu.vector_store %arg8[%c2_75, %c0_76, %c0_77], %103 {strides = array<i32>} : memref<4x32x256xf32, #tpu.memory_space<vmem>>, vector<1x32x256xf32>,
    %c2_78 = arith.constant 2 : index
    %c0_79 = arith.constant 0 : index
    %c0_80 = arith.constant 0 : index
    %104 = vector.load %arg8[%c2_78, %c0_79, %c0_80] : memref<4x32x256xf32, #tpu.memory_space<vmem>>, vector<1x32x256xf32>
    %105 = vector.shape_cast %104 : vector<1x32x256xf32> to vector<32x256xf32>
    %cst_81 = arith.constant dense<0xFF800000> : vector<256xf32>
    %106 = vector.multi_reduction <maximumf>, %105, %cst_81 [0] : vector<32x256xf32> to vector<256xf32>
    %107 = vector.shape_cast %106 : vector<256xf32> to vector<1x256xf32>
    %c2_82 = arith.constant 2 : index
    %c51_83 = arith.constant 51 : index
    %108 = vector.load %arg9[%c2_82, %c51_83] : memref<4x384xf32, #tpu.memory_space<vmem>>, vector<1x256xf32>
    tpu.vector_store %arg9[%c2_82, %c51_83], %107 {strides = array<i32>} : memref<4x384xf32, #tpu.memory_space<vmem>>, vector<1x256xf32>,
    %cst_84 = arith.constant dense<0.000000e+00> : vector<1x256xf32>
    %109 = tpu.matmul %61, %105, %cst_84 {dimension_numbers = #tpu.dot_dimension_numbers<[1], [0], [0], [1], [0, 0, 1, 1], [], []>} : vector<1x32xf32>, vector<32x256xf32>, vector<1x256xf32> -> vector<1x256xf32>
    %cst_85 = arith.constant 3.125000e-02 : f32
    %110 = vector.broadcast %cst_85 : f32 to vector<1x256xf32>
    %111 = arith.mulf %109, %110 : vector<1x256xf32>
    %c2_86 = arith.constant 2 : index
    %c51_87 = arith.constant 51 : index
    %112 = vector.load %arg10[%c2_86, %c51_87] : memref<4x384xf32, #tpu.memory_space<vmem>>, vector<1x256xf32>
    tpu.vector_store %arg10[%c2_86, %c51_87], %111 {strides = array<i32>} : memref<4x384xf32, #tpu.memory_space<vmem>>, vector<1x256xf32>,
    %c3_88 = arith.constant 3 : index
    %c0_89 = arith.constant 0 : index
    %c0_90 = arith.constant 0 : index
    %113 = vector.load %arg3[%c3_88, %c0_89, %c0_90] : memref<4x32x256xf32, #tpu.memory_space<vmem>>, vector<1x32x256xf32>
    %114 = vector.shape_cast %113 : vector<1x32x256xf32> to vector<32x256xf32>
    %115 = vector.extract_strided_slice %54 {offsets = [0, 3], sizes = [32, 1], strides = [1, 1]} : vector<32x4xf32> to vector<32x1xf32>
    %116 = vector.broadcast %115 : vector<32x1xf32> to vector<32x256xf32>
    %117 = arith.mulf %114, %116 : vector<32x256xf32>
    %c3_91 = arith.constant 3 : index
    %c0_92 = arith.constant 0 : index
    %c0_93 = arith.constant 0 : index
    %118 = vector.load %arg8[%c3_91, %c0_92, %c0_93] : memref<4x32x256xf32, #tpu.memory_space<vmem>>, vector<1x32x256xf32>
    %119 = vector.shape_cast %118 : vector<1x32x256xf32> to vector<32x256xf32>
    %120 = vector.shape_cast %117 : vector<32x256xf32> to vector<1x32x256xf32>
    tpu.vector_store %arg8[%c3_91, %c0_92, %c0_93], %120 {strides = array<i32>} : memref<4x32x256xf32, #tpu.memory_space<vmem>>, vector<1x32x256xf32>,
    %c3_94 = arith.constant 3 : index
    %c0_95 = arith.constant 0 : index
    %c0_96 = arith.constant 0 : index
    %121 = vector.load %arg8[%c3_94, %c0_95, %c0_96] : memref<4x32x256xf32, #tpu.memory_space<vmem>>, vector<1x32x256xf32>
    %122 = vector.shape_cast %121 : vector<1x32x256xf32> to vector<32x256xf32>
    %cst_97 = arith.constant dense<0xFF800000> : vector<256xf32>
    %123 = vector.multi_reduction <maximumf>, %122, %cst_97 [0] : vector<32x256xf32> to vector<256xf32>
    %124 = vector.shape_cast %123 : vector<256xf32> to vector<1x256xf32>
    %c3_98 = arith.constant 3 : index
    %c51_99 = arith.constant 51 : index
    %125 = vector.load %arg9[%c3_98, %c51_99] : memref<4x384xf32, #tpu.memory_space<vmem>>, vector<1x256xf32>
    tpu.vector_store %arg9[%c3_98, %c51_99], %124 {strides = array<i32>} : memref<4x384xf32, #tpu.memory_space<vmem>>, vector<1x256xf32>,
    %cst_100 = arith.constant dense<0.000000e+00> : vector<1x256xf32>
    %126 = tpu.matmul %61, %122, %cst_100 {dimension_numbers = #tpu.dot_dimension_numbers<[1], [0], [0], [1], [0, 0, 1, 1], [], []>} : vector<1x32xf32>, vector<32x256xf32>, vector<1x256xf32> -> vector<1x256xf32>
    %cst_101 = arith.constant 3.125000e-02 : f32
    %127 = vector.broadcast %cst_101 : f32 to vector<1x256xf32>
    %128 = arith.mulf %126, %127 : vector<1x256xf32>
    %c3_102 = arith.constant 3 : index
    %c51_103 = arith.constant 51 : index
    %129 = vector.load %arg10[%c3_102, %c51_103] : memref<4x384xf32, #tpu.memory_space<vmem>>, vector<1x256xf32>
    tpu.vector_store %arg10[%c3_102, %c51_103], %128 {strides = array<i32>} : memref<4x384xf32, #tpu.memory_space<vmem>>, vector<1x256xf32>,
    %cst_104 = arith.constant 0.000000e+00 : f32
    %130 = vector.broadcast %cst_104 : f32 to vector<4x256xf32>
    %cst_105 = arith.constant 0.000000e+00 : f32
    %131 = vector.broadcast %cst_105 : f32 to vector<4x256xf32>
    %cst_106 = arith.constant 0.000000e+00 : f32
    %132 = vector.broadcast %cst_106 : f32 to vector<4x256xf32>
    %cst_107 = arith.constant 0.000000e+00 : f32
    %133 = vector.broadcast %cst_107 : f32 to vector<4x256xf32>
    %cst_108 = arith.constant 0.000000e+00 : f32
    %134 = vector.broadcast %cst_108 : f32 to vector<4x256xf32>
    %cst_109 = arith.constant 0.000000e+00 : f32
    %135 = vector.broadcast %cst_109 : f32 to vector<4x256xf32>
    %cst_110 = arith.constant 0.000000e+00 : f32
    %136 = vector.broadcast %cst_110 : f32 to vector<4x256xf32>
    %c0_111 = arith.constant 0 : index
    %137 = memref.load %arg1[%c0_111] : memref<100xf32, #tpu.memory_space<smem>>
    %c49 = arith.constant 49 : index
    %138 = memref.load %arg1[%c49] : memref<100xf32, #tpu.memory_space<smem>>
    %c0_112 = arith.constant 0 : index
    %c0_113 = arith.constant 0 : index
    %139 = vector.load %arg9[%c0_112, %c0_113] : memref<4x384xf32, #tpu.memory_space<vmem>>, vector<4x256xf32>
    %140 = vector.broadcast %137 : f32 to vector<4x256xf32>
    %141 = arith.mulf %140, %139 : vector<4x256xf32>
    %142 = arith.addf %130, %141 : vector<4x256xf32>
    %c0_114 = arith.constant 0 : index
    %c0_115 = arith.constant 0 : index
    %143 = vector.load %arg10[%c0_114, %c0_115] : memref<4x384xf32, #tpu.memory_space<vmem>>, vector<4x256xf32>
    %144 = vector.broadcast %138 : f32 to vector<4x256xf32>
    %145 = arith.mulf %144, %143 : vector<4x256xf32>
    %146 = arith.addf %142, %145 : vector<4x256xf32>
    %c1_116 = arith.constant 1 : index
    %147 = memref.load %arg1[%c1_116] : memref<100xf32, #tpu.memory_space<smem>>
    %c50 = arith.constant 50 : index
    %148 = memref.load %arg1[%c50] : memref<100xf32, #tpu.memory_space<smem>>
    %c0_117 = arith.constant 0 : index
    %c1_118 = arith.constant 1 : index
    %149 = vector.load %arg9[%c0_117, %c1_118] : memref<4x384xf32, #tpu.memory_space<vmem>>, vector<4x256xf32>
    %150 = vector.broadcast %147 : f32 to vector<4x256xf32>
    %151 = arith.mulf %150, %149 : vector<4x256xf32>
    %152 = arith.addf %131, %151 : vector<4x256xf32>
    %c0_119 = arith.constant 0 : index
    %c1_120 = arith.constant 1 : index
    %153 = vector.load %arg10[%c0_119, %c1_120] : memref<4x384xf32, #tpu.memory_space<vmem>>, vector<4x256xf32>
    %154 = vector.broadcast %148 : f32 to vector<4x256xf32>
    %155 = arith.mulf %154, %153 : vector<4x256xf32>
    %156 = arith.addf %152, %155 : vector<4x256xf32>
    %c2_121 = arith.constant 2 : index
    %157 = memref.load %arg1[%c2_121] : memref<100xf32, #tpu.memory_space<smem>>
    %c51_122 = arith.constant 51 : index
    %158 = memref.load %arg1[%c51_122] : memref<100xf32, #tpu.memory_space<smem>>
    %c0_123 = arith.constant 0 : index
    %c2_124 = arith.constant 2 : index
    %159 = vector.load %arg9[%c0_123, %c2_124] : memref<4x384xf32, #tpu.memory_space<vmem>>, vector<4x256xf32>
    %160 = vector.broadcast %157 : f32 to vector<4x256xf32>
    %161 = arith.mulf %160, %159 : vector<4x256xf32>
    %162 = arith.addf %132, %161 : vector<4x256xf32>
    %c0_125 = arith.constant 0 : index
    %c2_126 = arith.constant 2 : index
    %163 = vector.load %arg10[%c0_125, %c2_126] : memref<4x384xf32, #tpu.memory_space<vmem>>, vector<4x256xf32>
    %164 = vector.broadcast %158 : f32 to vector<4x256xf32>
    %165 = arith.mulf %164, %163 : vector<4x256xf32>
    %166 = arith.addf %162, %165 : vector<4x256xf32>
    %c3_127 = arith.constant 3 : index
    %167 = memref.load %arg1[%c3_127] : memref<100xf32, #tpu.memory_space<smem>>
    %c52 = arith.constant 52 : index
    %168 = memref.load %arg1[%c52] : memref<100xf32, #tpu.memory_space<smem>>
    %c0_128 = arith.constant 0 : index
    %c3_129 = arith.constant 3 : index
    %169 = vector.load %arg9[%c0_128, %c3_129] : memref<4x384xf32, #tpu.memory_space<vmem>>, vector<4x256xf32>
    %170 = vector.broadcast %167 : f32 to vector<4x256xf32>
    %171 = arith.mulf %170, %169 : vector<4x256xf32>
    %172 = arith.addf %133, %171 : vector<4x256xf32>
    %c0_130 = arith.constant 0 : index
    %c3_131 = arith.constant 3 : index
    %173 = vector.load %arg10[%c0_130, %c3_131] : memref<4x384xf32, #tpu.memory_space<vmem>>, vector<4x256xf32>
    %174 = vector.broadcast %168 : f32 to vector<4x256xf32>
    %175 = arith.mulf %174, %173 : vector<4x256xf32>
    %176 = arith.addf %172, %175 : vector<4x256xf32>
    %c4 = arith.constant 4 : index
    %177 = memref.load %arg1[%c4] : memref<100xf32, #tpu.memory_space<smem>>
    %c53 = arith.constant 53 : index
    %178 = memref.load %arg1[%c53] : memref<100xf32, #tpu.memory_space<smem>>
    %c0_132 = arith.constant 0 : index
    %c4_133 = arith.constant 4 : index
    %179 = vector.load %arg9[%c0_132, %c4_133] : memref<4x384xf32, #tpu.memory_space<vmem>>, vector<4x256xf32>
    %180 = vector.broadcast %177 : f32 to vector<4x256xf32>
    %181 = arith.mulf %180, %179 : vector<4x256xf32>
    %182 = arith.addf %134, %181 : vector<4x256xf32>
    %c0_134 = arith.constant 0 : index
    %c4_135 = arith.constant 4 : index
    %183 = vector.load %arg10[%c0_134, %c4_135] : memref<4x384xf32, #tpu.memory_space<vmem>>, vector<4x256xf32>
    %184 = vector.broadcast %178 : f32 to vector<4x256xf32>
    %185 = arith.mulf %184, %183 : vector<4x256xf32>
    %186 = arith.addf %182, %185 : vector<4x256xf32>
    %c5 = arith.constant 5 : index
    %187 = memref.load %arg1[%c5] : memref<100xf32, #tpu.memory_space<smem>>
    %c54 = arith.constant 54 : index
    %188 = memref.load %arg1[%c54] : memref<100xf32, #tpu.memory_space<smem>>
    %c0_136 = arith.constant 0 : index
    %c5_137 = arith.constant 5 : index
    %189 = vector.load %arg9[%c0_136, %c5_137] : memref<4x384xf32, #tpu.memory_space<vmem>>, vector<4x256xf32>
    %190 = vector.broadcast %187 : f32 to vector<4x256xf32>
    %191 = arith.mulf %190, %189 : vector<4x256xf32>
    %192 = arith.addf %135, %191 : vector<4x256xf32>
    %c0_138 = arith.constant 0 : index
    %c5_139 = arith.constant 5 : index
    %193 = vector.load %arg10[%c0_138, %c5_139] : memref<4x384xf32, #tpu.memory_space<vmem>>, vector<4x256xf32>
    %194 = vector.broadcast %188 : f32 to vector<4x256xf32>
    %195 = arith.mulf %194, %193 : vector<4x256xf32>
    %196 = arith.addf %192, %195 : vector<4x256xf32>
    %c6 = arith.constant 6 : index
    %197 = memref.load %arg1[%c6] : memref<100xf32, #tpu.memory_space<smem>>
    %c55 = arith.constant 55 : index
    %198 = memref.load %arg1[%c55] : memref<100xf32, #tpu.memory_space<smem>>
    %c0_140 = arith.constant 0 : index
    %c6_141 = arith.constant 6 : index
    %199 = vector.load %arg9[%c0_140, %c6_141] : memref<4x384xf32, #tpu.memory_space<vmem>>, vector<4x256xf32>
    %200 = vector.broadcast %197 : f32 to vector<4x256xf32>
    %201 = arith.mulf %200, %199 : vector<4x256xf32>
    %202 = arith.addf %136, %201 : vector<4x256xf32>
    %c0_142 = arith.constant 0 : index
    %c6_143 = arith.constant 6 : index
    %203 = vector.load %arg10[%c0_142, %c6_143] : memref<4x384xf32, #tpu.memory_space<vmem>>, vector<4x256xf32>
    %204 = vector.broadcast %198 : f32 to vector<4x256xf32>
    %205 = arith.mulf %204, %203 : vector<4x256xf32>
    %206 = arith.addf %202, %205 : vector<4x256xf32>
    %c7 = arith.constant 7 : index
    %207 = memref.load %arg1[%c7] : memref<100xf32, #tpu.memory_space<smem>>
    %c56 = arith.constant 56 : index
    %208 = memref.load %arg1[%c56] : memref<100xf32, #tpu.memory_space<smem>>
    %c0_144 = arith.constant 0 : index
    %c16 = arith.constant 16 : index
    %209 = vector.load %arg9[%c0_144, %c16] : memref<4x384xf32, #tpu.memory_space<vmem>>, vector<4x256xf32>
    %210 = vector.broadcast %207 : f32 to vector<4x256xf32>
    %211 = arith.mulf %210, %209 : vector<4x256xf32>
    %212 = arith.addf %146, %211 : vector<4x256xf32>
    %c0_145 = arith.constant 0 : index
    %c16_146 = arith.constant 16 : index
    %213 = vector.load %arg10[%c0_145, %c16_146] : memref<4x384xf32, #tpu.memory_space<vmem>>, vector<4x256xf32>
    %214 = vector.broadcast %208 : f32 to vector<4x256xf32>
    %215 = arith.mulf %214, %213 : vector<4x256xf32>
    %216 = arith.addf %212, %215 : vector<4x256xf32>
    %c8 = arith.constant 8 : index
    %217 = memref.load %arg1[%c8] : memref<100xf32, #tpu.memory_space<smem>>
    %c57 = arith.constant 57 : index
    %218 = memref.load %arg1[%c57] : memref<100xf32, #tpu.memory_space<smem>>
    %c0_147 = arith.constant 0 : index
    %c17 = arith.constant 17 : index
    %219 = vector.load %arg9[%c0_147, %c17] : memref<4x384xf32, #tpu.memory_space<vmem>>, vector<4x256xf32>
    %220 = vector.broadcast %217 : f32 to vector<4x256xf32>
    %221 = arith.mulf %220, %219 : vector<4x256xf32>
    %222 = arith.addf %156, %221 : vector<4x256xf32>
    %c0_148 = arith.constant 0 : index
    %c17_149 = arith.constant 17 : index
    %223 = vector.load %arg10[%c0_148, %c17_149] : memref<4x384xf32, #tpu.memory_space<vmem>>, vector<4x256xf32>
    %224 = vector.broadcast %218 : f32 to vector<4x256xf32>
    %225 = arith.mulf %224, %223 : vector<4x256xf32>
    %226 = arith.addf %222, %225 : vector<4x256xf32>
    %c9 = arith.constant 9 : index
    %227 = memref.load %arg1[%c9] : memref<100xf32, #tpu.memory_space<smem>>
    %c58 = arith.constant 58 : index
    %228 = memref.load %arg1[%c58] : memref<100xf32, #tpu.memory_space<smem>>
    %c0_150 = arith.constant 0 : index
    %c18 = arith.constant 18 : index
    %229 = vector.load %arg9[%c0_150, %c18] : memref<4x384xf32, #tpu.memory_space<vmem>>, vector<4x256xf32>
    %230 = vector.broadcast %227 : f32 to vector<4x256xf32>
    %231 = arith.mulf %230, %229 : vector<4x256xf32>
    %232 = arith.addf %166, %231 : vector<4x256xf32>
    %c0_151 = arith.constant 0 : index
    %c18_152 = arith.constant 18 : index
    %233 = vector.load %arg10[%c0_151, %c18_152] : memref<4x384xf32, #tpu.memory_space<vmem>>, vector<4x256xf32>
    %234 = vector.broadcast %228 : f32 to vector<4x256xf32>
    %235 = arith.mulf %234, %233 : vector<4x256xf32>
    %236 = arith.addf %232, %235 : vector<4x256xf32>
    %c10 = arith.constant 10 : index
    %237 = memref.load %arg1[%c10] : memref<100xf32, #tpu.memory_space<smem>>
    %c59 = arith.constant 59 : index
    %238 = memref.load %arg1[%c59] : memref<100xf32, #tpu.memory_space<smem>>
    %c0_153 = arith.constant 0 : index
    %c19 = arith.constant 19 : index
    %239 = vector.load %arg9[%c0_153, %c19] : memref<4x384xf32, #tpu.memory_space<vmem>>, vector<4x256xf32>
    %240 = vector.broadcast %237 : f32 to vector<4x256xf32>
    %241 = arith.mulf %240, %239 : vector<4x256xf32>
    %242 = arith.addf %176, %241 : vector<4x256xf32>
    %c0_154 = arith.constant 0 : index
    %c19_155 = arith.constant 19 : index
    %243 = vector.load %arg10[%c0_154, %c19_155] : memref<4x384xf32, #tpu.memory_space<vmem>>, vector<4x256xf32>
    %244 = vector.broadcast %238 : f32 to vector<4x256xf32>
    %245 = arith.mulf %244, %243 : vector<4x256xf32>
    %246 = arith.addf %242, %245 : vector<4x256xf32>
    %c11 = arith.constant 11 : index
    %247 = memref.load %arg1[%c11] : memref<100xf32, #tpu.memory_space<smem>>
    %c60 = arith.constant 60 : index
    %248 = memref.load %arg1[%c60] : memref<100xf32, #tpu.memory_space<smem>>
    %c0_156 = arith.constant 0 : index
    %c20 = arith.constant 20 : index
    %249 = vector.load %arg9[%c0_156, %c20] : memref<4x384xf32, #tpu.memory_space<vmem>>, vector<4x256xf32>
    %250 = vector.broadcast %247 : f32 to vector<4x256xf32>
    %251 = arith.mulf %250, %249 : vector<4x256xf32>
    %252 = arith.addf %186, %251 : vector<4x256xf32>
    %c0_157 = arith.constant 0 : index
    %c20_158 = arith.constant 20 : index
    %253 = vector.load %arg10[%c0_157, %c20_158] : memref<4x384xf32, #tpu.memory_space<vmem>>, vector<4x256xf32>
    %254 = vector.broadcast %248 : f32 to vector<4x256xf32>
    %255 = arith.mulf %254, %253 : vector<4x256xf32>
    %256 = arith.addf %252, %255 : vector<4x256xf32>
    %c12 = arith.constant 12 : index
    %257 = memref.load %arg1[%c12] : memref<100xf32, #tpu.memory_space<smem>>
    %c61 = arith.constant 61 : index
    %258 = memref.load %arg1[%c61] : memref<100xf32, #tpu.memory_space<smem>>
    %c0_159 = arith.constant 0 : index
    %c21 = arith.constant 21 : index
    %259 = vector.load %arg9[%c0_159, %c21] : memref<4x384xf32, #tpu.memory_space<vmem>>, vector<4x256xf32>
    %260 = vector.broadcast %257 : f32 to vector<4x256xf32>
    %261 = arith.mulf %260, %259 : vector<4x256xf32>
    %262 = arith.addf %196, %261 : vector<4x256xf32>
    %c0_160 = arith.constant 0 : index
    %c21_161 = arith.constant 21 : index
    %263 = vector.load %arg10[%c0_160, %c21_161] : memref<4x384xf32, #tpu.memory_space<vmem>>, vector<4x256xf32>
    %264 = vector.broadcast %258 : f32 to vector<4x256xf32>
    %265 = arith.mulf %264, %263 : vector<4x256xf32>
    %266 = arith.addf %262, %265 : vector<4x256xf32>
    %c13 = arith.constant 13 : index
    %267 = memref.load %arg1[%c13] : memref<100xf32, #tpu.memory_space<smem>>
    %c62 = arith.constant 62 : index
    %268 = memref.load %arg1[%c62] : memref<100xf32, #tpu.memory_space<smem>>
    %c0_162 = arith.constant 0 : index
    %c22 = arith.constant 22 : index
    %269 = vector.load %arg9[%c0_162, %c22] : memref<4x384xf32, #tpu.memory_space<vmem>>, vector<4x256xf32>
    %270 = vector.broadcast %267 : f32 to vector<4x256xf32>
    %271 = arith.mulf %270, %269 : vector<4x256xf32>
    %272 = arith.addf %206, %271 : vector<4x256xf32>
    %c0_163 = arith.constant 0 : index
    %c22_164 = arith.constant 22 : index
    %273 = vector.load %arg10[%c0_163, %c22_164] : memref<4x384xf32, #tpu.memory_space<vmem>>, vector<4x256xf32>
    %274 = vector.broadcast %268 : f32 to vector<4x256xf32>
    %275 = arith.mulf %274, %273 : vector<4x256xf32>
    %276 = arith.addf %272, %275 : vector<4x256xf32>
    %c14 = arith.constant 14 : index
    %277 = memref.load %arg1[%c14] : memref<100xf32, #tpu.memory_space<smem>>
    %c63 = arith.constant 63 : index
    %278 = memref.load %arg1[%c63] : memref<100xf32, #tpu.memory_space<smem>>
    %c0_165 = arith.constant 0 : index
    %c32 = arith.constant 32 : index
    %279 = vector.load %arg9[%c0_165, %c32] : memref<4x384xf32, #tpu.memory_space<vmem>>, vector<4x256xf32>
    %280 = vector.broadcast %277 : f32 to vector<4x256xf32>
    %281 = arith.mulf %280, %279 : vector<4x256xf32>
    %282 = arith.addf %216, %281 : vector<4x256xf32>
    %c0_166 = arith.constant 0 : index
    %c32_167 = arith.constant 32 : index
    %283 = vector.load %arg10[%c0_166, %c32_167] : memref<4x384xf32, #tpu.memory_space<vmem>>, vector<4x256xf32>
    %284 = vector.broadcast %278 : f32 to vector<4x256xf32>
    %285 = arith.mulf %284, %283 : vector<4x256xf32>
    %286 = arith.addf %282, %285 : vector<4x256xf32>
    %c15 = arith.constant 15 : index
    %287 = memref.load %arg1[%c15] : memref<100xf32, #tpu.memory_space<smem>>
    %c64 = arith.constant 64 : index
    %288 = memref.load %arg1[%c64] : memref<100xf32, #tpu.memory_space<smem>>
    %c0_168 = arith.constant 0 : index
    %c33 = arith.constant 33 : index
    %289 = vector.load %arg9[%c0_168, %c33] : memref<4x384xf32, #tpu.memory_space<vmem>>, vector<4x256xf32>
    %290 = vector.broadcast %287 : f32 to vector<4x256xf32>
    %291 = arith.mulf %290, %289 : vector<4x256xf32>
    %292 = arith.addf %226, %291 : vector<4x256xf32>
    %c0_169 = arith.constant 0 : index
    %c33_170 = arith.constant 33 : index
    %293 = vector.load %arg10[%c0_169, %c33_170] : memref<4x384xf32, #tpu.memory_space<vmem>>, vector<4x256xf32>
    %294 = vector.broadcast %288 : f32 to vector<4x256xf32>
    %295 = arith.mulf %294, %293 : vector<4x256xf32>
    %296 = arith.addf %292, %295 : vector<4x256xf32>
    %c16_171 = arith.constant 16 : index
    %297 = memref.load %arg1[%c16_171] : memref<100xf32, #tpu.memory_space<smem>>
    %c65 = arith.constant 65 : index
    %298 = memref.load %arg1[%c65] : memref<100xf32, #tpu.memory_space<smem>>
    %c0_172 = arith.constant 0 : index
    %c34 = arith.constant 34 : index
    %299 = vector.load %arg9[%c0_172, %c34] : memref<4x384xf32, #tpu.memory_space<vmem>>, vector<4x256xf32>
    %300 = vector.broadcast %297 : f32 to vector<4x256xf32>
    %301 = arith.mulf %300, %299 : vector<4x256xf32>
    %302 = arith.addf %236, %301 : vector<4x256xf32>
    %c0_173 = arith.constant 0 : index
    %c34_174 = arith.constant 34 : index
    %303 = vector.load %arg10[%c0_173, %c34_174] : memref<4x384xf32, #tpu.memory_space<vmem>>, vector<4x256xf32>
    %304 = vector.broadcast %298 : f32 to vector<4x256xf32>
    %305 = arith.mulf %304, %303 : vector<4x256xf32>
    %306 = arith.addf %302, %305 : vector<4x256xf32>
    %c17_175 = arith.constant 17 : index
    %307 = memref.load %arg1[%c17_175] : memref<100xf32, #tpu.memory_space<smem>>
    %c66 = arith.constant 66 : index
    %308 = memref.load %arg1[%c66] : memref<100xf32, #tpu.memory_space<smem>>
    %c0_176 = arith.constant 0 : index
    %c35 = arith.constant 35 : index
    %309 = vector.load %arg9[%c0_176, %c35] : memref<4x384xf32, #tpu.memory_space<vmem>>, vector<4x256xf32>
    %310 = vector.broadcast %307 : f32 to vector<4x256xf32>
    %311 = arith.mulf %310, %309 : vector<4x256xf32>
    %312 = arith.addf %246, %311 : vector<4x256xf32>
    %c0_177 = arith.constant 0 : index
    %c35_178 = arith.constant 35 : index
    %313 = vector.load %arg10[%c0_177, %c35_178] : memref<4x384xf32, #tpu.memory_space<vmem>>, vector<4x256xf32>
    %314 = vector.broadcast %308 : f32 to vector<4x256xf32>
    %315 = arith.mulf %314, %313 : vector<4x256xf32>
    %316 = arith.addf %312, %315 : vector<4x256xf32>
    %c18_179 = arith.constant 18 : index
    %317 = memref.load %arg1[%c18_179] : memref<100xf32, #tpu.memory_space<smem>>
    %c67 = arith.constant 67 : index
    %318 = memref.load %arg1[%c67] : memref<100xf32, #tpu.memory_space<smem>>
    %c0_180 = arith.constant 0 : index
    %c36 = arith.constant 36 : index
    %319 = vector.load %arg9[%c0_180, %c36] : memref<4x384xf32, #tpu.memory_space<vmem>>, vector<4x256xf32>
    %320 = vector.broadcast %317 : f32 to vector<4x256xf32>
    %321 = arith.mulf %320, %319 : vector<4x256xf32>
    %322 = arith.addf %256, %321 : vector<4x256xf32>
    %c0_181 = arith.constant 0 : index
    %c36_182 = arith.constant 36 : index
    %323 = vector.load %arg10[%c0_181, %c36_182] : memref<4x384xf32, #tpu.memory_space<vmem>>, vector<4x256xf32>
    %324 = vector.broadcast %318 : f32 to vector<4x256xf32>
    %325 = arith.mulf %324, %323 : vector<4x256xf32>
    %326 = arith.addf %322, %325 : vector<4x256xf32>
    %c19_183 = arith.constant 19 : index
    %327 = memref.load %arg1[%c19_183] : memref<100xf32, #tpu.memory_space<smem>>
    %c68 = arith.constant 68 : index
    %328 = memref.load %arg1[%c68] : memref<100xf32, #tpu.memory_space<smem>>
    %c0_184 = arith.constant 0 : index
    %c37 = arith.constant 37 : index
    %329 = vector.load %arg9[%c0_184, %c37] : memref<4x384xf32, #tpu.memory_space<vmem>>, vector<4x256xf32>
    %330 = vector.broadcast %327 : f32 to vector<4x256xf32>
    %331 = arith.mulf %330, %329 : vector<4x256xf32>
    %332 = arith.addf %266, %331 : vector<4x256xf32>
    %c0_185 = arith.constant 0 : index
    %c37_186 = arith.constant 37 : index
    %333 = vector.load %arg10[%c0_185, %c37_186] : memref<4x384xf32, #tpu.memory_space<vmem>>, vector<4x256xf32>
    %334 = vector.broadcast %328 : f32 to vector<4x256xf32>
    %335 = arith.mulf %334, %333 : vector<4x256xf32>
    %336 = arith.addf %332, %335 : vector<4x256xf32>
    %c20_187 = arith.constant 20 : index
    %337 = memref.load %arg1[%c20_187] : memref<100xf32, #tpu.memory_space<smem>>
    %c69 = arith.constant 69 : index
    %338 = memref.load %arg1[%c69] : memref<100xf32, #tpu.memory_space<smem>>
    %c0_188 = arith.constant 0 : index
    %c38 = arith.constant 38 : index
    %339 = vector.load %arg9[%c0_188, %c38] : memref<4x384xf32, #tpu.memory_space<vmem>>, vector<4x256xf32>
    %340 = vector.broadcast %337 : f32 to vector<4x256xf32>
    %341 = arith.mulf %340, %339 : vector<4x256xf32>
    %342 = arith.addf %276, %341 : vector<4x256xf32>
    %c0_189 = arith.constant 0 : index
    %c38_190 = arith.constant 38 : index
    %343 = vector.load %arg10[%c0_189, %c38_190] : memref<4x384xf32, #tpu.memory_space<vmem>>, vector<4x256xf32>
    %344 = vector.broadcast %338 : f32 to vector<4x256xf32>
    %345 = arith.mulf %344, %343 : vector<4x256xf32>
    %346 = arith.addf %342, %345 : vector<4x256xf32>
    %c21_191 = arith.constant 21 : index
    %347 = memref.load %arg1[%c21_191] : memref<100xf32, #tpu.memory_space<smem>>
    %c70 = arith.constant 70 : index
    %348 = memref.load %arg1[%c70] : memref<100xf32, #tpu.memory_space<smem>>
    %c0_192 = arith.constant 0 : index
    %c48 = arith.constant 48 : index
    %349 = vector.load %arg9[%c0_192, %c48] : memref<4x384xf32, #tpu.memory_space<vmem>>, vector<4x256xf32>
    %350 = vector.broadcast %347 : f32 to vector<4x256xf32>
    %351 = arith.mulf %350, %349 : vector<4x256xf32>
    %352 = arith.addf %286, %351 : vector<4x256xf32>
    %c0_193 = arith.constant 0 : index
    %c48_194 = arith.constant 48 : index
    %353 = vector.load %arg10[%c0_193, %c48_194] : memref<4x384xf32, #tpu.memory_space<vmem>>, vector<4x256xf32>
    %354 = vector.broadcast %348 : f32 to vector<4x256xf32>
    %355 = arith.mulf %354, %353 : vector<4x256xf32>
    %356 = arith.addf %352, %355 : vector<4x256xf32>
    %c22_195 = arith.constant 22 : index
    %357 = memref.load %arg1[%c22_195] : memref<100xf32, #tpu.memory_space<smem>>
    %c71 = arith.constant 71 : index
    %358 = memref.load %arg1[%c71] : memref<100xf32, #tpu.memory_space<smem>>
    %c0_196 = arith.constant 0 : index
    %c49_197 = arith.constant 49 : index
    %359 = vector.load %arg9[%c0_196, %c49_197] : memref<4x384xf32, #tpu.memory_space<vmem>>, vector<4x256xf32>
    %360 = vector.broadcast %357 : f32 to vector<4x256xf32>
    %361 = arith.mulf %360, %359 : vector<4x256xf32>
    %362 = arith.addf %296, %361 : vector<4x256xf32>
    %c0_198 = arith.constant 0 : index
    %c49_199 = arith.constant 49 : index
    %363 = vector.load %arg10[%c0_198, %c49_199] : memref<4x384xf32, #tpu.memory_space<vmem>>, vector<4x256xf32>
    %364 = vector.broadcast %358 : f32 to vector<4x256xf32>
    %365 = arith.mulf %364, %363 : vector<4x256xf32>
    %366 = arith.addf %362, %365 : vector<4x256xf32>
    %c23 = arith.constant 23 : index
    %367 = memref.load %arg1[%c23] : memref<100xf32, #tpu.memory_space<smem>>
    %c72 = arith.constant 72 : index
    %368 = memref.load %arg1[%c72] : memref<100xf32, #tpu.memory_space<smem>>
    %c0_200 = arith.constant 0 : index
    %c50_201 = arith.constant 50 : index
    %369 = vector.load %arg9[%c0_200, %c50_201] : memref<4x384xf32, #tpu.memory_space<vmem>>, vector<4x256xf32>
    %370 = vector.broadcast %367 : f32 to vector<4x256xf32>
    %371 = arith.mulf %370, %369 : vector<4x256xf32>
    %372 = arith.addf %306, %371 : vector<4x256xf32>
    %c0_202 = arith.constant 0 : index
    %c50_203 = arith.constant 50 : index
    %373 = vector.load %arg10[%c0_202, %c50_203] : memref<4x384xf32, #tpu.memory_space<vmem>>, vector<4x256xf32>
    %374 = vector.broadcast %368 : f32 to vector<4x256xf32>
    %375 = arith.mulf %374, %373 : vector<4x256xf32>
    %376 = arith.addf %372, %375 : vector<4x256xf32>
    %c24 = arith.constant 24 : index
    %377 = memref.load %arg1[%c24] : memref<100xf32, #tpu.memory_space<smem>>
    %c73 = arith.constant 73 : index
    %378 = memref.load %arg1[%c73] : memref<100xf32, #tpu.memory_space<smem>>
    %c0_204 = arith.constant 0 : index
    %c51_205 = arith.constant 51 : index
    %379 = vector.load %arg9[%c0_204, %c51_205] : memref<4x384xf32, #tpu.memory_space<vmem>>, vector<4x256xf32>
    %380 = vector.broadcast %377 : f32 to vector<4x256xf32>
    %381 = arith.mulf %380, %379 : vector<4x256xf32>
    %382 = arith.addf %316, %381 : vector<4x256xf32>
    %c0_206 = arith.constant 0 : index
    %c51_207 = arith.constant 51 : index
    %383 = vector.load %arg10[%c0_206, %c51_207] : memref<4x384xf32, #tpu.memory_space<vmem>>, vector<4x256xf32>
    %384 = vector.broadcast %378 : f32 to vector<4x256xf32>
    %385 = arith.mulf %384, %383 : vector<4x256xf32>
    %386 = arith.addf %382, %385 : vector<4x256xf32>
    %c25 = arith.constant 25 : index
    %387 = memref.load %arg1[%c25] : memref<100xf32, #tpu.memory_space<smem>>
    %c74 = arith.constant 74 : index
    %388 = memref.load %arg1[%c74] : memref<100xf32, #tpu.memory_space<smem>>
    %c0_208 = arith.constant 0 : index
    %c52_209 = arith.constant 52 : index
    %389 = vector.load %arg9[%c0_208, %c52_209] : memref<4x384xf32, #tpu.memory_space<vmem>>, vector<4x256xf32>
    %390 = vector.broadcast %387 : f32 to vector<4x256xf32>
    %391 = arith.mulf %390, %389 : vector<4x256xf32>
    %392 = arith.addf %326, %391 : vector<4x256xf32>
    %c0_210 = arith.constant 0 : index
    %c52_211 = arith.constant 52 : index
    %393 = vector.load %arg10[%c0_210, %c52_211] : memref<4x384xf32, #tpu.memory_space<vmem>>, vector<4x256xf32>
    %394 = vector.broadcast %388 : f32 to vector<4x256xf32>
    %395 = arith.mulf %394, %393 : vector<4x256xf32>
    %396 = arith.addf %392, %395 : vector<4x256xf32>
    %c26 = arith.constant 26 : index
    %397 = memref.load %arg1[%c26] : memref<100xf32, #tpu.memory_space<smem>>
    %c75 = arith.constant 75 : index
    %398 = memref.load %arg1[%c75] : memref<100xf32, #tpu.memory_space<smem>>
    %c0_212 = arith.constant 0 : index
    %c53_213 = arith.constant 53 : index
    %399 = vector.load %arg9[%c0_212, %c53_213] : memref<4x384xf32, #tpu.memory_space<vmem>>, vector<4x256xf32>
    %400 = vector.broadcast %397 : f32 to vector<4x256xf32>
    %401 = arith.mulf %400, %399 : vector<4x256xf32>
    %402 = arith.addf %336, %401 : vector<4x256xf32>
    %c0_214 = arith.constant 0 : index
    %c53_215 = arith.constant 53 : index
    %403 = vector.load %arg10[%c0_214, %c53_215] : memref<4x384xf32, #tpu.memory_space<vmem>>, vector<4x256xf32>
    %404 = vector.broadcast %398 : f32 to vector<4x256xf32>
    %405 = arith.mulf %404, %403 : vector<4x256xf32>
    %406 = arith.addf %402, %405 : vector<4x256xf32>
    %c27 = arith.constant 27 : index
    %407 = memref.load %arg1[%c27] : memref<100xf32, #tpu.memory_space<smem>>
    %c76 = arith.constant 76 : index
    %408 = memref.load %arg1[%c76] : memref<100xf32, #tpu.memory_space<smem>>
    %c0_216 = arith.constant 0 : index
    %c54_217 = arith.constant 54 : index
    %409 = vector.load %arg9[%c0_216, %c54_217] : memref<4x384xf32, #tpu.memory_space<vmem>>, vector<4x256xf32>
    %410 = vector.broadcast %407 : f32 to vector<4x256xf32>
    %411 = arith.mulf %410, %409 : vector<4x256xf32>
    %412 = arith.addf %346, %411 : vector<4x256xf32>
    %c0_218 = arith.constant 0 : index
    %c54_219 = arith.constant 54 : index
    %413 = vector.load %arg10[%c0_218, %c54_219] : memref<4x384xf32, #tpu.memory_space<vmem>>, vector<4x256xf32>
    %414 = vector.broadcast %408 : f32 to vector<4x256xf32>
    %415 = arith.mulf %414, %413 : vector<4x256xf32>
    %416 = arith.addf %412, %415 : vector<4x256xf32>
    %c28 = arith.constant 28 : index
    %417 = memref.load %arg1[%c28] : memref<100xf32, #tpu.memory_space<smem>>
    %c77 = arith.constant 77 : index
    %418 = memref.load %arg1[%c77] : memref<100xf32, #tpu.memory_space<smem>>
    %c0_220 = arith.constant 0 : index
    %c64_221 = arith.constant 64 : index
    %419 = vector.load %arg9[%c0_220, %c64_221] : memref<4x384xf32, #tpu.memory_space<vmem>>, vector<4x256xf32>
    %420 = vector.broadcast %417 : f32 to vector<4x256xf32>
    %421 = arith.mulf %420, %419 : vector<4x256xf32>
    %422 = arith.addf %356, %421 : vector<4x256xf32>
    %c0_222 = arith.constant 0 : index
    %c64_223 = arith.constant 64 : index
    %423 = vector.load %arg10[%c0_222, %c64_223] : memref<4x384xf32, #tpu.memory_space<vmem>>, vector<4x256xf32>
    %424 = vector.broadcast %418 : f32 to vector<4x256xf32>
    %425 = arith.mulf %424, %423 : vector<4x256xf32>
    %426 = arith.addf %422, %425 : vector<4x256xf32>
    %c29 = arith.constant 29 : index
    %427 = memref.load %arg1[%c29] : memref<100xf32, #tpu.memory_space<smem>>
    %c78 = arith.constant 78 : index
    %428 = memref.load %arg1[%c78] : memref<100xf32, #tpu.memory_space<smem>>
    %c0_224 = arith.constant 0 : index
    %c65_225 = arith.constant 65 : index
    %429 = vector.load %arg9[%c0_224, %c65_225] : memref<4x384xf32, #tpu.memory_space<vmem>>, vector<4x256xf32>
    %430 = vector.broadcast %427 : f32 to vector<4x256xf32>
    %431 = arith.mulf %430, %429 : vector<4x256xf32>
    %432 = arith.addf %366, %431 : vector<4x256xf32>
    %c0_226 = arith.constant 0 : index
    %c65_227 = arith.constant 65 : index
    %433 = vector.load %arg10[%c0_226, %c65_227] : memref<4x384xf32, #tpu.memory_space<vmem>>, vector<4x256xf32>
    %434 = vector.broadcast %428 : f32 to vector<4x256xf32>
    %435 = arith.mulf %434, %433 : vector<4x256xf32>
    %436 = arith.addf %432, %435 : vector<4x256xf32>
    %c30 = arith.constant 30 : index
    %437 = memref.load %arg1[%c30] : memref<100xf32, #tpu.memory_space<smem>>
    %c79 = arith.constant 79 : index
    %438 = memref.load %arg1[%c79] : memref<100xf32, #tpu.memory_space<smem>>
    %c0_228 = arith.constant 0 : index
    %c66_229 = arith.constant 66 : index
    %439 = vector.load %arg9[%c0_228, %c66_229] : memref<4x384xf32, #tpu.memory_space<vmem>>, vector<4x256xf32>
    %440 = vector.broadcast %437 : f32 to vector<4x256xf32>
    %441 = arith.mulf %440, %439 : vector<4x256xf32>
    %442 = arith.addf %376, %441 : vector<4x256xf32>
    %c0_230 = arith.constant 0 : index
    %c66_231 = arith.constant 66 : index
    %443 = vector.load %arg10[%c0_230, %c66_231] : memref<4x384xf32, #tpu.memory_space<vmem>>, vector<4x256xf32>
    %444 = vector.broadcast %438 : f32 to vector<4x256xf32>
    %445 = arith.mulf %444, %443 : vector<4x256xf32>
    %446 = arith.addf %442, %445 : vector<4x256xf32>
    %c31 = arith.constant 31 : index
    %447 = memref.load %arg1[%c31] : memref<100xf32, #tpu.memory_space<smem>>
    %c80 = arith.constant 80 : index
    %448 = memref.load %arg1[%c80] : memref<100xf32, #tpu.memory_space<smem>>
    %c0_232 = arith.constant 0 : index
    %c67_233 = arith.constant 67 : index
    %449 = vector.load %arg9[%c0_232, %c67_233] : memref<4x384xf32, #tpu.memory_space<vmem>>, vector<4x256xf32>
    %450 = vector.broadcast %447 : f32 to vector<4x256xf32>
    %451 = arith.mulf %450, %449 : vector<4x256xf32>
    %452 = arith.addf %386, %451 : vector<4x256xf32>
    %c0_234 = arith.constant 0 : index
    %c67_235 = arith.constant 67 : index
    %453 = vector.load %arg10[%c0_234, %c67_235] : memref<4x384xf32, #tpu.memory_space<vmem>>, vector<4x256xf32>
    %454 = vector.broadcast %448 : f32 to vector<4x256xf32>
    %455 = arith.mulf %454, %453 : vector<4x256xf32>
    %456 = arith.addf %452, %455 : vector<4x256xf32>
    %c32_236 = arith.constant 32 : index
    %457 = memref.load %arg1[%c32_236] : memref<100xf32, #tpu.memory_space<smem>>
    %c81 = arith.constant 81 : index
    %458 = memref.load %arg1[%c81] : memref<100xf32, #tpu.memory_space<smem>>
    %c0_237 = arith.constant 0 : index
    %c68_238 = arith.constant 68 : index
    %459 = vector.load %arg9[%c0_237, %c68_238] : memref<4x384xf32, #tpu.memory_space<vmem>>, vector<4x256xf32>
    %460 = vector.broadcast %457 : f32 to vector<4x256xf32>
    %461 = arith.mulf %460, %459 : vector<4x256xf32>
    %462 = arith.addf %396, %461 : vector<4x256xf32>
    %c0_239 = arith.constant 0 : index
    %c68_240 = arith.constant 68 : index
    %463 = vector.load %arg10[%c0_239, %c68_240] : memref<4x384xf32, #tpu.memory_space<vmem>>, vector<4x256xf32>
    %464 = vector.broadcast %458 : f32 to vector<4x256xf32>
    %465 = arith.mulf %464, %463 : vector<4x256xf32>
    %466 = arith.addf %462, %465 : vector<4x256xf32>
    %c33_241 = arith.constant 33 : index
    %467 = memref.load %arg1[%c33_241] : memref<100xf32, #tpu.memory_space<smem>>
    %c82 = arith.constant 82 : index
    %468 = memref.load %arg1[%c82] : memref<100xf32, #tpu.memory_space<smem>>
    %c0_242 = arith.constant 0 : index
    %c69_243 = arith.constant 69 : index
    %469 = vector.load %arg9[%c0_242, %c69_243] : memref<4x384xf32, #tpu.memory_space<vmem>>, vector<4x256xf32>
    %470 = vector.broadcast %467 : f32 to vector<4x256xf32>
    %471 = arith.mulf %470, %469 : vector<4x256xf32>
    %472 = arith.addf %406, %471 : vector<4x256xf32>
    %c0_244 = arith.constant 0 : index
    %c69_245 = arith.constant 69 : index
    %473 = vector.load %arg10[%c0_244, %c69_245] : memref<4x384xf32, #tpu.memory_space<vmem>>, vector<4x256xf32>
    %474 = vector.broadcast %468 : f32 to vector<4x256xf32>
    %475 = arith.mulf %474, %473 : vector<4x256xf32>
    %476 = arith.addf %472, %475 : vector<4x256xf32>
    %c34_246 = arith.constant 34 : index
    %477 = memref.load %arg1[%c34_246] : memref<100xf32, #tpu.memory_space<smem>>
    %c83 = arith.constant 83 : index
    %478 = memref.load %arg1[%c83] : memref<100xf32, #tpu.memory_space<smem>>
    %c0_247 = arith.constant 0 : index
    %c70_248 = arith.constant 70 : index
    %479 = vector.load %arg9[%c0_247, %c70_248] : memref<4x384xf32, #tpu.memory_space<vmem>>, vector<4x256xf32>
    %480 = vector.broadcast %477 : f32 to vector<4x256xf32>
    %481 = arith.mulf %480, %479 : vector<4x256xf32>
    %482 = arith.addf %416, %481 : vector<4x256xf32>
    %c0_249 = arith.constant 0 : index
    %c70_250 = arith.constant 70 : index
    %483 = vector.load %arg10[%c0_249, %c70_250] : memref<4x384xf32, #tpu.memory_space<vmem>>, vector<4x256xf32>
    %484 = vector.broadcast %478 : f32 to vector<4x256xf32>
    %485 = arith.mulf %484, %483 : vector<4x256xf32>
    %486 = arith.addf %482, %485 : vector<4x256xf32>
    %c35_251 = arith.constant 35 : index
    %487 = memref.load %arg1[%c35_251] : memref<100xf32, #tpu.memory_space<smem>>
    %c84 = arith.constant 84 : index
    %488 = memref.load %arg1[%c84] : memref<100xf32, #tpu.memory_space<smem>>
    %c0_252 = arith.constant 0 : index
    %c80_253 = arith.constant 80 : index
    %489 = vector.load %arg9[%c0_252, %c80_253] : memref<4x384xf32, #tpu.memory_space<vmem>>, vector<4x256xf32>
    %490 = vector.broadcast %487 : f32 to vector<4x256xf32>
    %491 = arith.mulf %490, %489 : vector<4x256xf32>
    %492 = arith.addf %426, %491 : vector<4x256xf32>
    %c0_254 = arith.constant 0 : index
    %c80_255 = arith.constant 80 : index
    %493 = vector.load %arg10[%c0_254, %c80_255] : memref<4x384xf32, #tpu.memory_space<vmem>>, vector<4x256xf32>
    %494 = vector.broadcast %488 : f32 to vector<4x256xf32>
    %495 = arith.mulf %494, %493 : vector<4x256xf32>
    %496 = arith.addf %492, %495 : vector<4x256xf32>
    %c36_256 = arith.constant 36 : index
    %497 = memref.load %arg1[%c36_256] : memref<100xf32, #tpu.memory_space<smem>>
    %c85 = arith.constant 85 : index
    %498 = memref.load %arg1[%c85] : memref<100xf32, #tpu.memory_space<smem>>
    %c0_257 = arith.constant 0 : index
    %c81_258 = arith.constant 81 : index
    %499 = vector.load %arg9[%c0_257, %c81_258] : memref<4x384xf32, #tpu.memory_space<vmem>>, vector<4x256xf32>
    %500 = vector.broadcast %497 : f32 to vector<4x256xf32>
    %501 = arith.mulf %500, %499 : vector<4x256xf32>
    %502 = arith.addf %436, %501 : vector<4x256xf32>
    %c0_259 = arith.constant 0 : index
    %c81_260 = arith.constant 81 : index
    %503 = vector.load %arg10[%c0_259, %c81_260] : memref<4x384xf32, #tpu.memory_space<vmem>>, vector<4x256xf32>
    %504 = vector.broadcast %498 : f32 to vector<4x256xf32>
    %505 = arith.mulf %504, %503 : vector<4x256xf32>
    %506 = arith.addf %502, %505 : vector<4x256xf32>
    %c37_261 = arith.constant 37 : index
    %507 = memref.load %arg1[%c37_261] : memref<100xf32, #tpu.memory_space<smem>>
    %c86 = arith.constant 86 : index
    %508 = memref.load %arg1[%c86] : memref<100xf32, #tpu.memory_space<smem>>
    %c0_262 = arith.constant 0 : index
    %c82_263 = arith.constant 82 : index
    %509 = vector.load %arg9[%c0_262, %c82_263] : memref<4x384xf32, #tpu.memory_space<vmem>>, vector<4x256xf32>
    %510 = vector.broadcast %507 : f32 to vector<4x256xf32>
    %511 = arith.mulf %510, %509 : vector<4x256xf32>
    %512 = arith.addf %446, %511 : vector<4x256xf32>
    %c0_264 = arith.constant 0 : index
    %c82_265 = arith.constant 82 : index
    %513 = vector.load %arg10[%c0_264, %c82_265] : memref<4x384xf32, #tpu.memory_space<vmem>>, vector<4x256xf32>
    %514 = vector.broadcast %508 : f32 to vector<4x256xf32>
    %515 = arith.mulf %514, %513 : vector<4x256xf32>
    %516 = arith.addf %512, %515 : vector<4x256xf32>
    %c38_266 = arith.constant 38 : index
    %517 = memref.load %arg1[%c38_266] : memref<100xf32, #tpu.memory_space<smem>>
    %c87 = arith.constant 87 : index
    %518 = memref.load %arg1[%c87] : memref<100xf32, #tpu.memory_space<smem>>
    %c0_267 = arith.constant 0 : index
    %c83_268 = arith.constant 83 : index
    %519 = vector.load %arg9[%c0_267, %c83_268] : memref<4x384xf32, #tpu.memory_space<vmem>>, vector<4x256xf32>
    %520 = vector.broadcast %517 : f32 to vector<4x256xf32>
    %521 = arith.mulf %520, %519 : vector<4x256xf32>
    %522 = arith.addf %456, %521 : vector<4x256xf32>
    %c0_269 = arith.constant 0 : index
    %c83_270 = arith.constant 83 : index
    %523 = vector.load %arg10[%c0_269, %c83_270] : memref<4x384xf32, #tpu.memory_space<vmem>>, vector<4x256xf32>
    %524 = vector.broadcast %518 : f32 to vector<4x256xf32>
    %525 = arith.mulf %524, %523 : vector<4x256xf32>
    %526 = arith.addf %522, %525 : vector<4x256xf32>
    %c39 = arith.constant 39 : index
    %527 = memref.load %arg1[%c39] : memref<100xf32, #tpu.memory_space<smem>>
    %c88 = arith.constant 88 : index
    %528 = memref.load %arg1[%c88] : memref<100xf32, #tpu.memory_space<smem>>
    %c0_271 = arith.constant 0 : index
    %c84_272 = arith.constant 84 : index
    %529 = vector.load %arg9[%c0_271, %c84_272] : memref<4x384xf32, #tpu.memory_space<vmem>>, vector<4x256xf32>
    %530 = vector.broadcast %527 : f32 to vector<4x256xf32>
    %531 = arith.mulf %530, %529 : vector<4x256xf32>
    %532 = arith.addf %466, %531 : vector<4x256xf32>
    %c0_273 = arith.constant 0 : index
    %c84_274 = arith.constant 84 : index
    %533 = vector.load %arg10[%c0_273, %c84_274] : memref<4x384xf32, #tpu.memory_space<vmem>>, vector<4x256xf32>
    %534 = vector.broadcast %528 : f32 to vector<4x256xf32>
    %535 = arith.mulf %534, %533 : vector<4x256xf32>
    %536 = arith.addf %532, %535 : vector<4x256xf32>
    %c40 = arith.constant 40 : index
    %537 = memref.load %arg1[%c40] : memref<100xf32, #tpu.memory_space<smem>>
    %c89 = arith.constant 89 : index
    %538 = memref.load %arg1[%c89] : memref<100xf32, #tpu.memory_space<smem>>
    %c0_275 = arith.constant 0 : index
    %c85_276 = arith.constant 85 : index
    %539 = vector.load %arg9[%c0_275, %c85_276] : memref<4x384xf32, #tpu.memory_space<vmem>>, vector<4x256xf32>
    %540 = vector.broadcast %537 : f32 to vector<4x256xf32>
    %541 = arith.mulf %540, %539 : vector<4x256xf32>
    %542 = arith.addf %476, %541 : vector<4x256xf32>
    %c0_277 = arith.constant 0 : index
    %c85_278 = arith.constant 85 : index
    %543 = vector.load %arg10[%c0_277, %c85_278] : memref<4x384xf32, #tpu.memory_space<vmem>>, vector<4x256xf32>
    %544 = vector.broadcast %538 : f32 to vector<4x256xf32>
    %545 = arith.mulf %544, %543 : vector<4x256xf32>
    %546 = arith.addf %542, %545 : vector<4x256xf32>
    %c41 = arith.constant 41 : index
    %547 = memref.load %arg1[%c41] : memref<100xf32, #tpu.memory_space<smem>>
    %c90 = arith.constant 90 : index
    %548 = memref.load %arg1[%c90] : memref<100xf32, #tpu.memory_space<smem>>
    %c0_279 = arith.constant 0 : index
    %c86_280 = arith.constant 86 : index
    %549 = vector.load %arg9[%c0_279, %c86_280] : memref<4x384xf32, #tpu.memory_space<vmem>>, vector<4x256xf32>
    %550 = vector.broadcast %547 : f32 to vector<4x256xf32>
    %551 = arith.mulf %550, %549 : vector<4x256xf32>
    %552 = arith.addf %486, %551 : vector<4x256xf32>
    %c0_281 = arith.constant 0 : index
    %c86_282 = arith.constant 86 : index
    %553 = vector.load %arg10[%c0_281, %c86_282] : memref<4x384xf32, #tpu.memory_space<vmem>>, vector<4x256xf32>
    %554 = vector.broadcast %548 : f32 to vector<4x256xf32>
    %555 = arith.mulf %554, %553 : vector<4x256xf32>
    %556 = arith.addf %552, %555 : vector<4x256xf32>
    %c42 = arith.constant 42 : index
    %557 = memref.load %arg1[%c42] : memref<100xf32, #tpu.memory_space<smem>>
    %c91 = arith.constant 91 : index
    %558 = memref.load %arg1[%c91] : memref<100xf32, #tpu.memory_space<smem>>
    %c0_283 = arith.constant 0 : index
    %c96 = arith.constant 96 : index
    %559 = vector.load %arg9[%c0_283, %c96] : memref<4x384xf32, #tpu.memory_space<vmem>>, vector<4x256xf32>
    %560 = vector.broadcast %557 : f32 to vector<4x256xf32>
    %561 = arith.mulf %560, %559 : vector<4x256xf32>
    %562 = arith.addf %496, %561 : vector<4x256xf32>
    %c0_284 = arith.constant 0 : index
    %c96_285 = arith.constant 96 : index
    %563 = vector.load %arg10[%c0_284, %c96_285] : memref<4x384xf32, #tpu.memory_space<vmem>>, vector<4x256xf32>
    %564 = vector.broadcast %558 : f32 to vector<4x256xf32>
    %565 = arith.mulf %564, %563 : vector<4x256xf32>
    %566 = arith.addf %562, %565 : vector<4x256xf32>
    %c43 = arith.constant 43 : index
    %567 = memref.load %arg1[%c43] : memref<100xf32, #tpu.memory_space<smem>>
    %c92 = arith.constant 92 : index
    %568 = memref.load %arg1[%c92] : memref<100xf32, #tpu.memory_space<smem>>
    %c0_286 = arith.constant 0 : index
    %c97 = arith.constant 97 : index
    %569 = vector.load %arg9[%c0_286, %c97] : memref<4x384xf32, #tpu.memory_space<vmem>>, vector<4x256xf32>
    %570 = vector.broadcast %567 : f32 to vector<4x256xf32>
    %571 = arith.mulf %570, %569 : vector<4x256xf32>
    %572 = arith.addf %506, %571 : vector<4x256xf32>
    %c0_287 = arith.constant 0 : index
    %c97_288 = arith.constant 97 : index
    %573 = vector.load %arg10[%c0_287, %c97_288] : memref<4x384xf32, #tpu.memory_space<vmem>>, vector<4x256xf32>
    %574 = vector.broadcast %568 : f32 to vector<4x256xf32>
    %575 = arith.mulf %574, %573 : vector<4x256xf32>
    %576 = arith.addf %572, %575 : vector<4x256xf32>
    %c44 = arith.constant 44 : index
    %577 = memref.load %arg1[%c44] : memref<100xf32, #tpu.memory_space<smem>>
    %c93 = arith.constant 93 : index
    %578 = memref.load %arg1[%c93] : memref<100xf32, #tpu.memory_space<smem>>
    %c0_289 = arith.constant 0 : index
    %c98_290 = arith.constant 98 : index
    %579 = vector.load %arg9[%c0_289, %c98_290] : memref<4x384xf32, #tpu.memory_space<vmem>>, vector<4x256xf32>
    %580 = vector.broadcast %577 : f32 to vector<4x256xf32>
    %581 = arith.mulf %580, %579 : vector<4x256xf32>
    %582 = arith.addf %516, %581 : vector<4x256xf32>
    %c0_291 = arith.constant 0 : index
    %c98_292 = arith.constant 98 : index
    %583 = vector.load %arg10[%c0_291, %c98_292] : memref<4x384xf32, #tpu.memory_space<vmem>>, vector<4x256xf32>
    %584 = vector.broadcast %578 : f32 to vector<4x256xf32>
    %585 = arith.mulf %584, %583 : vector<4x256xf32>
    %586 = arith.addf %582, %585 : vector<4x256xf32>
    %c45 = arith.constant 45 : index
    %587 = memref.load %arg1[%c45] : memref<100xf32, #tpu.memory_space<smem>>
    %c94 = arith.constant 94 : index
    %588 = memref.load %arg1[%c94] : memref<100xf32, #tpu.memory_space<smem>>
    %c0_293 = arith.constant 0 : index
    %c99_294 = arith.constant 99 : index
    %589 = vector.load %arg9[%c0_293, %c99_294] : memref<4x384xf32, #tpu.memory_space<vmem>>, vector<4x256xf32>
    %590 = vector.broadcast %587 : f32 to vector<4x256xf32>
    %591 = arith.mulf %590, %589 : vector<4x256xf32>
    %592 = arith.addf %526, %591 : vector<4x256xf32>
    %c0_295 = arith.constant 0 : index
    %c99_296 = arith.constant 99 : index
    %593 = vector.load %arg10[%c0_295, %c99_296] : memref<4x384xf32, #tpu.memory_space<vmem>>, vector<4x256xf32>
    %594 = vector.broadcast %588 : f32 to vector<4x256xf32>
    %595 = arith.mulf %594, %593 : vector<4x256xf32>
    %596 = arith.addf %592, %595 : vector<4x256xf32>
    %c46 = arith.constant 46 : index
    %597 = memref.load %arg1[%c46] : memref<100xf32, #tpu.memory_space<smem>>
    %c95 = arith.constant 95 : index
    %598 = memref.load %arg1[%c95] : memref<100xf32, #tpu.memory_space<smem>>
    %c0_297 = arith.constant 0 : index
    %c100 = arith.constant 100 : index
    %599 = vector.load %arg9[%c0_297, %c100] : memref<4x384xf32, #tpu.memory_space<vmem>>, vector<4x256xf32>
    %600 = vector.broadcast %597 : f32 to vector<4x256xf32>
    %601 = arith.mulf %600, %599 : vector<4x256xf32>
    %602 = arith.addf %536, %601 : vector<4x256xf32>
    %c0_298 = arith.constant 0 : index
    %c100_299 = arith.constant 100 : index
    %603 = vector.load %arg10[%c0_298, %c100_299] : memref<4x384xf32, #tpu.memory_space<vmem>>, vector<4x256xf32>
    %604 = vector.broadcast %598 : f32 to vector<4x256xf32>
    %605 = arith.mulf %604, %603 : vector<4x256xf32>
    %606 = arith.addf %602, %605 : vector<4x256xf32>
    %c47 = arith.constant 47 : index
    %607 = memref.load %arg1[%c47] : memref<100xf32, #tpu.memory_space<smem>>
    %c96_300 = arith.constant 96 : index
    %608 = memref.load %arg1[%c96_300] : memref<100xf32, #tpu.memory_space<smem>>
    %c0_301 = arith.constant 0 : index
    %c101 = arith.constant 101 : index
    %609 = vector.load %arg9[%c0_301, %c101] : memref<4x384xf32, #tpu.memory_space<vmem>>, vector<4x256xf32>
    %610 = vector.broadcast %607 : f32 to vector<4x256xf32>
    %611 = arith.mulf %610, %609 : vector<4x256xf32>
    %612 = arith.addf %546, %611 : vector<4x256xf32>
    %c0_302 = arith.constant 0 : index
    %c101_303 = arith.constant 101 : index
    %613 = vector.load %arg10[%c0_302, %c101_303] : memref<4x384xf32, #tpu.memory_space<vmem>>, vector<4x256xf32>
    %614 = vector.broadcast %608 : f32 to vector<4x256xf32>
    %615 = arith.mulf %614, %613 : vector<4x256xf32>
    %616 = arith.addf %612, %615 : vector<4x256xf32>
    %c48_304 = arith.constant 48 : index
    %617 = memref.load %arg1[%c48_304] : memref<100xf32, #tpu.memory_space<smem>>
    %c97_305 = arith.constant 97 : index
    %618 = memref.load %arg1[%c97_305] : memref<100xf32, #tpu.memory_space<smem>>
    %c0_306 = arith.constant 0 : index
    %c102 = arith.constant 102 : index
    %619 = vector.load %arg9[%c0_306, %c102] : memref<4x384xf32, #tpu.memory_space<vmem>>, vector<4x256xf32>
    %620 = vector.broadcast %617 : f32 to vector<4x256xf32>
    %621 = arith.mulf %620, %619 : vector<4x256xf32>
    %622 = arith.addf %556, %621 : vector<4x256xf32>
    %c0_307 = arith.constant 0 : index
    %c102_308 = arith.constant 102 : index
    %623 = vector.load %arg10[%c0_307, %c102_308] : memref<4x384xf32, #tpu.memory_space<vmem>>, vector<4x256xf32>
    %624 = vector.broadcast %618 : f32 to vector<4x256xf32>
    %625 = arith.mulf %624, %623 : vector<4x256xf32>
    %626 = arith.addf %622, %625 : vector<4x256xf32>
    %cst_309 = arith.constant 0.000000e+00 : f32
    %627 = vector.broadcast %cst_309 : f32 to vector<4x256xf32>
    %c0_310 = arith.constant 0 : index
    %c0_311 = arith.constant 0 : index
    %628 = vector.load %arg2[%c0_310, %c0_311] : memref<7x256xf32, #tpu.memory_space<vmem>>, vector<1x256xf32>
    %629 = vector.broadcast %628 : vector<1x256xf32> to vector<4x256xf32>
    %630 = arith.mulf %566, %629 : vector<4x256xf32>
    %631 = arith.addf %627, %630 : vector<4x256xf32>
    %c1_312 = arith.constant 1 : index
    %c0_313 = arith.constant 0 : index
    %632 = vector.load %arg2[%c1_312, %c0_313] : memref<7x256xf32, #tpu.memory_space<vmem>>, vector<1x256xf32>
    %633 = vector.broadcast %632 : vector<1x256xf32> to vector<4x256xf32>
    %634 = arith.mulf %576, %633 : vector<4x256xf32>
    %635 = arith.addf %631, %634 : vector<4x256xf32>
    %c2_314 = arith.constant 2 : index
    %c0_315 = arith.constant 0 : index
    %636 = vector.load %arg2[%c2_314, %c0_315] : memref<7x256xf32, #tpu.memory_space<vmem>>, vector<1x256xf32>
    %637 = vector.broadcast %636 : vector<1x256xf32> to vector<4x256xf32>
    %638 = arith.mulf %586, %637 : vector<4x256xf32>
    %639 = arith.addf %635, %638 : vector<4x256xf32>
    %c3_316 = arith.constant 3 : index
    %c0_317 = arith.constant 0 : index
    %640 = vector.load %arg2[%c3_316, %c0_317] : memref<7x256xf32, #tpu.memory_space<vmem>>, vector<1x256xf32>
    %641 = vector.broadcast %640 : vector<1x256xf32> to vector<4x256xf32>
    %642 = arith.mulf %596, %641 : vector<4x256xf32>
    %643 = arith.addf %639, %642 : vector<4x256xf32>
    %c4_318 = arith.constant 4 : index
    %c0_319 = arith.constant 0 : index
    %644 = vector.load %arg2[%c4_318, %c0_319] : memref<7x256xf32, #tpu.memory_space<vmem>>, vector<1x256xf32>
    %645 = vector.broadcast %644 : vector<1x256xf32> to vector<4x256xf32>
    %646 = arith.mulf %606, %645 : vector<4x256xf32>
    %647 = arith.addf %643, %646 : vector<4x256xf32>
    %c5_320 = arith.constant 5 : index
    %c0_321 = arith.constant 0 : index
    %648 = vector.load %arg2[%c5_320, %c0_321] : memref<7x256xf32, #tpu.memory_space<vmem>>, vector<1x256xf32>
    %649 = vector.broadcast %648 : vector<1x256xf32> to vector<4x256xf32>
    %650 = arith.mulf %616, %649 : vector<4x256xf32>
    %651 = arith.addf %647, %650 : vector<4x256xf32>
    %c6_322 = arith.constant 6 : index
    %c0_323 = arith.constant 0 : index
    %652 = vector.load %arg2[%c6_322, %c0_323] : memref<7x256xf32, #tpu.memory_space<vmem>>, vector<1x256xf32>
    %653 = vector.broadcast %652 : vector<1x256xf32> to vector<4x256xf32>
    %654 = arith.mulf %626, %653 : vector<4x256xf32>
    %655 = arith.addf %651, %654 : vector<4x256xf32>
    %656 = vector.broadcast %0 : f32 to vector<4x256xf32>
    %657 = arith.mulf %655, %656 : vector<4x256xf32>
    %658 = vector.broadcast %1 : f32 to vector<4x256xf32>
    %659 = arith.addf %657, %658 : vector<4x256xf32>
    %cst_324 = arith.constant 0.000000e+00 : f32
    %660 = vector.broadcast %cst_324 : f32 to vector<4x256xf32>
    %661 = arith.maximumf %659, %660 : vector<4x256xf32>
    %662 = arith.negf %661 : vector<4x256xf32>
    %663 = math.exp %662 : vector<4x256xf32>
    %cst_325 = arith.constant 1.000000e+00 : f32
    %664 = vector.broadcast %cst_325 : f32 to vector<4x256xf32>
    %665 = arith.addf %664, %663 : vector<4x256xf32>
    %666 = arith.divf %664, %665 : vector<4x256xf32>
    %c0_326 = arith.constant 0 : index
    %c0_327 = arith.constant 0 : index
    %c0_328 = arith.constant 0 : index
    %667 = vector.load %arg8[%c0_326, %c0_327, %c0_328] : memref<4x32x256xf32, #tpu.memory_space<vmem>>, vector<1x32x256xf32>
    %668 = vector.shape_cast %667 : vector<1x32x256xf32> to vector<32x256xf32>
    %669 = vector.extract_strided_slice %666 {offsets = [0, 0], sizes = [1, 256], strides = [1, 1]} : vector<4x256xf32> to vector<1x256xf32>
    %670 = vector.broadcast %669 : vector<1x256xf32> to vector<32x256xf32>
    %671 = arith.mulf %668, %670 : vector<32x256xf32>
    %c0_329 = arith.constant 0 : index
    %c0_330 = arith.constant 0 : index
    %c0_331 = arith.constant 0 : index
    %672 = vector.load %arg8[%c0_329, %c0_330, %c0_331] : memref<4x32x256xf32, #tpu.memory_space<vmem>>, vector<1x32x256xf32>
    %673 = vector.shape_cast %672 : vector<1x32x256xf32> to vector<32x256xf32>
    %674 = vector.shape_cast %671 : vector<32x256xf32> to vector<1x32x256xf32>
    tpu.vector_store %arg8[%c0_329, %c0_330, %c0_331], %674 {strides = array<i32>} : memref<4x32x256xf32, #tpu.memory_space<vmem>>, vector<1x32x256xf32>,
    %c1_332 = arith.constant 1 : index
    %c0_333 = arith.constant 0 : index
    %c0_334 = arith.constant 0 : index
    %675 = vector.load %arg8[%c1_332, %c0_333, %c0_334] : memref<4x32x256xf32, #tpu.memory_space<vmem>>, vector<1x32x256xf32>
    %676 = vector.shape_cast %675 : vector<1x32x256xf32> to vector<32x256xf32>
    %677 = vector.extract_strided_slice %666 {offsets = [1, 0], sizes = [1, 256], strides = [1, 1]} : vector<4x256xf32> to vector<1x256xf32>
    %678 = vector.broadcast %677 : vector<1x256xf32> to vector<32x256xf32>
    %679 = arith.mulf %676, %678 : vector<32x256xf32>
    %c1_335 = arith.constant 1 : index
    %c0_336 = arith.constant 0 : index
    %c0_337 = arith.constant 0 : index
    %680 = vector.load %arg8[%c1_335, %c0_336, %c0_337] : memref<4x32x256xf32, #tpu.memory_space<vmem>>, vector<1x32x256xf32>
    %681 = vector.shape_cast %680 : vector<1x32x256xf32> to vector<32x256xf32>
    %682 = vector.shape_cast %679 : vector<32x256xf32> to vector<1x32x256xf32>
    tpu.vector_store %arg8[%c1_335, %c0_336, %c0_337], %682 {strides = array<i32>} : memref<4x32x256xf32, #tpu.memory_space<vmem>>, vector<1x32x256xf32>,
    %c2_338 = arith.constant 2 : index
    %c0_339 = arith.constant 0 : index
    %c0_340 = arith.constant 0 : index
    %683 = vector.load %arg8[%c2_338, %c0_339, %c0_340] : memref<4x32x256xf32, #tpu.memory_space<vmem>>, vector<1x32x256xf32>
    %684 = vector.shape_cast %683 : vector<1x32x256xf32> to vector<32x256xf32>
    %685 = vector.extract_strided_slice %666 {offsets = [2, 0], sizes = [1, 256], strides = [1, 1]} : vector<4x256xf32> to vector<1x256xf32>
    %686 = vector.broadcast %685 : vector<1x256xf32> to vector<32x256xf32>
    %687 = arith.mulf %684, %686 : vector<32x256xf32>
    %c2_341 = arith.constant 2 : index
    %c0_342 = arith.constant 0 : index
    %c0_343 = arith.constant 0 : index
    %688 = vector.load %arg8[%c2_341, %c0_342, %c0_343] : memref<4x32x256xf32, #tpu.memory_space<vmem>>, vector<1x32x256xf32>
    %689 = vector.shape_cast %688 : vector<1x32x256xf32> to vector<32x256xf32>
    %690 = vector.shape_cast %687 : vector<32x256xf32> to vector<1x32x256xf32>
    tpu.vector_store %arg8[%c2_341, %c0_342, %c0_343], %690 {strides = array<i32>} : memref<4x32x256xf32, #tpu.memory_space<vmem>>, vector<1x32x256xf32>,
    %c3_344 = arith.constant 3 : index
    %c0_345 = arith.constant 0 : index
    %c0_346 = arith.constant 0 : index
    %691 = vector.load %arg8[%c3_344, %c0_345, %c0_346] : memref<4x32x256xf32, #tpu.memory_space<vmem>>, vector<1x32x256xf32>
    %692 = vector.shape_cast %691 : vector<1x32x256xf32> to vector<32x256xf32>
    %693 = vector.extract_strided_slice %666 {offsets = [3, 0], sizes = [1, 256], strides = [1, 1]} : vector<4x256xf32> to vector<1x256xf32>
    %694 = vector.broadcast %693 : vector<1x256xf32> to vector<32x256xf32>
    %695 = arith.mulf %692, %694 : vector<32x256xf32>
    %c3_347 = arith.constant 3 : index
    %c0_348 = arith.constant 0 : index
    %c0_349 = arith.constant 0 : index
    %696 = vector.load %arg8[%c3_347, %c0_348, %c0_349] : memref<4x32x256xf32, #tpu.memory_space<vmem>>, vector<1x32x256xf32>
    %697 = vector.shape_cast %696 : vector<1x32x256xf32> to vector<32x256xf32>
    %698 = vector.shape_cast %695 : vector<32x256xf32> to vector<1x32x256xf32>
    tpu.vector_store %arg8[%c3_347, %c0_348, %c0_349], %698 {strides = array<i32>} : memref<4x32x256xf32, #tpu.memory_space<vmem>>, vector<1x32x256xf32>,
    return
  }
  func.func @transform_0(%arg0: i32) -> i32 {
    %c0_i32 = arith.constant 0 : i32
    %c0_i32_0 = arith.constant 0 : i32
    return %c0_i32 : i32
  }
  func.func @transform_1(%arg0: i32) -> (i32, i32) {
    %c0_i32 = arith.constant 0 : i32
    %c0_i32_0 = arith.constant 0 : i32
    %c0_i32_1 = arith.constant 0 : i32
    return %c0_i32, %c0_i32_0 : i32, i32
  }
  func.func @transform_2(%arg0: i32) -> (i32, i32, i32) {
    %c0_i32 = arith.constant 0 : i32
    %c0_i32_0 = arith.constant 0 : i32
    %c0_i32_1 = arith.constant 0 : i32
    return %arg0, %c0_i32, %c0_i32_0 : i32, i32, i32
  }
  func.func @transform_3(%arg0: i32) -> (i32, i32) {
    %c0_i32 = arith.constant 0 : i32
    %c0_i32_0 = arith.constant 0 : i32
    %c0_i32_1 = arith.constant 0 : i32
    return %c0_i32, %c0_i32_0 : i32, i32
  }
  func.func @transform_4(%arg0: i32) -> (i32, i32) {
    %c0_i32 = arith.constant 0 : i32
    %c0_i32_0 = arith.constant 0 : i32
    %c0_i32_1 = arith.constant 0 : i32
    return %c0_i32, %c0_i32_0 : i32, i32
  }
  func.func @transform_5(%arg0: i32) -> (i32, i32) {
    %c0_i32 = arith.constant 0 : i32
    %c0_i32_0 = arith.constant 0 : i32
    %c0_i32_1 = arith.constant 0 : i32
    return %c0_i32, %c0_i32_0 : i32, i32
  }
  func.func @transform_6(%arg0: i32) -> (i32, i32) {
    %c0_i32 = arith.constant 0 : i32
    %c0_i32_0 = arith.constant 0 : i32
    %c0_i32_1 = arith.constant 0 : i32
    return %c0_i32, %c0_i32_0 : i32, i32
  }
  func.func @transform_7(%arg0: i32) -> (i32, i32, i32) {
    %c0_i32 = arith.constant 0 : i32
    %c0_i32_0 = arith.constant 0 : i32
    %c0_i32_1 = arith.constant 0 : i32
    return %arg0, %c0_i32, %c0_i32_0 : i32, i32, i32
  }
}

</mosaic_0001>

<bundles_post_ra>
// kernel: tpu_custom_call.1
= control target key start
LH: loop header
LB: loop body
LE: loop exit
PB: predicated region body
PF: predicated region fallthrough
CT: control target
= control target key end

     0   :  { %s6292_s0 = inlined_call_operand.vmem [shape: f32[100], index: 0, kind: input, shape index: {}]   ;;  %s6293_s1 = inlined_call_operand.vmem [shape: f32[7,256], index: 1, kind: input, shape index: {}]   ;;  %s6294_s2 = inlined_call_operand.hbm [shape: f32[8,32,256], index: 2, kind: input, shape index: {}]   ;;  %s6295_s3 = inlined_call_operand.vmem [shape: f32[2,32], index: 3, kind: input, shape index: {}]   ;;  %s6296_s4 = inlined_call_operand.vmem [shape: f32[2,1], index: 4, kind: input, shape index: {}]   ;;  %s6297_s5 = inlined_call_operand.vmem [shape: f32[32,2], index: 5, kind: input, shape index: {}]   ;;  %s6298_s6 = inlined_call_operand.vmem [shape: f32[32,1], index: 6, kind: input, shape index: {}]   ;;  %s6299_s7 = inlined_call_operand.hbm [shape: f32[8,32,256], index: 7, kind: output, shape index: {}]  }
   0x1   :  { %6423 = sst [smem:[#allocation110_spill]] %s6292_s0 }
   0x2   :  { %12 = vsyncpa [#allocation7], 0 }
   0x3   :  { %13 = vsyncpa [#allocation5], 0 }
   0x4   :  { %15 = vsyncpa [#allocation5 + $0x1], 0 }
   0x5   :  { %16 = vsyncpa [#allocation6], 0 }
   0x6   :  { %18 = vsyncpa [#allocation6 + $0x1], 0  ;;  %s4221_s24 = smov 0   ;;  %s4223_s25 = smov 0  }
   0x7   :  { %s4225_s26 = smov 0   ;;  %s4227_s27 = smov 0  }
   0x8 LB: > { %s4242_s28 = sadd.s32 4294967295, %s4145_s27   ;;  %s3592_s29 = sadd.s32 4294967294, %s4145_s27   ;;  %s4145_s27 = sphi %s4227_s27, %s6679_s27   ;;  %s4141_s26 = sphi %s4225_s26, %s6678_s26   ;;  %s4137_s25 = sphi %s4223_s25, %s6677_s25   ;;  %s4133_s24 = sphi %s4221_s24, %s6676_s24  }
   0x9   : > { %s4246_s30 = sadd.s32 1, %s4145_s27   ;;  %s73_s8 = sadd.s32 1, %s4141_s26 }
   0xa   : > { %s70_s9 = ssub.s32 %s4145_s27, %s4246_s30  ;;  %p80_p0 = scmp.ne.s32.totalorder %s4141_s26, %s4137_s25 }
   0xb   : > { %p71_p1 = scmp.eq.s32.totalorder %s70_s9, 0  ;;  %p81_p2 = scmp.eq.s32.totalorder %s4145_s27, 0 }
   0xc   : > { %p86_p3 = scmp.ne.s32.totalorder %s4137_s25, %s4133_s24  ;;  %p6301_p4 = scmp.eq.s32.totalorder %s4242_s28, 0 }
   0xd   : > { %s4258_s10 = scalar_select %p71_p1, %s4141_s26, %s73_s8  }
   0xe   : > { %p4260_p5 = por %p81_p2, %p80_p0  ;;  %p4266_p6 = por %p6301_p4, %p86_p3 }
   0xf   : > { %6424 = sst [smem:[#allocation13_spill]] %s4258_s10  ;;  %p194_p7 = scmp.eq.s32.totalorder %s4242_s28, 1 }
  0x10   : > { %s6426_s12 = scalar_select %p4266_p6, 1, 0 }
  0x11   : > { %p200_p8 = scmp.eq.s32.totalorder %s3592_s29, 1  ;;  %p3593_p9 = scmp.ge.s32.totalorder %s4145_s27, 1 }
  0x12   : > { %p207_p10 = scmp.lt.s32.totalorder %s4145_s27, 3  ;;  %p4273_p11 = por %p194_p7, %p80_p0 }
  0x13   : > { %p4277_p12 = por %p200_p8, %p86_p3  ;;  %s6430_s0 = sld [smem:[#allocation110_spill]] }
  0x14   : > { %s6427_s13 = scalar_select %p4273_p11, 1, 0 }
  0x15   : > { %s6428_s14 = scalar_select %p4277_p12, 1, 0 }
  0x16   : > { %p4281_p13 = pnand %p3593_p9, %p207_p10  ;;  %p3928_p2 = scmp.lt.s32.totalorder %s4145_s27, 2 }
  0x17   : > { %s246_s20 = sand.u32 1, %s4141_s26  }
  0x18   : > { %s6429_s15 = scalar_select %p4281_p13, 1, 0 }
  0x19   : > { %s220_s18 = sshll.u32 %s6430_s0, 4  ;;  %p3915_p1 = pneg %p4281_p13  ;;  %s221_s18 = int_to_ptr.vmem [resolvable:$true] %s220_s18 }
  0x1a   : > { %p4301_p3 = pnand %p3928_p2, %p4260_p5  ;;  %s3596_s22 = sshll.u32 %s246_s20, 8 }
  0x1b   : > { %p4294_p7 = pnand %p3915_p1, %p6301_p4  ;;  %s4034_s23 = scalar_lea.vmem %s221_s18, 16 }
  0x1c   : > { %p4035_p8 = scmp.ne.s32.totalorder %s221_s18, %s4034_s23  ;;  %p4042_p12 = scmp.lt.s32.totalorder %s221_s18, %s221_s18 }
  0x1d   : > { %p4036_p9 = pneg %p4294_p7  ;;  %p4043_p11 = scmp.lt.s32.totalorder %s4034_s23, %s4034_s23 }
  0x1f   : > { %p4037_p10 = pnand %p4036_p9, %p4035_p8  ;;  %p4044_p1 = por %p4043_p11, %p4042_p12 }
  0x21   : > { %p4038_p0 = pneg %p4037_p10 }
  0x23   : > { %p4045_p4 = pnand %p4044_p1, %p4038_p0 }
  0x25   : > { %4048 = shalt.err (!%p4045_p4)
}
  0x26   : > { %s4147_s29 = smov [#allocation4]   ;;  %s3875_s8 = sshll.u32 %s4145_s27, 12 }
  0x27   : > { %3918 = dma.vmem_to_smem (!%p4294_p7), %s221_s18, 16, %s4147_s29, [#allocation7]  }
  0x28   : > { %s250_s9 = scalar_lea.vmem [#allocation8], %s3596_s22  ;;  %s4313_s0 = scalar_lea.hbm %s6294_s2, %s3875_s8 }
  0x29   : > { %s258_s11 = sshll.u32 %s250_s9, 4  ;;  %s4317_s23 = scalar_lea.sflag [#allocation5], %s246_s20  ;;  %s4315_s11 = int_to_ptr.vmem [resolvable:$true] %s258_s11 }
  0x2a   : > { %s4049_s10 = scalar_lea.hbm %s4313_s0, 4096  ;;  %p4051_p5 = pneg %p4301_p3 }
  0x2b   : > { %p4050_p4 = scmp.ne.s32.totalorder %s4313_s0, %s4049_s10  ;;  %s4054_s22 = scalar_lea.hbm %s6294_s2, 8192 }
  0x2c   : > { %p4055_p0 = scmp.lt.s32.totalorder %s4313_s0, %s6294_s2  ;;  %p4056_p2 = scmp.lt.s32.totalorder %s4054_s22, %s4049_s10 }
  0x2d   : > { %p4052_p11 = pnand %p4051_p5, %p4050_p4 }
  0x2e   : > { %p4057_p7 = por %p4056_p2, %p4055_p0 }
  0x2f   : > { %p4053_p12 = pneg %p4052_p11 }
  0x31   : > { %p4058_p8 = pnand %p4057_p7, %p4053_p12 }
  0x33   : > { %4061 = shalt.err (!%p4058_p8)
}
  0x34   : > { %s4062_s20 = scalar_lea.vmem %s4315_s11, 4096  ;;  %s4148_s9 = smov [#allocation8]  }
  0x35   : > { %p4063_p9 = scmp.ne.s32.totalorder %s4315_s11, %s4062_s20  ;;  %s4067_s16 = sshll.u32 %s4148_s9, 4  ;;  %s4068_s16 = int_to_ptr.vmem [resolvable:$false] %s4067_s16 }
  0x36   : > { %s4069_s17 = scalar_lea.vmem %s4068_s16, 8192  ;;  %p4070_p4 = scmp.lt.s32.totalorder %s4315_s11, %s4068_s16 }
  0x37   : > { %p4065_p10 = pnand %p4063_p9, %p4051_p5  ;;  %p4071_p11 = scmp.lt.s32.totalorder %s4069_s17, %s4062_s20 }
  0x39   : > { %p4066_p1 = pneg %p4065_p10  ;;  %p4072_p6 = por %p4071_p11, %p4070_p4 }
  0x3b   : > { %p4073_p13 = pnand %p4072_p6, %p4066_p1 }
  0x3d   : > { %4076 = shalt.err (!%p4073_p13)
}
  0x3e   : > { %s4149_s10 = smov 256   ;;  %s4150_s18 = smov 16  }
  0x3f   : > { %3922 = dma.hbm_to_vmem [thread:$0]  (!%p4301_p3), %s4313_s0, 4096, %s4315_s11, %s4317_s23, %s4149_s10, %s4149_s10, %s4150_s18  }
  0x40   : > { %p6433_p5 = scmp.ne.s32.totalorder %s6429_s15, 0 }
  0x42   : > { %270 = sbr.rel (%p6433_p5) target bundleno = 1930 (0x78a), region = 48 }
  0x47   : > { %p6434_p12 = scmp.eq.s32.totalorder %s4242_s28, 0 }
  0x49   : > { %4120 = dma.done.wait (%p6434_p12), [#allocation7], 16   ;;  %p6435_p0 = pmov %p6434_p12 }
  0x4a   : > { %s4345_s19 = sand.u32 1, %s4137_s25   ;;  %p6436_p6 = scmp.ne.s32.totalorder %s6426_s12, 0 }
  0x4b   : > { %4122 = vsyncadd (%p6435_p0), [#allocation7], 4294967280  ;;  %s6348_s22 = sshll.u32 %s4345_s19, 8  ;;  %s277_s29 = scalar_lea.sflag [#allocation5], %s4345_s19 }
  0x4c   : > { %s4351_s0 = scalar_lea.vmem [#allocation8], %s6348_s22 }
  0x4d   : > { %4124 = dma.done.wait (%p6436_p6), %s277_s29, 4096  }
  0x4e   : > { %4126 = vsyncadd (%p6436_p6), %s277_s29, 4294963200 }
  0x4f   : > { %285 = sfence }
  0x50   : > { %v4358_v0 = vld [vmem:[%s4351_s0 + $0x30] sm:$0xff]  ;;  %v4361_v1 = vld [vmem:[%s4351_s0 + $0x38] sm:$0xff]  ;;  %v4384_v10 = vld [vmem:[%s4351_s0 + $0x60] sm:$0xff]  ;;  %v4151_v54 = vmov 0.0   ;;  %vm4152_vm0 = vmmov 0   ;;  %vm463_vm1 = vcmask 7168  }
  0x51   : > { %v4364_v2 = vld [vmem:[%s4351_s0 + $0xb0] sm:$0xff]  ;;  %v345_v3 = vadd.f32 %v4361_v1, %v4358_v0  ;;  %v333_v4 = vmax.f32 %v4358_v0, %v4361_v1  ;;  %v4371_v5 = vld [vmem:[%s4351_s0 + $0xb8] sm:$0xff]  ;;  %v4387_v11 = vld [vmem:[%s4351_s0 + $0x68] sm:$0xff]  ;;  %3888 = vmatprep.subr.mxu0 %v4151_v54  ;;  %3896 = vmatprep.mubr.msk.f32.mxu0 %vm4152_vm0, %v4151_v54  ;;  %vm468_vm2 = vcmask 15360   ;;  %vm473_vm3 = vcmask 23552   ;;  %s6349_s20 = smov 124  }
  0x52   : > { %v4374_v6 = vld [vmem:[%s4351_s0 + $0x70] sm:$0xff]  ;;  %v4377_v7 = vld [vmem:[%s4351_s0 + $0x78] sm:$0xff]  ;;  %v407_v8 = vmax.f32 %v4364_v2, %v4371_v5  ;;  %v4390_v12 = vld [vmem:[%s4351_s0 + $0x20] sm:$0xff]  ;;  %v367_v14 = vmax.f32 %v4384_v10, %v4387_v11  ;;  %v419_v26 = vadd.f32 %v4371_v5, %v4364_v2  ;;  %v379_v31 = vadd.f32 %v4387_v11, %v4384_v10  ;;  %s4158_s18 = smov 1   ;;  %s4159_s29 = smov 3  }
  0x53   : > { %346 = vadd.xlane.f32.xlu1 %v345_v3  ;;  %334 = vmax.xlane.f32.xlu0 %v333_v4  ;;  %v370_v9 = vmax.f32 %v4374_v6, %v4377_v7  ;;  %v4393_v13 = vld [vmem:[%s4351_s0 + $0x28] sm:$0xff]  ;;  %v4400_v16 = vld [vmem:[%s4351_s0 + $0xf0] sm:$0xff]  ;;  %v4403_v17 = vld [vmem:[%s4351_s0 + $0xf8] sm:$0xff]  ;;  %v382_v19 = vadd.f32 %v4377_v7, %v4374_v6  ;;  %v4153_v4 = vmov 0   ;;  %vm478_vm4 = vcmask 31744   ;;  %s4163_s23 = smov 2  }
  0x54   : > { %v330_v15 = vmax.f32 %v4390_v12, %v4393_v13  ;;  %v444_v18 = vmax.f32 %v4400_v16, %v4403_v17  ;;  %v4410_v20 = vld [vmem:[%s4351_s0 + $0xa0] sm:$0xff]  ;;  %v4413_v21 = vld [vmem:[%s4351_s0 + $0xa8] sm:$0xff]  ;;  %v342_v23 = vadd.f32 %v4393_v13, %v4390_v12  ;;  %v4420_v24 = vld [vmem:[%s4351_s0 + $0x10] sm:$0xff]  ;;  %v456_v35 = vadd.f32 %v4403_v17, %v4400_v16  ;;  %3995 = vset.pattern.permute.xlu0 %v4153_v4  ;;  %s4164_s8 = smov 4   ;;  %s3729_s9 = sld [smem:[#allocation4 + $0x7]] }
  0x55   : > { %v404_v22 = vmax.f32 %v4410_v20, %v4413_v21  ;;  %v4423_v25 = vld [vmem:[%s4351_s0 + $0x18] sm:$0xff]  ;;  %v4430_v28 = vld [vmem:[%s4351_s0 + $0x50] sm:$0xff]  ;;  %v4440_v32 = vld [vmem:[%s4351_s0 + $0xe0] sm:$0xff]  ;;  %v416_v42 = vadd.f32 %v4413_v21, %v4410_v20  ;;  %3996 = vset.pattern.permute.xlu1 %v4153_v4  ;;  %vm483_vm5 = vcmask 39936   ;;  %vm488_vm6 = vcmask 48128   ;;  %s3731_s16 = sld [smem:[#allocation4 + $0x8]] }
  0x56   : > { %v327_v27 = vmax.f32 %v4420_v24, %v4423_v25  ;;  %v4433_v29 = vld [vmem:[%s4351_s0 + $0x58] sm:$0xff]  ;;  %v4443_v33 = vld [vmem:[%s4351_s0 + $0xe8] sm:$0xff]  ;;  %v4450_v36 = vld [vmem:[%s4351_s0 + $0x90] sm:$0xff]  ;;  %v339_v38 = vadd.f32 %v4423_v25, %v4420_v24  ;;  %vm493_vm7 = vcmask 56320   ;;  %vm505_vm8 = vcmask 261120   ;;  %s3733_s17 = sld [smem:[#allocation4 + $0x9]] }
  0x57   : > { %408 = vmax.xlane.f32.xlu1 %v407_v8  ;;  %371 = vmax.xlane.f32.xlu0 %v370_v9  ;;  %v364_v30 = vmax.f32 %v4430_v28, %v4433_v29  ;;  %v441_v34 = vmax.f32 %v4440_v32, %v4443_v33  ;;  %v4453_v37 = vld [vmem:[%s4351_s0 + $0x98] sm:$0xff]  ;;  %v4460_v40 = vld [vmem:[%s4351_s0] sm:$0xff]  ;;  %v4463_v41 = vld [vmem:[%s4351_s0 + $0x8] sm:$0xff]  ;;  %v376_v47 = vadd.f32 %v4433_v29, %v4430_v28  ;;  %vm620_vm9 = vcmask 1041408   ;;  %s3735_s10 = sld [smem:[#allocation4 + $0xa]]  ;;  %p6672_p3 = scmp.ne.s32.totalorder %s6427_s13, 0 }
  0x58   : > { %v401_v39 = vmax.f32 %v4450_v36, %v4453_v37  ;;  %v324_v43 = vmax.f32 %v4460_v40, %v4463_v41  ;;  %v4470_v44 = vld [vmem:[%s4351_s0 + $0x40] sm:$0xff]  ;;  %v4473_v45 = vld [vmem:[%s4351_s0 + $0x48] sm:$0xff]  ;;  %v4480_v48 = vld [vmem:[%s4351_s0 + $0xd0] sm:$0xff]  ;;  %v453_v51 = vadd.f32 %v4443_v33, %v4440_v32  ;;  %v336_v55 = vadd.f32 %v4463_v41, %v4460_v40  ;;  %s3739_s12 = sld [smem:[#allocation4 + $0xc]] }
  0x59   : > { %v361_v46 = vmax.f32 %v4470_v44, %v4473_v45  ;;  %v4483_v49 = vld [vmem:[%s4351_s0 + $0xd8] sm:$0xff]  ;;  %v4490_v52 = vld [vmem:[%s4351_s0 + $0x80] sm:$0xff]  ;;  %v4493_v53 = vld [vmem:[%s4351_s0 + $0x88] sm:$0xff]  ;;  %v413_v57 = vadd.f32 %v4453_v37, %v4450_v36  ;;  %v373_v58 = vadd.f32 %v4473_v45, %v4470_v44  ;;  %vm753_vm10 = vcmask 412672   ;;  %s3741_s15 = sld [smem:[#allocation4 + $0xd]] }
  0x5a   : > { %v438_v50 = vmax.f32 %v4480_v48, %v4483_v49  ;;  %v398_v56 = vmax.f32 %v4490_v52, %v4493_v53  ;;  %v4505_v59 = vld [vmem:[%s4351_s0 + $0xc0] sm:$0xff]  ;;  %v4508_v60 = vld [vmem:[%s4351_s0 + $0xc8] sm:$0xff]  ;;  %v450_v62 = vadd.f32 %v4483_v49, %v4480_v48  ;;  %v410_v63 = vadd.f32 %v4493_v53, %v4490_v52  ;;  %754 = vst.msk [vmem:[#allocation2] sm:$0xf] %vm753_vm10, %v4151_v54  ;;  %s4162_s0 = smov 51   ;;  %s3743_s21 = sld [smem:[#allocation4 + $0xe]] }
  0x5b   : > { %368 = vmax.xlane.f32.xlu1 %v367_v14  ;;  %331 = vmax.xlane.f32.xlu0 %v330_v15  ;;  %v435_v61 = vmax.f32 %v4505_v59, %v4508_v60  ;;  %v447_v3 = vadd.f32 %v4508_v60, %v4505_v59  ;;  %v499_v8 = vld [vmem:[%s6296_s4] sm:$0x3]  ;;  %vm756_vm11 = vcmask 1043864   ;;  %755 = vst.msk [vmem:[#allocation3] sm:$0xf] %vm753_vm10, %v4151_v54  ;;  %vm849_vm14 = vcmask 416768  }
  0x5c   : > { %757 = vst.msk [vmem:[#allocation2 + $0x8] sm:$0xf] %vm756_vm11, %v4151_v54  ;;  %758 = vst.msk [vmem:[#allocation3 + $0x8] sm:$0xf] %vm756_vm11, %v4151_v54  ;;  %s3745_s11 = sld [smem:[#allocation4 + $0xf]]  ;;  %vm1619_vm0 = vcmask 1043456  }
  0x5d   : > { %s5147_s22 = sld [smem:[#allocation4 + $0x33]]  ;;  %vm2119_vm10 = vcmask 654336   ;;  %vm2368_vm11 = vcmask 523264  }
  0x5f   : > { %445 = vmax.xlane.f32.xlu1 %v444_v18  ;;  %383 = vadd.xlane.f32.xlu0 %v382_v19 }
  0x63   : > { %405 = vmax.xlane.f32.xlu1 %v404_v22  ;;  %343 = vadd.xlane.f32.xlu0 %v342_v23 }
  0x67   : > { %420 = vadd.xlane.f32.xlu0 %v419_v26  ;;  %328 = vmax.xlane.f32.xlu1 %v327_v27 }
  0x6b   : > { %365 = vmax.xlane.f32.xlu0 %v364_v30  ;;  %380 = vadd.xlane.f32.xlu1 %v379_v31 }
  0x6f   : > { %442 = vmax.xlane.f32.xlu0 %v441_v34  ;;  %457 = vadd.xlane.f32.xlu1 %v456_v35 }
  0x73   : > { %340 = vadd.xlane.f32.xlu0 %v339_v38  ;;  %402 = vmax.xlane.f32.xlu1 %v401_v39 }
  0x77   : > { %417 = vadd.xlane.f32.xlu0 %v416_v42  ;;  %325 = vmax.xlane.f32.xlu1 %v324_v43 }
  0x7b   : > { %362 = vmax.xlane.f32.xlu0 %v361_v46  ;;  %377 = vadd.xlane.f32.xlu1 %v376_v47 }
  0x7f   : > { %439 = vmax.xlane.f32.xlu0 %v438_v50  ;;  %454 = vadd.xlane.f32.xlu1 %v453_v51 }
  0x83   : > { %337 = vadd.xlane.f32.xlu0 %v336_v55  ;;  %399 = vmax.xlane.f32.xlu1 %v398_v56 }
  0x87   : > { %414 = vadd.xlane.f32.xlu0 %v413_v57  ;;  %374 = vadd.xlane.f32.xlu1 %v373_v58 }
  0x8b   : > { %436 = vmax.xlane.f32.xlu0 %v435_v61  ;;  %451 = vadd.xlane.f32.xlu1 %v450_v62 }
  0x8f   : > { %411 = vadd.xlane.f32.xlu0 %v410_v63  ;;  %448 = vadd.xlane.f32.xlu1 %v447_v3 }
  0xa5   : > { %502 = vperm.xlu0 %3995, %v499_v8  }
  0xdc   : > { %v347_v9 = vpop.xlane.xlu1 %346  ;;  %v335_v14 = vpop.xlane.xlu0 %334 }
  0xdd   : > { %v351_v42 = vmul.f32 0.00390625, %v347_v9 }
  0xe0   : > { %v409_v15 = vpop.xlane.xlu1 %408  ;;  %v372_v18 = vpop.xlane.xlu0 %371 }
  0xe1   : > { %v467_v31 = vsel %vm463_vm1, %v335_v14, %v372_v18 }
  0xe2   : > { %v472_v38 = vsel %vm468_vm2, %v467_v31, %v409_v15 }
  0xe4   : > { %v369_v19 = vpop.xlane.xlu1 %368  ;;  %v332_v22 = vpop.xlane.xlu0 %331 }
  0xe5   : > { %v466_v14 = vsel %vm463_vm1, %v332_v22, %v369_v19 }
  0xe8   : > { %v446_v23 = vpop.xlane.xlu1 %445  ;;  %v384_v26 = vpop.xlane.xlu0 %383 }
  0xe9   : > { %v477_v39 = vsel %vm473_vm3, %v472_v38, %v446_v23  ;;  %v388_v47 = vmul.f32 0.00390625, %v384_v26 }
  0xea   : > { %v482_v50 = vsel %vm478_vm4, %v477_v39, %v351_v42 }
  0xeb   : > { %v487_v58 = vsel %vm483_vm5, %v482_v50, %v388_v47 }
  0xec   : > { %v406_v27 = vpop.xlane.xlu1 %405  ;;  %v344_v30 = vpop.xlane.xlu0 %343 }
  0xed   : > { %v471_v15 = vsel %vm468_vm2, %v466_v14, %v406_v27  ;;  %v350_v23 = vmul.f32 0.00390625, %v344_v30 }
  0xf0   : > { %v421_v34 = vpop.xlane.xlu0 %420  ;;  %v329_v35 = vpop.xlane.xlu1 %328 }
  0xf1   : > { %v425_v51 = vmul.f32 0.00390625, %v421_v34 }
  0xf3   : > { %v492_v61 = vsel %vm488_vm6, %v487_v58, %v425_v51 }
  0xf4   : > { %v366_v43 = vpop.xlane.xlu0 %365  ;;  %v381_v46 = vpop.xlane.xlu1 %380 }
  0xf5   : > { %v387_v39 = vmul.f32 0.00390625, %v381_v46  ;;  %v465_v30 = vsel %vm463_vm1, %v329_v35, %v366_v43 }
  0xf8   : > { %v443_v55 = vpop.xlane.xlu0 %442  ;;  %v458_v56 = vpop.xlane.xlu1 %457 }
  0xf9   : > { %v462_v57 = vmul.f32 0.00390625, %v458_v56  ;;  %v476_v18 = vsel %vm473_vm3, %v471_v15, %v443_v55 }
  0xfa   : > { %v481_v34 = vsel %vm478_vm4, %v476_v18, %v350_v23 }
  0xfb   : > { %v497_v62 = vsel %vm493_vm7, %v492_v61, %v462_v57  ;;  %v486_v51 = vsel %vm483_vm5, %v481_v34, %v387_v39 }
  0xfc   : > { %v341_v63 = vpop.xlane.xlu0 %340  ;;  %3889 = vmatpush3.msra.mxu0 %v497_v62  ;;  %v403_v3 = vpop.xlane.xlu1 %402 }
  0xfd   : > { %3890 = vmatprep.subr.mxu0 %v4151_v54  ;;  %v470_v55 = vsel %vm468_vm2, %v465_v30, %v403_v3  ;;  %v349_v57 = vmul.f32 0.00390625, %v341_v63  ;;  %v587_v30 = vld [vmem:[%s6298_s6 + $0x18] sm:$0xff] }
  0xfe   : > { %605 = vperm.xlu1 %3996, %v587_v30  }
 0x100   : > { %v418_v8 = vpop.xlane.xlu0 %417  ;;  %v326_v9 = vpop.xlane.xlu1 %325 }
 0x101   : > { %v424_v38 = vmul.f32 0.00390625, %v418_v8 }
 0x103   : > { %v491_v56 = vsel %vm488_vm6, %v486_v51, %v424_v38 }
 0x104   : > { %v363_v26 = vpop.xlane.xlu0 %362  ;;  %v378_v31 = vpop.xlane.xlu1 %377 }
 0x105   : > { %v464_v14 = vsel %vm463_vm1, %v326_v9, %v363_v26  ;;  %v386_v15 = vmul.f32 0.00390625, %v378_v31 }
 0x108   : > { %v440_v42 = vpop.xlane.xlu0 %439  ;;  %v455_v47 = vpop.xlane.xlu1 %454 }
 0x109   : > { %v461_v50 = vmul.f32 0.00390625, %v455_v47  ;;  %v475_v46 = vsel %vm473_vm3, %v470_v55, %v440_v42  ;;  %v586_v55 = vld [vmem:[%s6298_s6 + $0x10] sm:$0xff] }
 0x10a   : > { %v480_v62 = vsel %vm478_vm4, %v475_v46, %v349_v57  ;;  %600 = vperm.xlu1 %3996, %v586_v55   ;;  %v585_v46 = vld [vmem:[%s6298_s6 + $0x8] sm:$0xff]  ;;  %v584_v57 = vld [vmem:[%s6298_s6] sm:$0xff] }
 0x10b   : > { %v496_v19 = vsel %vm493_vm7, %v491_v56, %v461_v50  ;;  %v485_v3 = vsel %vm483_vm5, %v480_v62, %v386_v15  ;;  %v581_v15 = vld [vmem:[%s6297_s5 + $0x8] sm:$0xff] }
 0x10c   : > { %v338_v22 = vpop.xlane.xlu0 %337  ;;  %3891 = vmatpush3.msra.mxu0 %v496_v19  ;;  %v400_v27 = vpop.xlane.xlu1 %399  ;;  %v498_v19 = vld [vmem:[%s6295_s3] sm:$0x3] }
 0x10d   : > { %3892 = vmatprep.subr.mxu0 %v4151_v54  ;;  %v469_v18 = vsel %vm468_vm2, %v464_v14, %v400_v27  ;;  %v348_v35 = vmul.f32 0.00390625, %v338_v22  ;;  %v580_v27 = vld [vmem:[%s6297_s5] sm:$0xff] }
 0x10e   : > { %3901 = vmatprep.mubr.msk.f32.mxu1 %vm468_vm2, %v580_v27  ;;  %595 = vperm.xlu1 %3996, %v585_v46  }
 0x110   : > { %v415_v58 = vpop.xlane.xlu0 %414  ;;  %v375_v61 = vpop.xlane.xlu1 %374 }
 0x111   : > { %v423_v8 = vmul.f32 0.00390625, %v415_v58  ;;  %v385_v47 = vmul.f32 0.00390625, %v375_v61 }
 0x112   : > { %590 = vperm.xlu1 %3996, %v584_v57  }
 0x113   : > { %v490_v63 = vsel %vm488_vm6, %v485_v3, %v423_v8 }
 0x114   : > { %v437_v23 = vpop.xlane.xlu0 %436  ;;  %v452_v34 = vpop.xlane.xlu1 %451 }
 0x115   : > { %v474_v43 = vsel %vm473_vm3, %v469_v18, %v437_v23  ;;  %v460_v38 = vmul.f32 0.00390625, %v452_v34  ;;  %v582_v18 = vld [vmem:[%s6297_s5 + $0x10] sm:$0xff]  ;;  %v583_v23 = vld [vmem:[%s6297_s5 + $0x18] sm:$0xff] }
 0x116   : > { %v479_v39 = vsel %vm478_vm4, %v474_v43, %v348_v35 }
 0x117   : > { %v495_v42 = vsel %vm493_vm7, %v490_v63, %v460_v38  ;;  %v484_v51 = vsel %vm483_vm5, %v479_v39, %v385_v47 }
 0x118   : > { %v412_v50 = vpop.xlane.xlu0 %411  ;;  %3893 = vmatpush3.msra.mxu0 %v495_v42  ;;  %v449_v9 = vpop.xlane.xlu1 %448 }
 0x119   : > { %v422_v26 = vmul.f32 0.00390625, %v412_v50  ;;  %v459_v31 = vmul.f32 0.00390625, %v449_v9  ;;  %3894 = vmatprep.subr.mxu0 %v4151_v54 }
 0x11b   : > { %v489_v56 = vsel %vm488_vm6, %v484_v51, %v422_v26 }
 0x11c   : > { %v494_v22 = vsel %vm493_vm7, %v489_v56, %v459_v31  ;;  %v4155_v31 = vmov 1   ;;  %vm1621_vm7 = vcmask 916480  }
 0x11d   : > { %3895 = vmatpush3.msra.mxu0 %v494_v22  ;;  %3997 = vset.pattern.permute.xlu1 %v4155_v31 }
 0x11e   : > { %3897 = vmatmul.mubr.msk.f32.vlgmr.msra.gmra.mxu0 %vm505_vm8, %v498_v19 }
 0x11f   : > { %1111 = vmatprep.mubr.f32.mxu0 %v4151_v54 }
 0x120   : > { %v503_v58 = vpop.permute.xlu0 %502 }
 0x179   : > { %v606_v34 = vpop.permute.xlu1 %605 }
 0x185   : > { %v601_v35 = vpop.permute.xlu1 %600 }
 0x189   : > { %v596_v43 = vpop.permute.xlu1 %595 }
 0x18d   : > { %v591_v9 = vpop.permute.xlu1 %590 }
 0x1de   : > { %v575_v61 = vpop.f32.mrf.mxu0 }
 0x1df   : > { %v576_v62 = vadd.f32 %v575_v61, %v503_v58 }
 0x1e0   : > { %v3898_v8 = vpop.f32.mrf.mxu0 }
 0x1e1   : > { %v579_v14 = vmax.f32 %v576_v62, 0.0 }
 0x1e3   : > { %3899 = vmatprep.subr.msk.mxu1 %vm620_vm9, %v579_v14 }
 0x1e4   : > { %3900 = vmatpush3.msk.msra.mxu1 %vm620_vm9, %v579_v14  ;;  %vm1870_vm9 = vcmask 785408  }
 0x1e5   : > { %3902 = vmatmul.mubr.msk.f32.vlgmr.msra.gmra.mxu1 %vm468_vm2, %v581_v15 }
 0x1e6   : > { %3904 = vmatprep.mubr.msk.f32.mxu1 %vm468_vm2, %v582_v18 }
 0x1e9   : > { %3905 = vmatmul.mubr.msk.f32.gmra.mxu1 %vm468_vm2, %v583_v23 }
 0x1ea   : > { %924 = vmatprep.mubr.f32.mxu1 %v4151_v54 }
 0x2a5   : > { %v3903_v38 = vpop.f32.mrf.mxu1 }
 0x2a6   : > { %v696_v3 = vadd.f32 %v3903_v38, %v596_v43  ;;  %v4156_v43 = vmov 2  }
 0x2a7   : > { %v690_v63 = vpop.f32.mrf.mxu1 }
 0x2a8   : > { %715 = vrot.lane.b32.xlu1 %v696_v3, %s6349_s20  ;;  %v691_v26 = vadd.f32 %v690_v63, %v591_v9 }
 0x2a9   : > { %v3906_v39 = vpop.f32.mrf.mxu1 }
 0x2aa   : > { %v706_v42 = vadd.f32 %v3906_v39, %v606_v34 }
 0x2ab   : > { %v700_v47 = vpop.f32.mrf.mxu1 }
 0x2ac   : > { %719 = vrot.lane.b32.xlu1 %v706_v42, %s6349_s20  ;;  %v701_v50 = vadd.f32 %v700_v47, %v601_v35 }
 0x2b0   : > { %717 = vrot.lane.b32.xlu1 %v701_v50, %s6349_s20 }
 0x2b4   : > { %713 = vrot.lane.b32.xlu1 %v691_v26, %s6349_s20  ;;  %s5149_s20 = sld [smem:[#allocation4 + $0x34]] }
 0x31a   : > { %v716_v51 = vpop.permute.xlu1 %715 }
 0x31b   : > { %v726_v56 = vadd.f32 %v716_v51, %v696_v3 }
 0x31d   : > { %v3637_v19 = vmul.f32 -1.442695, %v726_v56 }
 0x31e   : > { %v720_v22 = vpop.permute.xlu1 %719 }
 0x31f   : > { %4010 = vpow2.f32 %v3637_v19  ;;  %v728_v27 = vadd.f32 %v720_v22, %v706_v42  ;;  %v4157_v42 = vmov 3   ;;  %v3815_v19 = vld [vmem:[%s6293_s1 + $0x3] ss:$8 sm:$0x3] }
 0x321   : > { %v3639_v55 = vmul.f32 -1.442695, %v728_v27 }
 0x322   : > { %v718_v30 = vpop.permute.xlu1 %717 }
 0x323   : > { %4012 = vpow2.f32 %v3639_v55  ;;  %v727_v8 = vadd.f32 %v718_v30, %v701_v50  ;;  %v6304_v50 = vlaneseq }
 0x325   : > { %v3638_v14 = vmul.f32 -1.442695, %v727_v8  ;;  %v4595_v9 = vshrl.u32 %v6304_v50, 7 }
 0x326   : > { %v714_v46 = vpop.permute.xlu1 %713 }
 0x327   : > { %v725_v57 = vadd.f32 %v714_v46, %v691_v26  ;;  %6437 = vst [vmem:[#allocation14_spill] sm:$0xff] %v4595_v9  ;;  %v4598_v26 = vsub.s32 0, %v4595_v9  ;;  %v4601_v51 = vsub.s32 1, %v4595_v9 }
 0x329   : > { %v3636_v58 = vmul.f32 -1.442695, %v725_v57  ;;  %6438 = vst [vmem:[#allocation15_spill] sm:$0xff] %v4598_v26  ;;  %6439 = vst [vmem:[#allocation16_spill] sm:$0xff] %v4601_v51  ;;  %v3186_v27 = vrot.slane %v3815_v19, %v4598_v26  ;;  %v3190_v30 = vrot.slane %v3815_v19, %v4601_v51 }
 0x32b   : > { %4014 = vpow2.f32 %v3636_v58  ;;  %v3191_v55 = vcombine.low %v3186_v27, %v3190_v30 }
 0x32c   : > { %v4011_v61 = vpop.eup %4010 }
 0x32d   : > { %v742_v62 = vadd.f32 1.0, %v4011_v61 }
 0x32f   : > { %4016 = vrcp.f32 %v742_v62 }
 0x330   : > { %4018 = vpow2.f32 %v3638_v14  ;;  %v4013_v15 = vpop.eup %4012 }
 0x331   : > { %v744_v34 = vadd.f32 1.0, %v4013_v15  ;;  %v4160_v15 = vmov 1966171168  }
 0x338   : > { %v4015_v18 = vpop.eup %4014 }
 0x339   : > { %v741_v23 = vadd.f32 1.0, %v4015_v18  ;;  %v833_v18 = vunpack.c.l.s4 %v4160_v15 }
 0x33b   : > { %4020 = vrcp.f32 %v741_v23 }
 0x33c   : > { %v4017_v35 = vpop.eup %4016  ;;  %4022 = vrcp.f32 %v744_v34 }
 0x33d   : > { %969 = vperm.xlu1 %3997, %v4017_v35   ;;  %774 = vperm.xlu0 %3995, %v4017_v35   ;;  %v4019_v38 = vpop.eup %4018 }
 0x33e   : > { %v743_v3 = vadd.f32 1.0, %v4019_v38  ;;  %v834_v38 = vunpack.c.0.s8 %v833_v18 }
 0x340   : > { %4024 = vrcp.f32 %v743_v3 }
 0x341   : > { %3998 = vset.pattern.permute.xlu1 %v4156_v43 }
 0x342   : > { %1157 = vperm.xlu1 %3998, %v4017_v35  }
 0x346   : > { %3999 = vset.pattern.permute.xlu1 %v4155_v31 }
 0x348   : > { %v4021_v63 = vpop.eup %4020 }
 0x349   : > { %965 = vperm.xlu1 %3999, %v4021_v63   ;;  %769 = vperm.xlu0 %3995, %v4021_v63   ;;  %v4023_v39 = vpop.eup %4022 }
 0x34d   : > { %977 = vperm.xlu1 %3999, %v4023_v39   ;;  %784 = vperm.xlu0 %3995, %v4023_v39   ;;  %v4025_v47 = vpop.eup %4024 }
 0x351   : > { %4001 = vset.pattern.permute.xlu1 %v4157_v42  ;;  %4000 = vset.pattern.permute.xlu0 %v4156_v43 }
 0x352   : > { %1353 = vperm.xlu1 %4001, %v4023_v39   ;;  %1165 = vperm.xlu0 %4000, %v4023_v39  }
 0x356   : > { %4003 = vset.pattern.permute.xlu1 %v4155_v31  ;;  %4002 = vset.pattern.permute.xlu0 %v4153_v4  ;;  %v3813_v4 = vld [vmem:[%s6293_s1 + $0x1] ss:$8 sm:$0x3] }
 0x357   : > { %973 = vperm.xlu1 %4003, %v4025_v47   ;;  %779 = vperm.xlu0 %4002, %v4025_v47   ;;  %v3120_v31 = vrot.slane %v3813_v4, %v4598_v26  ;;  %v3124_v56 = vrot.slane %v3813_v4, %v4601_v51 }
 0x359   : > { %v3125_v22 = vcombine.low %v3120_v31, %v3124_v56 }
 0x35b   : > { %4004 = vset.pattern.permute.xlu1 %v4157_v42  ;;  %4006 = vset.pattern.permute.xlu0 %v4157_v42 }
 0x35c   : > { %1345 = vperm.xlu1 %4004, %v4017_v35   ;;  %1349 = vperm.xlu0 %4006, %v4025_v47  }
 0x360   : > { %4005 = vset.pattern.permute.xlu1 %v4156_v43  ;;  %4007 = vset.pattern.permute.xlu0 %v4156_v43 }
 0x361   : > { %1161 = vperm.xlu1 %4005, %v4025_v47   ;;  %1153 = vperm.xlu0 %4007, %v4021_v63  }
 0x365   : > { %4008 = vset.pattern.permute.xlu1 %v4157_v42  ;;  %4009 = vset.pattern.permute.xlu0 %v4157_v42 }
 0x366   : > { %1341 = vperm.xlu1 %4008, %v4021_v63  }
 0x36a   : > { %3126 = vrot.lane.b32.xlu1 %v3125_v22, %s4158_s18  ;;  %s4165_s18 = smov 112  }
 0x36e   : > { %3192 = vrot.lane.b32.xlu1 %v3191_v55, %s4159_s29  ;;  %s3737_s29 = sld [smem:[#allocation4 + $0xb]] }
 0x3b8   : > { %v970_v46 = vpop.permute.xlu1 %969  ;;  %v775_v57 = vpop.permute.xlu0 %774 }
 0x3b9   : > { %v4643_v63 = vmul.f32 %v4430_v28, %v970_v46  ;;  %v4646_v39 = vmul.f32 %v4433_v29, %v970_v46 }
 0x3bb   : > { %6446 = vst [vmem:[#allocation23_spill] sm:$0xff] %v4643_v63  ;;  %6447 = vst [vmem:[#allocation24_spill] sm:$0xff] %v4646_v39 }
 0x3bd   : > { %v1158_v58 = vpop.permute.xlu1 %1157 }
 0x3c4   : > { %v770_v61 = vpop.permute.xlu0 %769  ;;  %v966_v62 = vpop.permute.xlu1 %965 }
 0x3c5   : > { %v4649_v42 = vmul.f32 %v770_v61, %v4460_v40  ;;  %v4652_v47 = vmul.f32 %v770_v61, %v4463_v41  ;;  %v4655_v4 = vmul.f32 %v4470_v44, %v966_v62  ;;  %v4701_v61 = vmul.f32 %v4450_v36, %v1158_v58 }
 0x3c7   : > { %6448 = vst [vmem:[#allocation25_spill] sm:$0xff] %v4649_v42  ;;  %6449 = vst [vmem:[#allocation26_spill] sm:$0xff] %v4652_v47 }
 0x3c8   : > { %v785_v8 = vpop.permute.xlu0 %784  ;;  %v978_v14 = vpop.permute.xlu1 %977  ;;  %6450 = vst [vmem:[#allocation27_spill] sm:$0xff] %v4655_v4  ;;  %6458 = vst [vmem:[#allocation35_spill] sm:$0xff] %v4701_v61 }
 0x3c9   : > { %v4618_v23 = vmul.f32 %v785_v8, %v4358_v0  ;;  %v4621_v34 = vmul.f32 %v785_v8, %v4361_v1  ;;  %v4624_v35 = vmul.f32 %v4374_v6, %v978_v14  ;;  %v4627_v43 = vmul.f32 %v4377_v7, %v978_v14 }
 0x3ca   : > { %v4634_v1 = vsub.s32 %v834_v38, %v4595_v9  ;;  %v4637_v6 = vmul.f32 %v775_v57, %v4420_v24  ;;  %v4640_v7 = vmul.f32 %v775_v57, %v4423_v25  ;;  %v4658_v24 = vmul.f32 %v4473_v45, %v966_v62 }
 0x3cb   : > { %6440 = vst [vmem:[#allocation17_spill] sm:$0xff] %v4618_v23  ;;  %6441 = vst [vmem:[#allocation18_spill] sm:$0xff] %v4621_v34  ;;  %884 = vmatprep.subr.mxu1 %v4621_v34  ;;  %1071 = vmatprep.subr.mxu0 %v4627_v43  ;;  %v1015_v45 = vmax.f32 %v4646_v39, %v4627_v43 }
 0x3cc   : > { %6442 = vst [vmem:[#allocation19_spill] sm:$0xff] %v4624_v35  ;;  %6443 = vst [vmem:[#allocation20_spill] sm:$0xff] %v4627_v43  ;;  %885 = vmatpush1.msra.mxu1 %v4618_v23  ;;  %1072 = vmatpush1.msra.mxu0 %v4624_v35  ;;  %v821_v44 = vmax.f32 %v4640_v7, %v4621_v34  ;;  %v812_v56 = vmax.f32 %v4637_v6, %v4618_v23 }
 0x3cd   : > { %v1166_v0 = vpop.permute.xlu0 %1165  ;;  %v1354_v3 = vpop.permute.xlu1 %1353  ;;  %6444 = vst [vmem:[#allocation21_spill] sm:$0xff] %v4637_v6  ;;  %6445 = vst [vmem:[#allocation22_spill] sm:$0xff] %v4640_v7 }
 0x3ce   : > { %6451 = vst [vmem:[#allocation28_spill] sm:$0xff] %v4658_v24  ;;  %v4689_v19 = vmul.f32 %v4364_v2, %v1166_v0  ;;  %v4692_v22 = vmul.f32 %v4371_v5, %v1166_v0  ;;  %v4704_v5 = vmul.f32 %v4453_v37, %v1158_v58  ;;  %v4707_v62 = vmul.f32 %v4400_v16, %v1354_v3 }
 0x3cf   : > { %v4710_v8 = vmul.f32 %v4403_v17, %v1354_v3 }
 0x3d0   : > { %6456 = vst [vmem:[#allocation33_spill] sm:$0xff] %v4689_v19  ;;  %6457 = vst [vmem:[#allocation34_spill] sm:$0xff] %v4692_v22  ;;  %v1203_v16 = vmax.f32 %v4704_v5, %v4692_v22  ;;  %v1194_v17 = vmax.f32 %v4701_v61, %v4689_v19 }
 0x3d1   : > { %6459 = vst [vmem:[#allocation36_spill] sm:$0xff] %v4704_v5  ;;  %6460 = vst [vmem:[#allocation37_spill] sm:$0xff] %v4707_v62 }
 0x3d2   : > { %v780_v25 = vpop.permute.xlu0 %779  ;;  %v974_v31 = vpop.permute.xlu1 %973  ;;  %6461 = vst [vmem:[#allocation38_spill] sm:$0xff] %v4710_v8 }
 0x3d3   : > { %v4661_v28 = vmul.f32 %v780_v25, %v4390_v12  ;;  %v4664_v29 = vmul.f32 %v780_v25, %v4393_v13  ;;  %v4667_v40 = vmul.f32 %v4384_v10, %v974_v31  ;;  %v4670_v41 = vmul.f32 %v4387_v11, %v974_v31 }
 0x3d4   : > { %v1006_v12 = vmax.f32 %v4643_v63, %v4624_v35 }
 0x3d5   : > { %6452 = vst [vmem:[#allocation29_spill] sm:$0xff] %v4661_v28  ;;  %6453 = vst [vmem:[#allocation30_spill] sm:$0xff] %v4664_v29  ;;  %886 = vmatprep.subr.mxu1 %v4664_v29  ;;  %1073 = vmatprep.subr.mxu0 %v4670_v41  ;;  %v820_v10 = vmax.f32 %v4652_v47, %v4664_v29  ;;  %v1014_v11 = vmax.f32 %v4658_v24, %v4670_v41 }
 0x3d6   : > { %6454 = vst [vmem:[#allocation31_spill] sm:$0xff] %v4667_v40  ;;  %6455 = vst [vmem:[#allocation32_spill] sm:$0xff] %v4670_v41  ;;  %v811_v13 = vmax.f32 %v4649_v42, %v4661_v28  ;;  %887 = vmatpush1.msra.mxu1 %v4661_v28  ;;  %1074 = vmatpush1.msra.mxu0 %v4667_v40  ;;  %v1005_v27 = vmax.f32 %v4655_v4, %v4667_v40 }
 0x3d7   : > { %v1350_v30 = vpop.permute.xlu0 %1349  ;;  %v1346_v55 = vpop.permute.xlu1 %1345  ;;  %888 = vmatprep.subr.mxu1 %v4640_v7  ;;  %1075 = vmatprep.subr.mxu0 %v4646_v39  ;;  %v822_v46 = vmax.f32 %v820_v10, %v821_v44  ;;  %v1016_v57 = vmax.f32 %v1014_v11, %v1015_v45 }
 0x3d8   : > { %v813_v2 = vmax.f32 %v811_v13, %v812_v56  ;;  %889 = vmatpush1.msra.mxu1 %v4637_v6  ;;  %1076 = vmatpush1.msra.mxu0 %v4643_v63  ;;  %v1007_v36 = vmax.f32 %v1005_v27, %v1006_v12  ;;  %v4716_v38 = vmul.f32 %v4483_v49, %v1346_v55  ;;  %v4161_v56 = vmov 1.0  }
 0x3d9   : > { %v823_v14 = vrot.slane %v822_v46, 4  ;;  %890 = vmatprep.subr.mxu1 %v4652_v47  ;;  %v1017_v15 = vrot.slane %v1016_v57, 4  ;;  %1077 = vmatprep.subr.mxu0 %v4658_v24  ;;  %v4727_v49 = vmul.f32 %v4440_v32, %v1350_v30  ;;  %v4730_v25 = vmul.f32 %v4443_v33, %v1350_v30 }
 0x3da   : > { %v814_v18 = vrot.slane %v813_v2, 4  ;;  %6462 = vst [vmem:[#allocation39_spill] sm:$0xff] %v4716_v38  ;;  %891 = vmatpush1.msra.mxu1 %v4649_v42  ;;  %v1008_v3 = vrot.slane %v1007_v36, 4  ;;  %1078 = vmatpush1.msra.mxu0 %v4655_v4  ;;  %v4733_v31 = vmul.f32 %v4480_v48, %v1346_v55 }
 0x3db   : > { %v824_v37 = vmax.f32 %v822_v46, %v823_v14  ;;  %v1018_v58 = vmax.f32 %v1016_v57, %v1017_v15  ;;  %1259 = vmatprep.subr.mxu1 %v4692_v22  ;;  %6463 = vst [vmem:[#allocation40_spill] sm:$0xff] %v4727_v49  ;;  %6464 = vst [vmem:[#allocation41_spill] sm:$0xff] %v4730_v25  ;;  %1447 = vmatprep.subr.mxu0 %v4710_v8 }
 0x3dc   : > { %v815_v0 = vmax.f32 %v813_v2, %v814_v18  ;;  %6465 = vst [vmem:[#allocation42_spill] sm:$0xff] %v4733_v31  ;;  %v1154_v44 = vpop.permute.xlu0 %1153  ;;  %v1162_v45 = vpop.permute.xlu1 %1161  ;;  %3640 = vmatmul.mubr.msk.f32.vlgmr.msra.gmra.mxu1 %vm505_vm8, %v4161_v56  ;;  %3665 = vmatmul.mubr.msk.f32.vlgmr.msra.gmra.mxu0 %vm505_vm8, %v4161_v56  ;;  %v1009_v27 = vmax.f32 %v1007_v36, %v1008_v3 }
 0x3dd   : > { %v4738_v12 = vmul.f32 %v4490_v52, %v1154_v44  ;;  %v4741_v10 = vmul.f32 %v4493_v53, %v1154_v44  ;;  %v4744_v32 = vmul.f32 %v4410_v20, %v1162_v45  ;;  %v4747_v33 = vmul.f32 %v4413_v21, %v1162_v45  ;;  %1260 = vmatpush1.msra.mxu1 %v4689_v19 }
 0x3de   : > { %v825_v48 = vrot.slane %v824_v37, 2  ;;  %v1019_v11 = vrot.slane %v1018_v58, 2  ;;  %v816_v13 = vrot.slane %v815_v0, 2  ;;  %1448 = vmatpush1.msra.mxu0 %v4707_v62  ;;  %v1391_v20 = vmax.f32 %v4716_v38, %v4710_v8  ;;  %1299 = vmatprep.mubr.f32.mxu1 %v4151_v54 }
 0x3df   : > { %6466 = vst [vmem:[#allocation43_spill] sm:$0xff] %v4738_v12  ;;  %6467 = vst [vmem:[#allocation44_spill] sm:$0xff] %v4741_v10  ;;  %1449 = vmatprep.subr.mxu0 %v4730_v25  ;;  %1261 = vmatprep.subr.mxu1 %v4747_v33  ;;  %v1202_v21 = vmax.f32 %v4741_v10, %v4747_v33  ;;  %v1193_v52 = vmax.f32 %v4738_v12, %v4744_v32  ;;  %v1010_v46 = vrot.slane %v1009_v27, 2 }
 0x3e0   : > { %6468 = vst [vmem:[#allocation45_spill] sm:$0xff] %v4744_v32  ;;  %6469 = vst [vmem:[#allocation46_spill] sm:$0xff] %v4747_v33  ;;  %v826_v53 = vmax.f32 %v824_v37, %v825_v48  ;;  %v1020_v30 = vmax.f32 %v1018_v58, %v1019_v11  ;;  %v817_v55 = vmax.f32 %v815_v0, %v816_v13  ;;  %1450 = vmatpush1.msra.mxu0 %v4727_v49 }
 0x3e1   : > { %1262 = vmatpush1.msra.mxu1 %v4744_v32  ;;  %v1342_v57 = vpop.permute.xlu1 %1341  ;;  %1451 = vmatprep.subr.mxu0 %v4716_v38  ;;  %v1382_v2 = vmax.f32 %v4733_v31, %v4707_v62  ;;  %v1204_v14 = vmax.f32 %v1202_v21, %v1203_v16  ;;  %v1195_v15 = vmax.f32 %v1193_v52, %v1194_v17 }
 0x3e2   : > { %1263 = vmatprep.subr.mxu1 %v4704_v5  ;;  %v4767_v18 = vmul.f32 %v4505_v59, %v1342_v57  ;;  %v4770_v36 = vmul.f32 %v4508_v60, %v1342_v57  ;;  %v1011_v37 = vmax.f32 %v1009_v27, %v1010_v46  ;;  %1452 = vmatpush1.msra.mxu0 %v4733_v31  ;;  %v818_v58 = vrot.slane %v817_v55, 1 }
 0x3e3   : > { %1264 = vmatpush1.msra.mxu1 %v4701_v61  ;;  %v1205_v0 = vrot.slane %v1204_v14, 4  ;;  %v1196_v3 = vrot.slane %v1195_v15, 4  ;;  %v827_v44 = vrot.slane %v826_v53, 1  ;;  %v1021_v45 = vrot.slane %v1020_v30, 1  ;;  %1487 = vmatprep.mubr.f32.mxu0 %v4151_v54 }
 0x3e4   : > { %6470 = vst [vmem:[#allocation47_spill] sm:$0xff] %v4767_v18  ;;  %6471 = vst [vmem:[#allocation48_spill] sm:$0xff] %v4770_v36  ;;  %1265 = vmatprep.subr.mxu1 %v4741_v10  ;;  %v1390_v59 = vmax.f32 %v4770_v36, %v4730_v25  ;;  %1453 = vmatprep.subr.mxu0 %v4770_v36  ;;  %v1381_v60 = vmax.f32 %v4767_v18, %v4727_v49  ;;  %v1012_v17 = vrot.slane %v1011_v37, 1 }
 0x3e5   : > { %1266 = vmatpush1.msra.mxu1 %v4738_v12  ;;  %v819_v16 = vmax.f32 %v817_v55, %v818_v58  ;;  %v1206_v48 = vmax.f32 %v1204_v14, %v1205_v0  ;;  %v1197_v11 = vmax.f32 %v1195_v15, %v1196_v3  ;;  %1454 = vmatpush1.msra.mxu0 %v4767_v18 }
 0x3e6   : > { %v828_v13 = vmax.f32 %v826_v53, %v827_v44  ;;  %v1022_v27 = vmax.f32 %v1020_v30, %v1021_v45  ;;  %v1392_v21 = vmax.f32 %v1390_v59, %v1391_v20  ;;  %v1383_v52 = vmax.f32 %v1381_v60, %v1382_v2  ;;  %3690 = vmatmul.mubr.msk.f32.vlgmr.msra.gmra.mxu1 %vm505_vm8, %v4161_v56 }
 0x3e7   : > { %v1013_v46 = vmax.f32 %v1011_v37, %v1012_v17  ;;  %v1207_v57 = vrot.slane %v1206_v48, 2  ;;  %v1198_v50 = vrot.slane %v1197_v11, 2  ;;  %3715 = vmatmul.mubr.msk.f32.vlgmr.msra.gmra.mxu0 %vm505_vm8, %v4161_v56 }
 0x3e8   : > { %v831_v8 = vcombine.low %v819_v16, %v828_v13  ;;  %v1393_v55 = vrot.slane %v1392_v21, 4  ;;  %v1384_v58 = vrot.slane %v1383_v52, 4 }
 0x3e9   : > { %v1025_v14 = vcombine.low %v1013_v46, %v1022_v27  ;;  %v1208_v15 = vmax.f32 %v1206_v48, %v1207_v57  ;;  %v1199_v0 = vmax.f32 %v1197_v11, %v1198_v50  ;;  %v3814_v50 = vld [vmem:[%s6293_s1 + $0x2] ss:$8 sm:$0x3] }
 0x3ea   : > { %v838_v53 = vrot.slane %v831_v8, %v4634_v1  ;;  %v1394_v30 = vmax.f32 %v1392_v21, %v1393_v55  ;;  %v1385_v20 = vmax.f32 %v1383_v52, %v1384_v58  ;;  %v3153_v48 = vrot.slane %v3814_v50, %v4598_v26  ;;  %v3816_v55 = vld [vmem:[%s6293_s1 + $0x4] ss:$8 sm:$0x3] }
 0x3eb   : > { %v1032_v37 = vrot.slane %v1025_v14, %v4634_v1  ;;  %v1200_v3 = vrot.slane %v1199_v0, 1  ;;  %v1209_v54 = vrot.slane %v1208_v15, 1  ;;  %v3157_v11 = vrot.slane %v3814_v50, %v4601_v51 }
 0x3ec   : > { %v845_v2 = vrot.slane %v838_v53, %v4634_v1  ;;  %v1395_v44 = vrot.slane %v1394_v30, 2  ;;  %v1386_v45 = vrot.slane %v1385_v20, 2  ;;  %v3219_v14 = vrot.slane %v3816_v55, %v4598_v26 }
 0x3ed   : > { %v1201_v56 = vmax.f32 %v1199_v0, %v1200_v3  ;;  %v1210_v59 = vmax.f32 %v1208_v15, %v1209_v54  ;;  %v1039_v8 = vrot.slane %v1032_v37, %v4634_v1  ;;  %v3158_v52 = vcombine.low %v3153_v48, %v3157_v11 }
 0x3ee   : > { %846 = vrot.lane.b32.xlu1 %v845_v2, %s4162_s0  ;;  %v1396_v60 = vmax.f32 %v1394_v30, %v1395_v44  ;;  %v1387_v16 = vmax.f32 %v1385_v20, %v1386_v45  ;;  %v3223_v15 = vrot.slane %v3816_v55, %v4601_v51  ;;  %v4808_v2 = vpop.permute.xlu1 %3126  ;;  %v6474_v3 = vlaneseq }
 0x3ef   : > { %v1213_v17 = vcombine.low %v1201_v56, %v1210_v59  ;;  %3159 = vrot.lane.b32.xlu0 %v3158_v52, %s4163_s23  ;;  %6472 = vst [vmem:[#allocation49_spill] sm:$0xff] %v4808_v2  ;;  %v1642_v55 = vstv %s3731_s16  ;;  %s3747_s23 = sld [smem:[#allocation4 + $0x10]] }
 0x3f0   : > { %v1388_v13 = vrot.slane %v1387_v16, 1  ;;  %v1397_v27 = vrot.slane %v1396_v60, 1  ;;  %v3224_v53 = vcombine.low %v3219_v14, %v3223_v15  ;;  %vm853_vm12 = vcmp.ge.s32.totalorder %v6474_v3, 51  ;;  %s3751_s16 = sld [smem:[#allocation4 + $0x12]] }
 0x3f1   : > { %v1220_v21 = vrot.slane %v1213_v17, %v4634_v1  ;;  %vm854_vm13 = vcmp.lt.s32.totalorder %v6474_v3, 307  ;;  %v1678_v15 = vstv %s3733_s17  ;;  %s3753_s17 = sld [smem:[#allocation4 + $0x13]] }
 0x3f2   : > { %1040 = vrot.lane.b32.xlu1 %v1039_v8, %s4162_s0  ;;  %v1389_v46 = vmax.f32 %v1387_v16, %v1388_v13  ;;  %v1398_v57 = vmax.f32 %v1396_v60, %v1397_v27  ;;  %v4810_v37 = vpop.permute.xlu1 %3192  ;;  %vm4814_vm15 = vmand %vm853_vm12, %vm854_vm13  ;;  %v1608_v27 = vstv %s3729_s9  ;;  %s4166_s9 = smov 96  }
 0x3f3   : > { %v1227_v58 = vrot.slane %v1220_v21, %v4634_v1  ;;  %3225 = vrot.lane.b32.xlu0 %v3224_v53, %s4164_s8  ;;  %6473 = vst [vmem:[#allocation50_spill] sm:$0xff] %v4810_v37  ;;  %s3749_s8 = sld [smem:[#allocation4 + $0x11]] }
 0x3f4   : > { %v1401_v0 = vcombine.low %v1389_v46, %v1398_v57 }
 0x3f6   : > { %1228 = vrot.lane.b32.xlu1 %v1227_v58, %s4162_s0  ;;  %v1408_v30 = vrot.slane %v1401_v0, %v4634_v1 }
 0x3f8   : > { %v1415_v20 = vrot.slane %v1408_v30, %v4634_v1  ;;  %v1714_v30 = vstv %s3735_s10  ;;  %s3755_s10 = sld [smem:[#allocation4 + $0x14]] }
 0x3fa   : > { %1416 = vrot.lane.b32.xlu1 %v1415_v20, %s4162_s0 }
 0x460   : > { %v847_v54 = vpop.permute.xlu1 %846 }
 0x461   : > { %v848_v45 = vrot.slane %v847_v54, 7 }
 0x463   : > { %v850_v56 = vsel %vm849_vm14, %v848_v45, %v847_v54  ;;  %v1750_v54 = vstv %s3737_s29  ;;  %s3757_s29 = sld [smem:[#allocation4 + $0x15]] }
 0x464   : > { %856 = vst.msk [vmem:[#allocation2] ss:$4 sm:$0x7] %vm4814_vm15, %v850_v56  ;;  %v1041_v59 = vpop.permute.xlu1 %1040 }
 0x465   : > { %v1042_v60 = vrot.slane %v1041_v59, 7 }
 0x467   : > { %v1043_v16 = vsel %vm849_vm14, %v1042_v60, %v1041_v59  ;;  %v1786_v59 = vstv %s3739_s12  ;;  %s3759_s12 = sld [smem:[#allocation4 + $0x16]] }
 0x468   : > { %1046 = vst.msk [vmem:[#allocation2 + $0x1] ss:$4 sm:$0x7] %vm4814_vm15, %v1043_v16  ;;  %v1229_v50 = vpop.permute.xlu1 %1228 }
 0x469   : > { %v1230_v8 = vrot.slane %v1229_v50, 7 }
 0x46b   : > { %v1231_v17 = vsel %vm849_vm14, %v1230_v8, %v1229_v50  ;;  %v1822_v50 = vstv %s3741_s15  ;;  %s3761_s15 = sld [smem:[#allocation4 + $0x17]] }
 0x46c   : > { %1234 = vst.msk [vmem:[#allocation2 + $0x2] ss:$4 sm:$0x7] %vm4814_vm15, %v1231_v17  ;;  %v1417_v48 = vpop.permute.xlu1 %1416 }
 0x46d   : > { %v1418_v11 = vrot.slane %v1417_v48, 7 }
 0x46f   : > { %v1419_v13 = vsel %vm849_vm14, %v1418_v11, %v1417_v48  ;;  %v1858_v48 = vstv %s3743_s21  ;;  %s3763_s21 = sld [smem:[#allocation4 + $0x18]] }
 0x470   : > { %1422 = vst.msk [vmem:[#allocation2 + $0x3] ss:$4 sm:$0x7] %vm4814_vm15, %v1419_v13 }
 0x477   : > { %v4830_v21 = vld [vmem:[#allocation2] sm:$0xff]  ;;  %v4832_v52 = vld [vmem:[#allocation2 + $0x8] sm:$0xf] }
 0x478   : > { %v1610_v46 = vmul.f32 %v1608_v27, %v4832_v52  ;;  %v1609_v57 = vmul.f32 %v1608_v27, %v4830_v21  ;;  %v1644_v58 = vmul.f32 %v1642_v55, %v4832_v52  ;;  %v1643_v14 = vmul.f32 %v1642_v55, %v4830_v21 }
 0x479   : > { %v1680_v0 = vmul.f32 %v1678_v15, %v4832_v52  ;;  %v1679_v53 = vmul.f32 %v1678_v15, %v4830_v21  ;;  %v1716_v20 = vmul.f32 %v1714_v30, %v4832_v52  ;;  %v1715_v3 = vmul.f32 %v1714_v30, %v4830_v21 }
 0x47a   : > { %1615 = vrot.lane.b32.xlu0 %v1610_v46, %s4165_s18  ;;  %1613 = vrot.lane.b32.xlu1 %v1609_v57, %s4165_s18  ;;  %v1752_v45 = vmul.f32 %v1750_v54, %v4832_v52  ;;  %v1751_v56 = vmul.f32 %v1750_v54, %v4830_v21  ;;  %v1788_v60 = vmul.f32 %v1786_v59, %v4832_v52  ;;  %v1891_v27 = vstv %s3745_s11  ;;  %s6358_s11 = smov 80  }
 0x47b   : > { %v1787_v16 = vmul.f32 %v1786_v59, %v4830_v21  ;;  %v1824_v8 = vmul.f32 %v1822_v50, %v4832_v52  ;;  %v1823_v17 = vmul.f32 %v1822_v50, %v4830_v21  ;;  %v1860_v11 = vmul.f32 %v1858_v48, %v4832_v52 }
 0x47c   : > { %v1859_v13 = vmul.f32 %v1858_v48, %v4830_v21  ;;  %v1893_v46 = vmul.f32 %v1891_v27, %v4832_v52  ;;  %v1892_v57 = vmul.f32 %v1891_v27, %v4830_v21  ;;  %v1927_v55 = vstv %s3747_s23  ;;  %s3765_s23 = sld [smem:[#allocation4 + $0x19]] }
 0x47d   : > { %v1963_v15 = vstv %s3749_s8  ;;  %v1999_v30 = vstv %s3751_s16  ;;  %v2035_v54 = vstv %s3753_s17  ;;  %v2071_v59 = vstv %s3755_s10  ;;  %s3767_s8 = sld [smem:[#allocation4 + $0x1a]] }
 0x47e   : > { %1649 = vrot.lane.b32.xlu0 %v1644_v58, %s4165_s18  ;;  %1647 = vrot.lane.b32.xlu1 %v1643_v14, %s4165_s18  ;;  %v1929_v58 = vmul.f32 %v1927_v55, %v4832_v52  ;;  %v1928_v14 = vmul.f32 %v1927_v55, %v4830_v21  ;;  %v2107_v50 = vstv %s3757_s29  ;;  %v2140_v48 = vstv %s3759_s12  ;;  %s3769_s16 = sld [smem:[#allocation4 + $0x1b]] }
 0x47f   : > { %v2176_v27 = vstv %s3761_s15  ;;  %v2212_v55 = vstv %s3763_s21  ;;  %s3771_s17 = sld [smem:[#allocation4 + $0x1c]]  ;;  %s6355_s15 = smov 64  }
 0x480   : > { %s3773_s10 = sld [smem:[#allocation4 + $0x1d]] }
 0x481   : > { %s3775_s29 = sld [smem:[#allocation4 + $0x1e]] }
 0x482   : > { %1685 = vrot.lane.b32.xlu0 %v1680_v0, %s4165_s18  ;;  %1683 = vrot.lane.b32.xlu1 %v1679_v53, %s4165_s18  ;;  %v1965_v0 = vmul.f32 %v1963_v15, %v4832_v52  ;;  %v1964_v53 = vmul.f32 %v1963_v15, %v4830_v21  ;;  %v2248_v15 = vstv %s3765_s23  ;;  %s3777_s12 = sld [smem:[#allocation4 + $0x1f]] }
 0x483   : > { %s3787_s21 = sld [smem:[#allocation4 + $0x24]] }
 0x484   : > { %s3779_s23 = sld [smem:[#allocation4 + $0x20]] }
 0x486   : > { %1721 = vrot.lane.b32.xlu0 %v1716_v20, %s4165_s18  ;;  %1719 = vrot.lane.b32.xlu1 %v1715_v3, %s4165_s18  ;;  %v2001_v20 = vmul.f32 %v1999_v30, %v4832_v52  ;;  %v2000_v3 = vmul.f32 %v1999_v30, %v4830_v21  ;;  %v2284_v30 = vstv %s3767_s8  ;;  %s3789_s8 = sld [smem:[#allocation4 + $0x25]] }
 0x48a   : > { %1757 = vrot.lane.b32.xlu0 %v1752_v45, %s4165_s18  ;;  %1755 = vrot.lane.b32.xlu1 %v1751_v56, %s4165_s18  ;;  %v2037_v45 = vmul.f32 %v2035_v54, %v4832_v52  ;;  %v2036_v56 = vmul.f32 %v2035_v54, %v4830_v21  ;;  %v2320_v54 = vstv %s3769_s16  ;;  %s3781_s16 = sld [smem:[#allocation4 + $0x21]] }
 0x48e   : > { %1793 = vrot.lane.b32.xlu0 %v1788_v60, %s4165_s18  ;;  %1791 = vrot.lane.b32.xlu1 %v1787_v16, %s4165_s18  ;;  %v2073_v60 = vmul.f32 %v2071_v59, %v4832_v52  ;;  %v2072_v16 = vmul.f32 %v2071_v59, %v4830_v21  ;;  %v2356_v59 = vstv %s3771_s17  ;;  %s6353_s17 = smov 48  }
 0x492   : > { %1829 = vrot.lane.b32.xlu0 %v1824_v8, %s4165_s18  ;;  %1827 = vrot.lane.b32.xlu1 %v1823_v17, %s4165_s18  ;;  %v2109_v8 = vmul.f32 %v2107_v50, %v4832_v52  ;;  %v2108_v17 = vmul.f32 %v2107_v50, %v4830_v21  ;;  %v2389_v50 = vstv %s3773_s10  ;;  %s3791_s10 = sld [smem:[#allocation4 + $0x26]] }
 0x496   : > { %1865 = vrot.lane.b32.xlu0 %v1860_v11, %s4166_s9  ;;  %1863 = vrot.lane.b32.xlu1 %v1859_v13, %s4166_s9  ;;  %v2142_v11 = vmul.f32 %v2140_v48, %v4832_v52  ;;  %v2141_v13 = vmul.f32 %v2140_v48, %v4830_v21  ;;  %v2425_v48 = vstv %s3775_s29  ;;  %s3801_s29 = sld [smem:[#allocation4 + $0x2b]] }
 0x49a   : > { %1898 = vrot.lane.b32.xlu0 %v1893_v46, %s4166_s9  ;;  %1896 = vrot.lane.b32.xlu1 %v1892_v57, %s4166_s9  ;;  %v2178_v46 = vmul.f32 %v2176_v27, %v4832_v52  ;;  %v2177_v57 = vmul.f32 %v2176_v27, %v4830_v21  ;;  %v2461_v27 = vstv %s3777_s12  ;;  %s3783_s12 = sld [smem:[#allocation4 + $0x22]] }
 0x49e   : > { %1934 = vrot.lane.b32.xlu0 %v1929_v58, %s4166_s9  ;;  %1932 = vrot.lane.b32.xlu1 %v1928_v14, %s4166_s9  ;;  %v2214_v58 = vmul.f32 %v2212_v55, %v4832_v52  ;;  %v2213_v14 = vmul.f32 %v2212_v55, %v4830_v21  ;;  %v2638_v55 = vstv %s3787_s21  ;;  %s3793_s21 = sld [smem:[#allocation4 + $0x27]] }
 0x4a2   : > { %1970 = vrot.lane.b32.xlu0 %v1965_v0, %s4166_s9  ;;  %1968 = vrot.lane.b32.xlu1 %v1964_v53, %s4166_s9  ;;  %v2250_v0 = vmul.f32 %v2248_v15, %v4832_v52  ;;  %v2249_v53 = vmul.f32 %v2248_v15, %v4830_v21  ;;  %v2497_v15 = vstv %s3779_s23  ;;  %s3803_s23 = sld [smem:[#allocation4 + $0x2c]] }
 0x4a6   : > { %2006 = vrot.lane.b32.xlu0 %v2001_v20, %s4166_s9  ;;  %2004 = vrot.lane.b32.xlu1 %v2000_v3, %s4166_s9  ;;  %v2286_v20 = vmul.f32 %v2284_v30, %v4832_v52  ;;  %v2285_v3 = vmul.f32 %v2284_v30, %v4830_v21  ;;  %v2674_v30 = vstv %s3789_s8  ;;  %s6351_s8 = smov 32  }
 0x4aa   : > { %2042 = vrot.lane.b32.xlu0 %v2037_v45, %s4166_s9  ;;  %2040 = vrot.lane.b32.xlu1 %v2036_v56, %s4166_s9  ;;  %v2322_v45 = vmul.f32 %v2320_v54, %v4832_v52  ;;  %v2321_v56 = vmul.f32 %v2320_v54, %v4830_v21  ;;  %v2675_v54 = vmul.f32 %v2674_v30, %v4830_v21 }
 0x4ae   : > { %2078 = vrot.lane.b32.xlu0 %v2073_v60, %s4166_s9  ;;  %2076 = vrot.lane.b32.xlu1 %v2072_v16, %s4166_s9  ;;  %v2358_v60 = vmul.f32 %v2356_v59, %v4832_v52  ;;  %v2357_v16 = vmul.f32 %v2356_v59, %v4830_v21 }
 0x4b2   : > { %2114 = vrot.lane.b32.xlu0 %v2109_v8, %s6358_s11  ;;  %2112 = vrot.lane.b32.xlu1 %v2108_v17, %s6358_s11  ;;  %v2391_v8 = vmul.f32 %v2389_v50, %v4832_v52  ;;  %v2390_v17 = vmul.f32 %v2389_v50, %v4830_v21 }
 0x4b6   : > { %2147 = vrot.lane.b32.xlu0 %v2142_v11, %s6358_s11  ;;  %2145 = vrot.lane.b32.xlu1 %v2141_v13, %s6358_s11  ;;  %v2427_v11 = vmul.f32 %v2425_v48, %v4832_v52  ;;  %v2426_v13 = vmul.f32 %v2425_v48, %v4830_v21  ;;  %v2886_v48 = vstv %s3801_s29  ;;  %s3797_s29 = sld [smem:[#allocation4 + $0x29]] }
 0x4ba   : > { %2183 = vrot.lane.b32.xlu0 %v2178_v46, %s6358_s11  ;;  %2181 = vrot.lane.b32.xlu1 %v2177_v57, %s6358_s11  ;;  %v2463_v46 = vmul.f32 %v2461_v27, %v4832_v52  ;;  %v2462_v57 = vmul.f32 %v2461_v27, %v4830_v21  ;;  %v2887_v27 = vmul.f32 %v2886_v48, %v4830_v21 }
 0x4be   : > { %2219 = vrot.lane.b32.xlu0 %v2214_v58, %s6358_s11  ;;  %2217 = vrot.lane.b32.xlu1 %v2213_v14, %s6358_s11  ;;  %v2640_v58 = vmul.f32 %v2638_v55, %v4832_v52  ;;  %v2639_v14 = vmul.f32 %v2638_v55, %v4830_v21 }
 0x4c2   : > { %2255 = vrot.lane.b32.xlu0 %v2250_v0, %s6358_s11  ;;  %2253 = vrot.lane.b32.xlu1 %v2249_v53, %s6358_s11  ;;  %v2499_v0 = vmul.f32 %v2497_v15, %v4832_v52  ;;  %v2498_v53 = vmul.f32 %v2497_v15, %v4830_v21 }
 0x4c6   : > { %2291 = vrot.lane.b32.xlu0 %v2286_v20, %s6358_s11  ;;  %2289 = vrot.lane.b32.xlu1 %v2285_v3, %s6358_s11  ;;  %v4940_v20 = vpop.permute.xlu0 %3159  ;;  %v2676_v3 = vmul.f32 %v2674_v30, %v4832_v52  ;;  %v2922_v30 = vstv %s3803_s23  ;;  %s5000_s23 = sld [smem:[#allocation4 + $0x30]] }
 0x4c7   : > { %6477 = vst [vmem:[#allocation51_spill] sm:$0xff] %v4940_v20 }
 0x4ca   : > { %2327 = vrot.lane.b32.xlu0 %v2322_v45, %s6358_s11  ;;  %2325 = vrot.lane.b32.xlu1 %v2321_v56, %s6358_s11  ;;  %v2533_v45 = vstv %s3781_s16  ;;  %v4948_v56 = vpop.permute.xlu0 %3225  ;;  %s3795_s16 = sld [smem:[#allocation4 + $0x28]] }
 0x4cb   : > { %6478 = vst [vmem:[#allocation52_spill] sm:$0xff] %v4948_v56  ;;  %v2535_v59 = vmul.f32 %v2533_v45, %v4832_v52  ;;  %s5163_s11 = sld [smem:[#allocation4 + $0x38]] }
 0x4cc   : > { %v3066_v38 = vstv %s5000_s23  ;;  %s5143_s23 = sld [smem:[#allocation4 + $0x32]] }
 0x4ce   : > { %2363 = vrot.lane.b32.xlu0 %v2358_v60, %s6355_s15  ;;  %2361 = vrot.lane.b32.xlu1 %v2357_v16, %s6355_s15  ;;  %v2534_v60 = vmul.f32 %v2533_v45, %v4830_v21  ;;  %v2710_v16 = vstv %s3791_s10  ;;  %s3805_s10 = sld [smem:[#allocation4 + $0x2d]]  ;;  %v2923_v45 = vmul.f32 %v2922_v30, %v4830_v21 }
 0x4d1   : > { %v1625_v2 = vstv %s5163_s11  ;;  %s3736_s11 = sld [smem:[#allocation4 + $0x3b]] }
 0x4d2   : > { %2396 = vrot.lane.b32.xlu0 %v2391_v8, %s6355_s15  ;;  %2394 = vrot.lane.b32.xlu1 %v2390_v17, %s6355_s15  ;;  %v2712_v8 = vmul.f32 %v2710_v16, %v4832_v52  ;;  %v2711_v17 = vmul.f32 %v2710_v16, %v4830_v21 }
 0x4d6   : > { %2432 = vrot.lane.b32.xlu0 %v2427_v11, %s6355_s15  ;;  %2430 = vrot.lane.b32.xlu1 %v2426_v13, %s6355_s15  ;;  %v2888_v13 = vmul.f32 %v2886_v48, %v4832_v52 }
 0x4da   : > { %2468 = vrot.lane.b32.xlu0 %v2463_v46, %s6355_s15  ;;  %2466 = vrot.lane.b32.xlu1 %v2462_v57, %s6355_s15  ;;  %v2569_v46 = vstv %s3783_s12  ;;  %s3807_s12 = sld [smem:[#allocation4 + $0x2e]] }
 0x4db   : > { %v2571_v55 = vmul.f32 %v2569_v46, %v4832_v52 }
 0x4de   : > { %2645 = vrot.lane.b32.xlu0 %v2640_v58, %s6353_s17  ;;  %2643 = vrot.lane.b32.xlu1 %v2639_v14, %s6353_s17  ;;  %v2570_v58 = vmul.f32 %v2569_v46, %v4830_v21  ;;  %v2746_v14 = vstv %s3793_s21  ;;  %v2818_v46 = vstv %s3797_s29  ;;  %s3809_s21 = sld [smem:[#allocation4 + $0x2f]] }
 0x4df   : > { %s5136_s29 = sld [smem:[#allocation4 + $0x4]] }
 0x4e2   : > { %2504 = vrot.lane.b32.xlu0 %v2499_v0, %s6355_s15  ;;  %2502 = vrot.lane.b32.xlu1 %v2498_v53, %s6355_s15  ;;  %v2748_v0 = vmul.f32 %v2746_v14, %v4832_v52  ;;  %v2747_v53 = vmul.f32 %v2746_v14, %v4830_v21  ;;  %v2819_v14 = vmul.f32 %v2818_v46, %v4830_v21 }
 0x4e6   : > { %2681 = vrot.lane.b32.xlu0 %v2676_v3, %s6353_s17  ;;  %2679 = vrot.lane.b32.xlu1 %v2675_v54, %s6353_s17  ;;  %v2924_v54 = vmul.f32 %v2922_v30, %v4832_v52  ;;  %v2994_v30 = vstv %s3807_s12  ;;  %s5138_s12 = sld [smem:[#allocation4 + $0x5]] }
 0x4ea   : > { %2540 = vrot.lane.b32.xlu0 %v2535_v59, %s6355_s15  ;;  %2538 = vrot.lane.b32.xlu1 %v2534_v60, %s6355_s15  ;;  %v2782_v59 = vstv %s3795_s16  ;;  %s5127_s16 = sld [smem:[#allocation4 + $0x2]] }
 0x4eb   : > { %v2784_v16 = vmul.f32 %v2782_v59, %v4832_v52 }
 0x4ec   : > { %v4954_v50 = vpop.permute.xlu0 %1615 }
 0x4ee   : > { %2717 = vrot.lane.b32.xlu0 %v2712_v8, %s6353_s17  ;;  %2715 = vrot.lane.b32.xlu1 %v2711_v17, %s6353_s17  ;;  %v2783_v8 = vmul.f32 %v2782_v59, %v4830_v21  ;;  %v2958_v17 = vstv %s3805_s10  ;;  %s5130_s10 = sld [smem:[#allocation4 + $0x3]] }
 0x4f0   : > { %v4960_v11 = vpop.permute.xlu0 %1649 }
 0x4f2   : > { %2893 = vrot.lane.b32.xlu0 %v2888_v13, %s6351_s8  ;;  %2891 = vrot.lane.b32.xlu1 %v2887_v27, %s6351_s8  ;;  %v2960_v13 = vmul.f32 %v2958_v17, %v4832_v52  ;;  %v2959_v27 = vmul.f32 %v2958_v17, %v4830_v21 }
 0x4f4   : > { %v4966_v57 = vpop.permute.xlu0 %1685 }
 0x4f6   : > { %2576 = vrot.lane.b32.xlu0 %v2571_v55, %s6355_s15  ;;  %2574 = vrot.lane.b32.xlu1 %v2570_v58, %s6355_s15  ;;  %v926_v55 = vpop.f32.mrf.mxu1  ;;  %s5160_s15 = sld [smem:[#allocation4 + $0x37]] }
 0x4f7   : > { %v931_v59 = vmul.f32 0.03125, %v926_v55 }
 0x4f8   : > { %v4972_v15 = vpop.permute.xlu0 %1721 }
 0x4fa   : > { %2753 = vrot.lane.b32.xlu0 %v2748_v0, %s6353_s17  ;;  %2751 = vrot.lane.b32.xlu1 %v2747_v53, %s6353_s17  ;;  %v2820_v0 = vmul.f32 %v2818_v46, %v4832_v52  ;;  %v1113_v53 = vpop.f32.mrf.mxu0 }
 0x4fb   : > { %v1118_v62 = vmul.f32 0.03125, %v1113_v53 }
 0x4fc   : > { %v4978_v3 = vpop.permute.xlu0 %1757 }
 0x4fe   : > { %2929 = vrot.lane.b32.xlu0 %v2924_v54, %s6351_s8  ;;  %2927 = vrot.lane.b32.xlu1 %v2923_v45, %s6351_s8  ;;  %v928_v54 = vpop.f32.mrf.mxu1 }
 0x4ff   : > { %v932_v17 = vmul.f32 0.03125, %v928_v54 }
 0x500   : > { %v4984_v60 = vpop.permute.xlu0 %1793  ;;  %v1301_v46 = vpop.f32.mrf.mxu1 }
 0x501   : > { %v935_v25 = vcombine.low %v931_v59, %v932_v17  ;;  %v1306_v59 = vmul.f32 0.03125, %v1301_v46  ;;  %v3068_v17 = vmul.f32 %v3066_v38, %v4832_v52 }
 0x502   : > { %2789 = vrot.lane.b32.xlu0 %v2784_v16, %s6353_s17  ;;  %2787 = vrot.lane.b32.xlu1 %v2783_v8, %s6353_s17  ;;  %v2995_v16 = vmul.f32 %v2994_v30, %v4830_v21  ;;  %v2996_v8 = vmul.f32 %v2994_v30, %v4832_v52  ;;  %v1303_v31 = vpop.f32.mrf.mxu1 }
 0x503   : > { %v942_v53 = vrot.slane %v935_v25, %v4634_v1 }
 0x504   : > { %v4990_v48 = vpop.permute.xlu0 %1829 }
 0x506   : > { %2965 = vrot.lane.b32.xlu0 %v2960_v13, %s6351_s8  ;;  %2963 = vrot.lane.b32.xlu1 %v2959_v27, %s6351_s8  ;;  %v1115_v13 = vpop.f32.mrf.mxu0  ;;  %v3030_v27 = vstv %s3809_s21  ;;  %s5140_s21 = sld [smem:[#allocation4 + $0x6]] }
 0x507   : > { %v3032_v49 = vmul.f32 %v3030_v27, %v4832_v52  ;;  %v3031_v55 = vmul.f32 %v3030_v27, %v4830_v21  ;;  %v949_v27 = vrot.slane %v942_v53, %v4634_v1 }
 0x508   : > { %v4996_v58 = vpop.permute.xlu0 %1865  ;;  %v1489_v30 = vpop.f32.mrf.mxu0 }
 0x50a   : > { %2823 = vrot.lane.b32.xlu0 %v2819_v14, %s6353_s17  ;;  %2825 = vrot.lane.b32.xlu1 %v2820_v0, %s6353_s17  ;;  %v1119_v14 = vmul.f32 0.03125, %v1115_v13  ;;  %v1307_v13 = vmul.f32 0.03125, %v1303_v31  ;;  %v1491_v36 = vpop.f32.mrf.mxu0  ;;  %s5156_s17 = sld [smem:[#allocation4 + $0x36]] }
 0x50b   : > { %v1495_v25 = vmul.f32 0.03125, %v1491_v36 }
 0x50c   : > { %v5004_v45 = vpop.permute.xlu0 %1898  ;;  %v1122_v54 = vcombine.low %v1118_v62, %v1119_v14  ;;  %v1310_v62 = vcombine.low %v1306_v59, %v1307_v13  ;;  %v5047_v13 = vpop.permute.xlu1 %1613 }
 0x50e   : > { %2999 = vrot.lane.b32.xlu0 %v2995_v16, %s6351_s8  ;;  %3001 = vrot.lane.b32.xlu1 %v2996_v8, %s6351_s8  ;;  %v3067_v16 = vmul.f32 %v3066_v38, %v4830_v21  ;;  %v1317_v38 = vrot.slane %v1310_v62, %v4634_v1 }
 0x510   : > { %v5010_v0 = vpop.permute.xlu0 %1934  ;;  %v5053_v62 = vpop.permute.xlu1 %1647 }
 0x512   : > { %3037 = vrot.lane.b32.xlu0 %v3032_v49, %s6351_s8  ;;  %3035 = vrot.lane.b32.xlu1 %v3031_v55, %s6351_s8  ;;  %v1129_v49 = vrot.slane %v1122_v54, %v4634_v1  ;;  %v1494_v55 = vmul.f32 0.03125, %v1489_v30  ;;  %v1324_v54 = vrot.slane %v1317_v38, %v4634_v1 }
 0x514   : > { %v5019_v8 = vpop.permute.xlu0 %1970  ;;  %v1136_v46 = vrot.slane %v1129_v49, %v4634_v1  ;;  %v1498_v31 = vcombine.low %v1494_v55, %v1495_v25  ;;  %v5057_v25 = vpop.permute.xlu1 %1683 }
 0x516   : > { %3071 = vrot.lane.b32.xlu0 %v3067_v16, %s6351_s8  ;;  %3073 = vrot.lane.b32.xlu1 %v3068_v17, %s6351_s8  ;;  %v1505_v16 = vrot.slane %v1498_v31, %v4634_v1  ;;  %s5153_s8 = sld [smem:[#allocation4 + $0x35]] }
 0x518   : > { %v5026_v14 = vpop.permute.xlu0 %2006  ;;  %v1512_v36 = vrot.slane %v1505_v16, %v4634_v1  ;;  %v5063_v38 = vpop.permute.xlu1 %1719 }
 0x51a   : > { %950 = vrot.lane.b32.xlu0 %v949_v27, %s4162_s0 }
 0x51c   : > { %v5031_v18 = vpop.permute.xlu0 %2042 }
 0x51d   : > { %6479 = vst [vmem:[#allocation53_spill] sm:$0xff] %v5031_v18 }
 0x51e   : > { %1137 = vrot.lane.b32.xlu0 %v1136_v46, %s4162_s0 }
 0x520   : > { %v5036_v53 = vpop.permute.xlu0 %2078 }
 0x521   : > { %6480 = vst [vmem:[#allocation54_spill] sm:$0xff] %v5036_v53 }
 0x522   : > { %1325 = vrot.lane.b32.xlu0 %v1324_v54, %s4162_s0  ;;  %v5067_v54 = vpop.permute.xlu1 %1755 }
 0x524   : > { %v5040_v30 = vpop.permute.xlu0 %2114 }
 0x525   : > { %6481 = vst [vmem:[#allocation55_spill] sm:$0xff] %v5040_v30 }
 0x526   : > { %1513 = vrot.lane.b32.xlu0 %v1512_v36, %s4162_s0  ;;  %v5073_v22 = vpop.permute.xlu1 %1791  ;;  %s5125_s0 = sld [smem:[#allocation4 + $0x1]] }
 0x528   : > { %v5043_v59 = vpop.permute.xlu0 %2147 }
 0x529   : > { %6482 = vst [vmem:[#allocation56_spill] sm:$0xff] %v5043_v59 }
 0x52a   : > { %v5077_v33 = vpop.permute.xlu1 %1827 }
 0x52c   : > { %v5045_v17 = vpop.permute.xlu0 %2183 }
 0x52d   : > { %6483 = vst [vmem:[#allocation57_spill] sm:$0xff] %v5045_v17 }
 0x52e   : > { %v5083_v61 = vpop.permute.xlu1 %1863 }
 0x530   : > { %v5049_v49 = vpop.permute.xlu0 %2219 }
 0x531   : > { %6484 = vst [vmem:[#allocation58_spill] sm:$0xff] %v5049_v49 }
 0x532   : > { %v5087_v12 = vpop.permute.xlu1 %1896 }
 0x534   : > { %v5051_v27 = vpop.permute.xlu0 %2255 }
 0x535   : > { %6485 = vst [vmem:[#allocation59_spill] sm:$0xff] %v5051_v27 }
 0x536   : > { %v5093_v41 = vpop.permute.xlu1 %1932 }
 0x538   : > { %v5055_v55 = vpop.permute.xlu0 %2291 }
 0x539   : > { %6486 = vst [vmem:[#allocation60_spill] sm:$0xff] %v5055_v55 }
 0x53a   : > { %v5097_v39 = vpop.permute.xlu1 %1968 }
 0x53c   : > { %v5059_v1 = vpop.permute.xlu0 %2327 }
 0x53d   : > { %6487 = vst [vmem:[#allocation61_spill] sm:$0xff] %v5059_v1 }
 0x53e   : > { %v5103_v4 = vpop.permute.xlu1 %2004 }
 0x53f   : > { %6501 = vst [vmem:[#allocation75_spill] sm:$0xff] %v5103_v4 }
 0x540   : > { %v5061_v46 = vpop.permute.xlu0 %2363 }
 0x541   : > { %6488 = vst [vmem:[#allocation62_spill] sm:$0xff] %v5061_v46 }
 0x542   : > { %v5107_v23 = vpop.permute.xlu1 %2040 }
 0x543   : > { %6503 = vst [vmem:[#allocation77_spill] sm:$0xff] %v5107_v23 }
 0x544   : > { %v5065_v31 = vpop.permute.xlu0 %2396 }
 0x545   : > { %6489 = vst [vmem:[#allocation63_spill] sm:$0xff] %v5065_v31  ;;  %v1589_v31 = vstv %s5156_s17  ;;  %s3740_s17 = sld [smem:[#allocation4 + $0x3d]] }
 0x546   : > { %v5113_v7 = vpop.permute.xlu1 %2076 }
 0x547   : > { %6506 = vst [vmem:[#allocation80_spill] sm:$0xff] %v5113_v7 }
 0x548   : > { %v5069_v16 = vpop.permute.xlu0 %2432 }
 0x549   : > { %6490 = vst [vmem:[#allocation64_spill] sm:$0xff] %v5069_v16  ;;  %v1577_v16 = vstv %s5153_s8  ;;  %s3742_s8 = sld [smem:[#allocation4 + $0x3e]] }
 0x54a   : > { %v5117_v47 = vpop.permute.xlu1 %2112 }
 0x54b   : > { %6508 = vst [vmem:[#allocation82_spill] sm:$0xff] %v5117_v47 }
 0x54c   : > { %v5071_v36 = vpop.permute.xlu0 %2468 }
 0x54d   : > { %6491 = vst [vmem:[#allocation65_spill] sm:$0xff] %v5071_v36  ;;  %v1596_v36 = vstv %s5140_s21  ;;  %s3756_s21 = sld [smem:[#allocation4 + $0x45]] }
 0x54e   : > { %v1598_v20 = vmul.f32 %v1596_v36, %v4832_v52 }
 0x550   : > { %v5075_v19 = vpop.permute.xlu0 %2645 }
 0x551   : > { %6492 = vst [vmem:[#allocation66_spill] sm:$0xff] %v5075_v19  ;;  %v1565_v19 = vstv %s5149_s20  ;;  %s3734_s20 = sld [smem:[#allocation4 + $0x3a]] }
 0x554   : > { %v5079_v32 = vpop.permute.xlu0 %2504 }
 0x555   : > { %6493 = vst [vmem:[#allocation67_spill] sm:$0xff] %v5079_v32  ;;  %v1553_v32 = vstv %s5147_s22  ;;  %s5192_s22 = sld [smem:[#allocation4 + $0x39]] }
 0x558   : > { %v5081_v5 = vpop.permute.xlu0 %2681 }
 0x559   : > { %6494 = vst [vmem:[#allocation68_spill] sm:$0xff] %v5081_v5  ;;  %v1541_v5 = vstv %s5143_s23  ;;  %s3758_s23 = sld [smem:[#allocation4 + $0x46]] }
 0x55c   : > { %v5085_v10 = vpop.permute.xlu0 %2540 }
 0x55d   : > { %6495 = vst [vmem:[#allocation69_spill] sm:$0xff] %v5085_v10  ;;  %v1584_v10 = vstv %s5138_s12  ;;  %s3752_s12 = sld [smem:[#allocation4 + $0x43]] }
 0x55e   : > { %v1586_v17 = vmul.f32 %v1584_v10, %v4832_v52 }
 0x560   : > { %v5089_v43 = vpop.permute.xlu0 %2717 }
 0x561   : > { %6496 = vst [vmem:[#allocation70_spill] sm:$0xff] %v5089_v43  ;;  %v1560_v43 = vstv %s5130_s10  ;;  %s3748_s10 = sld [smem:[#allocation4 + $0x41]] }
 0x562   : > { %v1562_v56 = vmul.f32 %v1560_v43, %v4832_v52 }
 0x564   : > { %v5091_v35 = vpop.permute.xlu0 %2893 }
 0x565   : > { %6497 = vst [vmem:[#allocation71_spill] sm:$0xff] %v5091_v35 }
 0x568   : > { %v5095_v40 = vpop.permute.xlu0 %2576 }
 0x569   : > { %6498 = vst [vmem:[#allocation72_spill] sm:$0xff] %v5095_v40 }
 0x56c   : > { %v5099_v63 = vpop.permute.xlu0 %2753 }
 0x56d   : > { %6499 = vst [vmem:[#allocation73_spill] sm:$0xff] %v5099_v63 }
 0x570   : > { %v5101_v24 = vpop.permute.xlu0 %2929 }
 0x571   : > { %6500 = vst [vmem:[#allocation74_spill] sm:$0xff] %v5101_v24  ;;  %v5123_v24 = vpop.permute.xlu1 %2145 }
 0x572   : > { %6511 = vst [vmem:[#allocation85_spill] sm:$0xff] %v5123_v24  ;;  %v1601_v24 = vstv %s5160_s15  ;;  %s3738_s15 = sld [smem:[#allocation4 + $0x3c]] }
 0x574   : > { %v5105_v34 = vpop.permute.xlu0 %2789 }
 0x575   : > { %6502 = vst [vmem:[#allocation76_spill] sm:$0xff] %v5105_v34 }
 0x578   : > { %v5109_v29 = vpop.permute.xlu0 %2965 }
 0x579   : > { %6504 = vst [vmem:[#allocation78_spill] sm:$0xff] %v5109_v29  ;;  %v5132_v29 = vpop.permute.xlu1 %2181 }
 0x57a   : > { %6512 = vst [vmem:[#allocation86_spill] sm:$0xff] %v5132_v29 }
 0x57c   : > { %v5111_v28 = vpop.permute.xlu0 %2823 }
 0x57d   : > { %6505 = vst [vmem:[#allocation79_spill] sm:$0xff] %v5111_v28 }
 0x580   : > { %v5115_v6 = vpop.permute.xlu0 %2999 }
 0x581   : > { %6507 = vst [vmem:[#allocation81_spill] sm:$0xff] %v5115_v6 }
 0x584   : > { %v5119_v42 = vpop.permute.xlu0 %3037 }
 0x585   : > { %6509 = vst [vmem:[#allocation83_spill] sm:$0xff] %v5119_v42 }
 0x588   : > { %v5121_v9 = vpop.permute.xlu0 %3071 }
 0x589   : > { %6510 = vst [vmem:[#allocation84_spill] sm:$0xff] %v5121_v9 }
 0x58c   : > { %v951_v63 = vpop.permute.xlu0 %950 }
 0x58d   : > { %v952_v34 = vrot.slane %v951_v63, 7 }
 0x58f   : > { %v953_v28 = vsel %vm849_vm14, %v952_v34, %v951_v63 }
 0x590   : > { %955 = vst.msk [vmem:[#allocation3] ss:$4 sm:$0x7] %vm4814_vm15, %v953_v28  ;;  %v1138_v42 = vpop.permute.xlu0 %1137  ;;  %v5151_v28 = vpop.permute.xlu1 %2217 }
 0x591   : > { %v1139_v9 = vrot.slane %v1138_v42, 7  ;;  %6513 = vst [vmem:[#allocation87_spill] sm:$0xff] %v5151_v28  ;;  %v1561_v28 = vmul.f32 %v1560_v43, %v4830_v21 }
 0x593   : > { %v1140_v6 = vsel %vm849_vm14, %v1139_v9, %v1138_v42 }
 0x594   : > { %1143 = vst.msk [vmem:[#allocation3 + $0x1] ss:$4 sm:$0x7] %vm4814_vm15, %v1140_v6  ;;  %v1326_v34 = vpop.permute.xlu0 %1325  ;;  %v5165_v35 = vpop.permute.xlu1 %2253 }
 0x595   : > { %v1327_v63 = vrot.slane %v1326_v34, 7  ;;  %6514 = vst [vmem:[#allocation88_spill] sm:$0xff] %v5165_v35 }
 0x597   : > { %v1328_v9 = vsel %vm849_vm14, %v1327_v63, %v1326_v34  ;;  %v1534_v34 = vstv %s5125_s0  ;;  %v1548_v63 = vstv %s5127_s16  ;;  %s3744_s0 = sld [smem:[#allocation4 + $0x3f]] }
 0x598   : > { %1331 = vst.msk [vmem:[#allocation3 + $0x2] ss:$4 sm:$0x7] %vm4814_vm15, %v1328_v9  ;;  %v1514_v6 = vpop.permute.xlu0 %1513  ;;  %v1572_v9 = vstv %s5136_s29  ;;  %v1550_v44 = vmul.f32 %v1548_v63, %v4832_v52  ;;  %v5190_v59 = vpop.permute.xlu1 %2289  ;;  %s3746_s16 = sld [smem:[#allocation4 + $0x40]] }
 0x599   : > { %v1515_v42 = vrot.slane %v1514_v6, 7  ;;  %v1574_v49 = vmul.f32 %v1572_v9, %v4832_v52  ;;  %v1573_v29 = vmul.f32 %v1572_v9, %v4830_v21  ;;  %6515 = vst [vmem:[#allocation89_spill] sm:$0xff] %v5190_v59  ;;  %s3750_s29 = sld [smem:[#allocation4 + $0x42]] }
 0x59b   : > { %v1516_v40 = vsel %vm849_vm14, %v1515_v42, %v1514_v6  ;;  %v1536_v6 = vmul.f32 %v1534_v34, %v4832_v52  ;;  %v1535_v42 = vmul.f32 %v1534_v34, %v4830_v21  ;;  %v1585_v34 = vmul.f32 %v1584_v10, %v4830_v21 }
 0x59c   : > { %1519 = vst.msk [vmem:[#allocation3 + $0x3] ss:$4 sm:$0x7] %vm4814_vm15, %v1516_v40  ;;  %v1549_v40 = vmul.f32 %v1548_v63, %v4830_v21  ;;  %v1597_v63 = vmul.f32 %v1596_v36, %v4830_v21  ;;  %v5221_v7 = vpop.permute.xlu1 %2325 }
 0x59d   : > { %6516 = vst [vmem:[#allocation90_spill] sm:$0xff] %v5221_v7 }
 0x5a3   : > { %v5197_v37 = vld [vmem:[#allocation3] sm:$0xff]  ;;  %v5199_v43 = vld [vmem:[#allocation3 + $0x8] sm:$0xf] }
 0x5a4   : > { %v1542_v9 = vmul.f32 %v1541_v5, %v5197_v37  ;;  %v1543_v46 = vmul.f32 %v1541_v5, %v5199_v43  ;;  %v1554_v1 = vmul.f32 %v1553_v32, %v5197_v37  ;;  %v1555_v59 = vmul.f32 %v1553_v32, %v5199_v43 }
 0x5a5   : > { %v1566_v55 = vmul.f32 %v1565_v19, %v5197_v37  ;;  %v1567_v10 = vmul.f32 %v1565_v19, %v5199_v43  ;;  %v1578_v52 = vmul.f32 %v1577_v16, %v5197_v37  ;;  %v1579_v21 = vmul.f32 %v1577_v16, %v5199_v43 }
 0x5a6   : > { %v1590_v36 = vmul.f32 %v1589_v31, %v5197_v37  ;;  %v1591_v35 = vmul.f32 %v1589_v31, %v5199_v43  ;;  %v1602_v27 = vmul.f32 %v1601_v24, %v5197_v37  ;;  %v1603_v5 = vmul.f32 %v1601_v24, %v5199_v43 }
 0x5a7   : > { %v1627_v47 = vmul.f32 %v1625_v2, %v5199_v43  ;;  %v5215_v32 = vadd.f32 %v1542_v9, %v1535_v42  ;;  %v5217_v30 = vadd.f32 %v1543_v46, %v1536_v6  ;;  %v5219_v19 = vadd.f32 %v1554_v1, %v1549_v40 }
 0x5a8   : > { %v5223_v16 = vadd.f32 %v1555_v59, %v1550_v44  ;;  %v5225_v53 = vadd.f32 %v1566_v55, %v1561_v28  ;;  %v5227_v31 = vadd.f32 %v1567_v10, %v1562_v56  ;;  %v5229_v23 = vadd.f32 %v1578_v52, %v1573_v29  ;;  %v5246_v56 = vpop.permute.xlu1 %2361 }
 0x5a9   : > { %1632 = vrot.lane.b32.xlu0 %v1627_v47, %s4165_s18  ;;  %v5232_v24 = vadd.f32 %v1579_v21, %v1574_v49  ;;  %v5234_v42 = vadd.f32 %v1590_v36, %v1585_v34  ;;  %v5236_v46 = vadd.f32 %v1591_v35, %v1586_v17  ;;  %v5238_v1 = vadd.f32 %v1602_v27, %v1597_v63 }
 0x5aa   : > { %v5240_v6 = vadd.f32 %v1603_v5, %v1598_v20  ;;  %v1626_v59 = vmul.f32 %v1625_v2, %v5197_v37  ;;  %v1659_v55 = vstv %s5192_s22  ;;  %6517 = vst [vmem:[#allocation91_spill] sm:$0xff] %v5246_v56  ;;  %v1695_v49 = vstv %s3734_s20  ;;  %s3760_s22 = sld [smem:[#allocation4 + $0x47]] }
 0x5ab   : > { %v1661_v29 = vmul.f32 %v1659_v55, %v5199_v43  ;;  %v1660_v47 = vmul.f32 %v1659_v55, %v5197_v37  ;;  %v1697_v35 = vmul.f32 %v1695_v49, %v5199_v43  ;;  %v1696_v2 = vmul.f32 %v1695_v49, %v5197_v37  ;;  %s3762_s20 = sld [smem:[#allocation4 + $0x48]] }
 0x5ac   : > { %1630 = vrot.lane.b32.xlu1 %v1626_v59, %s4165_s18  ;;  %v1731_v20 = vstv %s3736_s11  ;;  %v5254_v17 = vpop.permute.xlu1 %2394  ;;  %v1767_v44 = vstv %s3738_s15  ;;  %v1803_v9 = vstv %s3740_s17  ;;  %s3764_s11 = sld [smem:[#allocation4 + $0x49]]  ;;  %s6526_s15 = smov 80  }
 0x5ad   : > { %1666 = vrot.lane.b32.xlu0 %v1661_v29, %s4165_s18  ;;  %6518 = vst [vmem:[#allocation92_spill] sm:$0xff] %v5254_v17  ;;  %v1733_v27 = vmul.f32 %v1731_v20, %v5199_v43  ;;  %v1732_v28 = vmul.f32 %v1731_v20, %v5197_v37  ;;  %v1769_v40 = vmul.f32 %v1767_v44, %v5199_v43  ;;  %v1839_v21 = vstv %s3742_s8  ;;  %s3766_s17 = sld [smem:[#allocation4 + $0x4a]] }
 0x5ae   : > { %v1768_v63 = vmul.f32 %v1767_v44, %v5197_v37  ;;  %v1805_v10 = vmul.f32 %v1803_v9, %v5199_v43  ;;  %v1804_v52 = vmul.f32 %v1803_v9, %v5197_v37  ;;  %v1841_v5 = vmul.f32 %v1839_v21, %v5199_v43  ;;  %s3770_s8 = sld [smem:[#allocation4 + $0x4c]] }
 0x5af   : > { %v1840_v59 = vmul.f32 %v1839_v21, %v5197_v37  ;;  %v1874_v55 = vstv %s3744_s0  ;;  %v2016_v21 = vstv %s3752_s12  ;;  %s3772_s0 = sld [smem:[#allocation4 + $0x4d]]  ;;  %s6532_s12 = smov 64  }
 0x5b0   : > { %1664 = vrot.lane.b32.xlu1 %v1660_v47, %s4165_s18  ;;  %v5262_v34 = vpop.permute.xlu1 %2430  ;;  %v1876_v29 = vmul.f32 %v1874_v55, %v5199_v43  ;;  %v1875_v49 = vmul.f32 %v1874_v55, %v5197_v37 }
 0x5b1   : > { %1702 = vrot.lane.b32.xlu0 %v1697_v35, %s4165_s18  ;;  %6519 = vst [vmem:[#allocation93_spill] sm:$0xff] %v5262_v34  ;;  %v1908_v35 = vstv %s3746_s16  ;;  %s3774_s16 = sld [smem:[#allocation4 + $0x4e]] }
 0x5b2   : > { %v1909_v20 = vmul.f32 %v1908_v35, %v5197_v37 }
 0x5b4   : > { %1700 = vrot.lane.b32.xlu1 %v1696_v2, %s4165_s18  ;;  %v5270_v36 = vpop.permute.xlu1 %2466  ;;  %v1910_v2 = vmul.f32 %v1908_v35, %v5199_v43 }
 0x5b5   : > { %1738 = vrot.lane.b32.xlu0 %v1733_v27, %s4165_s18  ;;  %6520 = vst [vmem:[#allocation94_spill] sm:$0xff] %v5270_v36  ;;  %v1944_v27 = vstv %s3748_s10  ;;  %s3776_s10 = sld [smem:[#allocation4 + $0x4f]] }
 0x5b6   : > { %v1946_v44 = vmul.f32 %v1944_v27, %v5199_v43 }
 0x5b8   : > { %1736 = vrot.lane.b32.xlu1 %v1732_v28, %s4165_s18  ;;  %v5278_v47 = vpop.permute.xlu1 %2643 }
 0x5b9   : > { %1774 = vrot.lane.b32.xlu0 %v1769_v40, %s4165_s18  ;;  %6521 = vst [vmem:[#allocation95_spill] sm:$0xff] %v5278_v47  ;;  %v1945_v40 = vmul.f32 %v1944_v27, %v5197_v37  ;;  %v1795_v47 = vrot.slane %v5073_v22, 4 }
 0x5bc   : > { %1772 = vrot.lane.b32.xlu1 %v1768_v63, %s4165_s18  ;;  %v5286_v28 = vpop.permute.xlu1 %2502  ;;  %v1980_v63 = vstv %s3750_s29  ;;  %s3778_s29 = sld [smem:[#allocation4 + $0x50]] }
 0x5bd   : > { %1810 = vrot.lane.b32.xlu0 %v1805_v10, %s4165_s18  ;;  %6522 = vst [vmem:[#allocation96_spill] sm:$0xff] %v5286_v28  ;;  %v1982_v9 = vmul.f32 %v1980_v63, %v5199_v43  ;;  %v1796_v28 = vrot.slane %v4984_v60, 4 }
 0x5c0   : > { %1808 = vrot.lane.b32.xlu1 %v1804_v52, %s4165_s18  ;;  %v5294_v10 = vpop.permute.xlu1 %2679  ;;  %v1981_v52 = vmul.f32 %v1980_v63, %v5197_v37 }
 0x5c1   : > { %1846 = vrot.lane.b32.xlu0 %v1841_v5, %s4165_s18  ;;  %6523 = vst [vmem:[#allocation97_spill] sm:$0xff] %v5294_v10  ;;  %v2018_v5 = vmul.f32 %v2016_v21, %v5199_v43  ;;  %v1522_v10 = vld [vmem:[#allocation2] sm:$0xff] }
 0x5c4   : > { %1844 = vrot.lane.b32.xlu1 %v1840_v59, %s4165_s18  ;;  %s3754_s18 = sld [smem:[#allocation4 + $0x44]]  ;;  %v2017_v59 = vmul.f32 %v2016_v21, %v5197_v37 }
 0x5c5   : > { %1881 = vrot.lane.b32.xlu0 %v1876_v29, %s4166_s9  ;;  %v5302_v29 = vpop.permute.xlu1 %2538 }
 0x5c6   : > { %6524 = vst [vmem:[#allocation98_spill] sm:$0xff] %v5302_v29  ;;  %v1759_v29 = vrot.slane %v5067_v54, 4 }
 0x5c8   : > { %1879 = vrot.lane.b32.xlu1 %v1875_v49, %s4166_s9 }
 0x5c9   : > { %1915 = vrot.lane.b32.xlu0 %v1910_v2, %s4166_s9  ;;  %v2088_v2 = vstv %s3756_s21  ;;  %v5310_v27 = vpop.permute.xlu1 %2715  ;;  %s3780_s21 = sld [smem:[#allocation4 + $0x51]] }
 0x5ca   : > { %v2052_v55 = vstv %s3754_s18  ;;  %6525 = vst [vmem:[#allocation99_spill] sm:$0xff] %v5310_v27  ;;  %s3788_s18 = sld [smem:[#allocation4 + $0x55]]  ;;  %v1760_v27 = vrot.slane %v4978_v3, 4 }
 0x5cb   : > { %v2054_v49 = vmul.f32 %v2052_v55, %v5199_v43  ;;  %v2053_v35 = vmul.f32 %v2052_v55, %v5197_v37  ;;  %v2193_v55 = vstv %s3762_s20  ;;  %s6536_s20 = smov 48  }
 0x5cc   : > { %1913 = vrot.lane.b32.xlu1 %v1909_v20, %s4166_s9  ;;  %v2090_v20 = vmul.f32 %v2088_v2, %v5199_v43  ;;  %v1761_v26 = vsel %vm1619_vm0, %v1759_v29, %v1760_v27  ;;  %v1797_v29 = vsel %vm1619_vm0, %v1795_v47, %v1796_v28 }
 0x5cd   : > { %1951 = vrot.lane.b32.xlu0 %v1946_v44, %s4166_s9  ;;  %v2089_v44 = vmul.f32 %v2088_v2, %v5197_v37  ;;  %v5318_v21 = vpop.permute.xlu1 %2891  ;;  %v2194_v2 = vmul.f32 %v2193_v55, %v5197_v37  ;;  %v5474_v47 = vsel %vm1621_vm7, %v5073_v22, %v1797_v29 }
 0x5ce   : > { %6527 = vst [vmem:[#allocation100_spill] sm:$0xff] %v5318_v21  ;;  %v1723_v21 = vrot.slane %v5063_v38, 4 }
 0x5d0   : > { %1949 = vrot.lane.b32.xlu1 %v1945_v40, %s4166_s9  ;;  %v2123_v40 = vstv %s3758_s23  ;;  %s3790_s23 = sld [smem:[#allocation4 + $0x56]] }
 0x5d1   : > { %1987 = vrot.lane.b32.xlu0 %v1982_v9, %s4166_s9  ;;  %v2125_v63 = vmul.f32 %v2123_v40, %v5199_v43  ;;  %v2124_v9 = vmul.f32 %v2123_v40, %v5197_v37 }
 0x5d4   : > { %1985 = vrot.lane.b32.xlu1 %v1981_v52, %s4166_s9  ;;  %v2157_v52 = vstv %s3760_s22  ;;  %s3782_s22 = sld [smem:[#allocation4 + $0x52]] }
 0x5d5   : > { %2023 = vrot.lane.b32.xlu0 %v2018_v5, %s4166_s9  ;;  %v2159_v5 = vmul.f32 %v2157_v52, %v5199_v43 }
 0x5d8   : > { %2021 = vrot.lane.b32.xlu1 %v2017_v59, %s4166_s9  ;;  %v2158_v59 = vmul.f32 %v2157_v52, %v5197_v37 }
 0x5d9   : > { %2059 = vrot.lane.b32.xlu0 %v2054_v49, %s4166_s9  ;;  %v2195_v49 = vmul.f32 %v2193_v55, %v5199_v43 }
 0x5dc   : > { %2057 = vrot.lane.b32.xlu1 %v2053_v35, %s4166_s9  ;;  %v5326_v35 = vpop.permute.xlu1 %2574 }
 0x5dd   : > { %2095 = vrot.lane.b32.xlu0 %v2090_v20, %s4166_s9  ;;  %6528 = vst [vmem:[#allocation101_spill] sm:$0xff] %v5326_v35  ;;  %v2229_v20 = vstv %s3764_s11  ;;  %s3792_s11 = sld [smem:[#allocation4 + $0x57]]  ;;  %v1724_v35 = vrot.slane %v4972_v15, 4 }
 0x5de   : > { %v2230_v40 = vmul.f32 %v2229_v20, %v5197_v37 }
 0x5df   : > { %v1725_v4 = vsel %vm1619_vm0, %v1723_v21, %v1724_v35 }
 0x5e0   : > { %2093 = vrot.lane.b32.xlu1 %v2089_v44, %s4166_s9  ;;  %s3768_s9 = sld [smem:[#allocation4 + $0x4b]]  ;;  %v2231_v44 = vmul.f32 %v2229_v20, %v5199_v43  ;;  %v2337_v20 = vstv %s3770_s8 }
 0x5e1   : > { %2130 = vrot.lane.b32.xlu0 %v2125_v63, %s6526_s15  ;;  %v2265_v63 = vstv %s3766_s17  ;;  %s5391_s17 = sld [smem:[#allocation4]] }
 0x5e2   : > { %v2267_v52 = vmul.f32 %v2265_v63, %v5199_v43  ;;  %s5412_s8 = sld [smem:[#allocation4 + $0x58]] }
 0x5e4   : > { %2128 = vrot.lane.b32.xlu1 %v2124_v9, %s6526_s15  ;;  %v5334_v9 = vpop.permute.xlu1 %2751 }
 0x5e5   : > { %2164 = vrot.lane.b32.xlu0 %v2159_v5, %s6526_s15  ;;  %6529 = vst [vmem:[#allocation102_spill] sm:$0xff] %v5334_v9  ;;  %v2266_v5 = vmul.f32 %v2265_v63, %v5197_v37  ;;  %v2372_v63 = vstv %s3772_s0  ;;  %s5421_s0 = sld [smem:[#allocation4 + $0x31]] }
 0x5e8   : > { %2162 = vrot.lane.b32.xlu1 %v2158_v59, %s6526_s15  ;;  %v2301_v59 = vstv %s3768_s9  ;;  %s5397_s9 = sld [smem:[#allocation4 + $0x53]] }
 0x5e9   : > { %2200 = vrot.lane.b32.xlu0 %v2195_v49, %s6526_s15  ;;  %v2303_v55 = vmul.f32 %v2301_v59, %v5199_v43  ;;  %v5342_v49 = vpop.permute.xlu1 %2927 }
 0x5ea   : > { %6530 = vst [vmem:[#allocation103_spill] sm:$0xff] %v5342_v49  ;;  %v2406_v49 = vstv %s3774_s16  ;;  %s5430_s16 = sld [smem:[#allocation4 + $0x5d]] }
 0x5ec   : > { %2198 = vrot.lane.b32.xlu1 %v2194_v2, %s6526_s15  ;;  %v2302_v2 = vmul.f32 %v2301_v59, %v5197_v37  ;;  %v2373_v59 = vmul.f32 %v2372_v63, %v5197_v37 }
 0x5ed   : > { %2236 = vrot.lane.b32.xlu0 %v2231_v44, %s6526_s15  ;;  %v2339_v44 = vmul.f32 %v2337_v20, %v5199_v43 }
 0x5f0   : > { %2234 = vrot.lane.b32.xlu1 %v2230_v40, %s6526_s15  ;;  %v2338_v40 = vmul.f32 %v2337_v20, %v5197_v37  ;;  %v2407_v20 = vmul.f32 %v2406_v49, %v5197_v37  ;;  %v2939_v22 = vstv %s5430_s16  ;;  %s5666_s16 = sld [smem:[#allocation4 + $0x54]] }
 0x5f1   : > { %2272 = vrot.lane.b32.xlu0 %v2267_v52, %s6526_s15  ;;  %v5350_v52 = vpop.permute.xlu1 %2787 }
 0x5f2   : > { %6531 = vst [vmem:[#allocation104_spill] sm:$0xff] %v5350_v52  ;;  %v2478_v52 = vstv %s3778_s29  ;;  %s5449_s29 = sld [smem:[#allocation4 + $0x59]] }
 0x5f4   : > { %2270 = vrot.lane.b32.xlu1 %v2266_v5, %s6526_s15  ;;  %v2374_v5 = vmul.f32 %v2372_v63, %v5199_v43 }
 0x5f5   : > { %2308 = vrot.lane.b32.xlu0 %v2303_v55, %s6526_s15  ;;  %v2408_v55 = vmul.f32 %v2406_v49, %v5199_v43  ;;  %v2480_v49 = vmul.f32 %v2478_v52, %v5199_v43 }
 0x5f8   : > { %2306 = vrot.lane.b32.xlu1 %v2302_v2, %s6526_s15  ;;  %v5358_v2 = vpop.permute.xlu1 %2963 }
 0x5f9   : > { %2344 = vrot.lane.b32.xlu0 %v2339_v44, %s6526_s15  ;;  %6533 = vst [vmem:[#allocation105_spill] sm:$0xff] %v5358_v2  ;;  %v2442_v44 = vstv %s3776_s10  ;;  %v2655_v2 = vstv %s3788_s18  ;;  %s6539_s10 = smov 32   ;;  %s5481_s18 = sld [smem:[#allocation4 + $0x5e]] }
 0x5fa   : > { %v2443_v63 = vmul.f32 %v2442_v44, %v5197_v37 }
 0x5fc   : > { %2342 = vrot.lane.b32.xlu1 %v2338_v40, %s6526_s15  ;;  %v2444_v40 = vmul.f32 %v2442_v44, %v5199_v43  ;;  %v2656_v44 = vmul.f32 %v2655_v2, %v5197_v37  ;;  %s5387_s15 = sld [smem:[#allocation4 + $0x5c]] }
 0x5fd   : > { %2379 = vrot.lane.b32.xlu0 %v2374_v5, %s6532_s12  ;;  %v5366_v5 = vpop.permute.xlu1 %2825 }
 0x5fe   : > { %6534 = vst [vmem:[#allocation106_spill] sm:$0xff] %v5366_v5  ;;  %v2691_v5 = vstv %s3790_s23  ;;  %s5548_s23 = sld [smem:[#allocation4 + $0x60]] }
 0x600   : > { %2377 = vrot.lane.b32.xlu1 %v2373_v59, %s6532_s12  ;;  %v2479_v59 = vmul.f32 %v2478_v52, %v5197_v37 }
 0x601   : > { %2413 = vrot.lane.b32.xlu0 %v2408_v55, %s6532_s12  ;;  %v2657_v55 = vmul.f32 %v2655_v2, %v5199_v43  ;;  %v2693_v2 = vmul.f32 %v2691_v5, %v5199_v43 }
 0x602   : > { %v2903_v9 = vstv %s5387_s15 }
 0x603   : > { %v2904_v7 = vmul.f32 %v2903_v9, %v5197_v37 }
 0x604   : > { %2411 = vrot.lane.b32.xlu1 %v2407_v20, %s6532_s12  ;;  %v5374_v20 = vpop.permute.xlu1 %3001 }
 0x605   : > { %2449 = vrot.lane.b32.xlu0 %v2444_v40, %s6532_s12  ;;  %6535 = vst [vmem:[#allocation107_spill] sm:$0xff] %v5374_v20  ;;  %v2514_v40 = vstv %s3780_s21  ;;  %v2550_v20 = vstv %s3782_s22  ;;  %s5526_s21 = sld [smem:[#allocation4 + $0x5f]] }
 0x606   : > { %v2516_v52 = vmul.f32 %v2514_v40, %v5199_v43  ;;  %s5573_s22 = sld [smem:[#allocation4 + $0x61]] }
 0x608   : > { %2447 = vrot.lane.b32.xlu1 %v2443_v63, %s6532_s12  ;;  %v2515_v63 = vmul.f32 %v2514_v40, %v5197_v37  ;;  %v2551_v40 = vmul.f32 %v2550_v20, %v5197_v37 }
 0x609   : > { %2485 = vrot.lane.b32.xlu0 %v2480_v49, %s6532_s12  ;;  %v5382_v49 = vpop.permute.xlu1 %3035 }
 0x60a   : > { %6537 = vst [vmem:[#allocation108_spill] sm:$0xff] %v5382_v49 }
 0x60c   : > { %2483 = vrot.lane.b32.xlu1 %v2479_v59, %s6532_s12  ;;  %v2692_v59 = vmul.f32 %v2691_v5, %v5197_v37 }
 0x60d   : > { %2662 = vrot.lane.b32.xlu0 %v2657_v55, %s6536_s20  ;;  %v2552_v55 = vmul.f32 %v2550_v20, %v5199_v43  ;;  %v1651_v20 = vrot.slane %v5053_v62, 4 }
 0x610   : > { %2660 = vrot.lane.b32.xlu1 %v2656_v44, %s6536_s20  ;;  %v5394_v44 = vpop.permute.xlu1 %3073 }
 0x611   : > { %2521 = vrot.lane.b32.xlu0 %v2516_v52, %s6532_s12  ;;  %6538 = vst [vmem:[#allocation109_spill] sm:$0xff] %v5394_v44  ;;  %v2727_v52 = vstv %s3792_s11  ;;  %v1652_v44 = vrot.slane %v4960_v11, 4  ;;  %s4177_s11 = smov 122  }
 0x613   : > { %v1653_v17 = vsel %vm1619_vm0, %v1651_v20, %v1652_v44  ;;  %v1831_v44 = vrot.slane %v5077_v33, 4  ;;  %v2763_v20 = vstv %s5412_s8  ;;  %s5626_s8 = sld [smem:[#allocation4 + $0x23]] }
 0x614   : > { %2519 = vrot.lane.b32.xlu1 %v2515_v63, %s6532_s12  ;;  %v1618_v63 = vrot.slane %v4954_v50, 4  ;;  %v1687_v50 = vrot.slane %v5057_v25, 4  ;;  %v5457_v21 = vsel %vm1621_vm7, %v5053_v62, %v1653_v17  ;;  %v1726_v62 = vsel %vm1621_vm7, %v5063_v38, %v1725_v4 }
 0x615   : > { %2698 = vrot.lane.b32.xlu0 %v2693_v2, %s6536_s20  ;;  %v1617_v2 = vrot.slane %v5047_v13, 4  ;;  %v1762_v17 = vsel %vm1621_vm7, %v5067_v54, %v1761_v26 }
 0x617   : > { %v1620_v34 = vsel %vm1619_vm0, %v1617_v2, %v1618_v63  ;;  %v1832_v63 = vrot.slane %v4990_v48, 4  ;;  %v1694_v2 = vadd.f32 %v4966_v57, %v5223_v16 }
 0x618   : > { %2696 = vrot.lane.b32.xlu1 %v2692_v59, %s6536_s20  ;;  %v2729_v59 = vmul.f32 %v2727_v52, %v5199_v43 }
 0x619   : > { %2557 = vrot.lane.b32.xlu0 %v2552_v55, %s6532_s12  ;;  %v2728_v55 = vmul.f32 %v2727_v52, %v5197_v37  ;;  %v1523_v52 = vstv %s5391_s17  ;;  %v1833_v28 = vsel %vm1619_vm0, %v1831_v44, %v1832_v63  ;;  %v1729_v44 = vadd.f32 %v1726_v62, %v5225_v53 }
 0x61a   : > { %v5440_v51 = vmul.f32 %v1523_v52, %v1522_v10  ;;  %v5453_v10 = vsel %vm1621_vm7, %v5047_v13, %v1620_v34  ;;  %v1834_v62 = vsel %vm1621_vm7, %v5077_v33, %v1833_v28 }
 0x61b   : > { %v5400_v5 = vpop.permute.xlu0 %1632 }
 0x61c   : > { %2555 = vrot.lane.b32.xlu1 %v2551_v40, %s6532_s12  ;;  %v1688_v40 = vrot.slane %v4966_v57, 4 }
 0x61d   : > { %2734 = vrot.lane.b32.xlu0 %v2729_v59, %s6536_s20  ;;  %v2905_v59 = vmul.f32 %v2903_v9, %v5199_v43 }
 0x61e   : > { %v5408_v49 = vpop.permute.xlu1 %1630  ;;  %v1689_v18 = vsel %vm1619_vm0, %v1687_v50, %v1688_v40  ;;  %v1730_v40 = vadd.f32 %v4972_v15, %v5227_v31  ;;  %v1527_v50 = vstv %s5421_s0  ;;  %v2764_v31 = vmul.f32 %v2763_v20, %v5197_v37  ;;  %s5633_s0 = sld [smem:[#allocation4 + $0x2a]] }
 0x61f   : > { %v5427_v36 = vpop.permute.xlu0 %1666  ;;  %v1690_v13 = vsel %vm1621_vm7, %v5057_v25, %v1689_v18  ;;  %v2765_v25 = vmul.f32 %v2763_v20, %v5199_v43  ;;  %v1528_v29 = vmul.f32 %v5197_v37, %v1527_v50  ;;  %v1634_v53 = vrot.slane %v5408_v49, 4 }
 0x620   : > { %2732 = vrot.lane.b32.xlu1 %v2728_v55, %s6536_s20  ;;  %v2586_v55 = vstv %s5397_s9  ;;  %v1693_v4 = vadd.f32 %v1690_v13, %v5219_v19  ;;  %v1901_v50 = vrot.slane %v5004_v45, 4  ;;  %s3604_s9 = sld [smem:[#allocation4 + $0x62]] }
 0x621   : > { %2910 = vrot.lane.b32.xlu0 %v2905_v59, %s6539_s10  ;;  %v2588_v35 = vmul.f32 %v2586_v55, %v5199_v43  ;;  %v2587_v16 = vmul.f32 %v2586_v55, %v5197_v37  ;;  %v1868_v59 = vrot.slane %v4996_v58, 4  ;;  %v1867_v55 = vrot.slane %v5083_v61, 4 }
 0x622   : > { %v5434_v56 = vpop.permute.xlu1 %1664  ;;  %v1635_v58 = vrot.slane %v5400_v5, 4  ;;  %v1529_v33 = vadd.f32 %v1528_v29, %v5440_v51  ;;  %v1801_v29 = vadd.f32 %v5474_v47, %v5234_v42 }
 0x623   : > { %v1703_v27 = vpop.permute.xlu0 %1702  ;;  %v5515_v5 = vsel %vm1619_vm0, %v1867_v55, %v1868_v59  ;;  %v1668_v51 = vrot.slane %v5434_v56, 4  ;;  %v1900_v55 = vrot.slane %v5087_v12, 4 }
 0x624   : > { %2908 = vrot.lane.b32.xlu1 %v2904_v7, %s6539_s10  ;;  %v1705_v9 = vrot.slane %v1703_v27, 4  ;;  %v5461_v57 = vadd.f32 %v1703_v27, %v1694_v2  ;;  %v1766_v2 = vadd.f32 %v4978_v3, %v5232_v24  ;;  %v2799_v27 = vstv %s5449_s29  ;;  %s4171_s29 = smov 6  }
 0x625   : > { %2593 = vrot.lane.b32.xlu0 %v2588_v35, %s6532_s12 }
 0x626   : > { %v1701_v7 = vpop.permute.xlu1 %1700 }
 0x627   : > { %v1704_v34 = vrot.slane %v1701_v7, 4  ;;  %v1739_v18 = vpop.permute.xlu0 %1738 }
 0x628   : > { %2591 = vrot.lane.b32.xlu1 %v2587_v16, %s6532_s12  ;;  %v1741_v54 = vrot.slane %v1739_v18, 4  ;;  %v5488_v52 = vadd.f32 %v1739_v18, %v1730_v40  ;;  %s5502_s12 = sld [smem:[#allocation4 + $0x5a]]  ;;  %v2940_v16 = vmul.f32 %v2939_v22, %v5197_v37  ;;  %v2975_v18 = vstv %s5481_s18  ;;  %s4172_s18 = smov 5  }
 0x629   : > { %v1706_v26 = vsel %vm1619_vm0, %v1704_v34, %v1705_v9  ;;  %2770 = vrot.lane.b32.xlu0 %v2765_v25, %s6536_s20 }
 0x62a   : > { %v1707_v38 = vsel %vm1621_vm7, %v1701_v7, %v1706_v26  ;;  %v1737_v15 = vpop.permute.xlu1 %1736  ;;  %v2941_v7 = vmul.f32 %v2939_v22, %v5199_v43  ;;  %v1802_v26 = vadd.f32 %v4984_v60, %v5236_v46  ;;  %v2800_v22 = vmul.f32 %v2799_v27, %v5197_v37 }
 0x62b   : > { %v5493_v19 = vadd.f32 %v1707_v38, %v1693_v4  ;;  %v1740_v63 = vrot.slane %v1737_v15, 4  ;;  %v1775_v9 = vpop.permute.xlu0 %1774  ;;  %v1765_v4 = vadd.f32 %v1762_v17, %v5229_v23  ;;  %v2801_v38 = vmul.f32 %v2799_v27, %v5199_v43 }
 0x62c   : > { %2768 = vrot.lane.b32.xlu1 %v2764_v31, %s6536_s20  ;;  %v1777_v24 = vrot.slane %v1775_v9, 4  ;;  %v5510_v20 = vadd.f32 %v1775_v9, %v1766_v2  ;;  %v1636_v23 = vsel %vm1619_vm0, %v1634_v53, %v1635_v58  ;;  %v2977_v9 = vmul.f32 %v2975_v18, %v5199_v43 }
 0x62d   : > { %v1742_v35 = vsel %vm1619_vm0, %v1740_v63, %v1741_v54  ;;  %2946 = vrot.lane.b32.xlu0 %v2941_v7, %s6539_s10  ;;  %v1658_v63 = vadd.f32 %v4960_v11, %v5217_v30  ;;  %v1637_v11 = vsel %vm1621_vm7, %v5408_v49, %v1636_v23 }
 0x62e   : > { %v1743_v3 = vsel %vm1621_vm7, %v1737_v15, %v1742_v35  ;;  %v1773_v13 = vpop.permute.xlu1 %1772  ;;  %v1669_v15 = vrot.slane %v5427_v36, 4  ;;  %v2835_v2 = vstv %s5502_s12  ;;  %v2976_v35 = vmul.f32 %v2975_v18, %v5197_v37  ;;  %s5683_s12 = sld [smem:[#allocation4 + $0x5b]] }
 0x62f   : > { %v5517_v34 = vadd.f32 %v1743_v3, %v1729_v44  ;;  %v1776_v40 = vrot.slane %v1773_v13, 4  ;;  %v1811_v25 = vpop.permute.xlu0 %1810  ;;  %v1838_v44 = vadd.f32 %v4990_v48, %v5240_v6  ;;  %v1937_v3 = vrot.slane %v5010_v0, 4 }
 0x630   : > { %2944 = vrot.lane.b32.xlu1 %v2940_v16, %s6539_s10  ;;  %v1813_v60 = vrot.slane %v1811_v25, 4  ;;  %v5534_v46 = vadd.f32 %v1811_v25, %v1802_v26  ;;  %v1624_v16 = vadd.f32 %v5453_v10, %v1529_v33  ;;  %v1670_v42 = vsel %vm1619_vm0, %v1668_v51, %v1669_v15 }
 0x631   : > { %v1778_v28 = vsel %vm1619_vm0, %v1776_v40, %v1777_v24  ;;  %2804 = vrot.lane.b32.xlu0 %v2800_v22, %s6536_s20  ;;  %v1936_v24 = vrot.slane %v5093_v41, 4  ;;  %v1675_v49 = vadd.f32 %v5427_v36, %v1658_v63  ;;  %v1837_v40 = vadd.f32 %v1834_v62, %v5238_v1 }
 0x632   : > { %v1779_v17 = vsel %vm1621_vm7, %v1773_v13, %v1778_v28  ;;  %v1809_v54 = vpop.permute.xlu1 %1808  ;;  %v3011_v13 = vstv %s5526_s21  ;;  %v2837_v18 = vmul.f32 %v2835_v2, %v5199_v43  ;;  %v1671_v33 = vsel %vm1621_vm7, %v5434_v56, %v1670_v42  ;;  %s4175_s21 = smov 125  }
 0x633   : > { %v5538_v31 = vadd.f32 %v1779_v17, %v1765_v4  ;;  %v1812_v59 = vrot.slane %v1809_v54, 4  ;;  %v1847_v58 = vpop.permute.xlu0 %1846  ;;  %v1639_v4 = vadd.f32 %v1637_v11, %v1624_v16  ;;  %v2836_v22 = vmul.f32 %v2835_v2, %v5197_v37  ;;  %v3817_v16 = vld [vmem:[%s6293_s1 + $0x5] ss:$8 sm:$0x3] }
 0x634   : > { %2806 = vrot.lane.b32.xlu1 %v2801_v38, %s6536_s20  ;;  %v1849_v30 = vrot.slane %v1847_v58, 4  ;;  %v5558_v6 = vadd.f32 %v1847_v58, %v1838_v44  ;;  %v1871_v1 = vsel %vm1870_vm9, %v5083_v61, %v5515_v5  ;;  %v1657_v62 = vadd.f32 %v5457_v21, %v5215_v32 }
 0x635   : > { %v1814_v27 = vsel %vm1619_vm0, %v1812_v59, %v1813_v60  ;;  %2980 = vrot.lane.b32.xlu0 %v2976_v35, %s6539_s10  ;;  %v1902_v56 = vsel %vm1619_vm0, %v1900_v55, %v1901_v50  ;;  %v1938_v17 = vsel %vm1619_vm0, %v1936_v24, %v1937_v3  ;;  %v1907_v60 = vadd.f32 %v5004_v45, %v1675_v49 }
 0x636   : > { %v1815_v48 = vsel %vm1621_vm7, %v1809_v54, %v1814_v27  ;;  %v1845_v7 = vpop.permute.xlu1 %1844  ;;  %v3047_v54 = vstv %s5548_s23  ;;  %v1674_v61 = vadd.f32 %v1671_v33, %v1657_v62  ;;  %v1873_v5 = vadd.f32 %v1871_v1, %v1639_v4  ;;  %v6541_v4 = vld [vmem:[#allocation16_spill] sm:$0xff]  ;;  %s6633_s23 = smov 124  }
 0x637   : > { %v5562_v47 = vadd.f32 %v1815_v48, %v1801_v29  ;;  %v1848_v53 = vrot.slane %v1845_v7, 4  ;;  %v1882_v26 = vpop.permute.xlu0 %1881  ;;  %v3013_v15 = vmul.f32 %v3011_v13, %v5199_v43  ;;  %v3012_v55 = vmul.f32 %v3011_v13, %v5197_v37  ;;  %v6540_v13 = vld [vmem:[#allocation15_spill] sm:$0xff] }
 0x638   : > { %2982 = vrot.lane.b32.xlu1 %v2977_v9, %s6539_s10  ;;  %v1884_v36 = vrot.slane %v1882_v26, 4  ;;  %v1903_v45 = vsel %vm1870_vm9, %v5087_v12, %v1902_v56  ;;  %v1939_v44 = vsel %vm1870_vm9, %v5093_v41, %v1938_v17  ;;  %v1973_v27 = vrot.slane %v5019_v8, 4  ;;  %v3818_v41 = vld [vmem:[%s6293_s1 + $0x6] ss:$8 sm:$0x3] }
 0x639   : > { %v1850_v10 = vsel %vm1619_vm0, %v1848_v53, %v1849_v30  ;;  %2842 = vrot.lane.b32.xlu0 %v2837_v18, %s6536_s20  ;;  %v1972_v58 = vrot.slane %v5097_v39, 4  ;;  %v2009_v35 = vrot.slane %v5026_v14, 4  ;;  %v1943_v9 = vadd.f32 %v5010_v0, %v5461_v57  ;;  %v6542_v26 = vld [vmem:[#allocation75_spill] sm:$0xff] }
 0x63a   : > { %v1851_v28 = vsel %vm1621_vm7, %v1845_v7, %v1850_v10  ;;  %v1880_v25 = vpop.permute.xlu1 %1879  ;;  %v1906_v12 = vadd.f32 %v1903_v45, %v1674_v61  ;;  %v3048_v30 = vmul.f32 %v3047_v54, %v5197_v37  ;;  %v3083_v7 = vstv %s5573_s22  ;;  %s4176_s22 = smov 123  }
 0x63b   : > { %v5584_v38 = vadd.f32 %v1851_v28, %v1837_v40  ;;  %v1883_v23 = vrot.slane %v1880_v25, 4  ;;  %v1916_v21 = vpop.permute.xlu0 %1915  ;;  %v3049_v57 = vmul.f32 %v3047_v54, %v5199_v43  ;;  %v3285_v40 = vrot.slane %v3818_v41, %v6540_v13 }
 0x63c   : > { %2840 = vrot.lane.b32.xlu1 %v2836_v22, %s6536_s20  ;;  %v1918_v59 = vrot.slane %v1916_v21, 4  ;;  %v5597_v63 = vadd.f32 %v1916_v21, %v1907_v60  ;;  %v3289_v10 = vrot.slane %v3818_v41, %v6541_v4  ;;  %v2008_v18 = vrot.slane %v6542_v26, 4 }
 0x63d   : > { %v1885_v32 = vsel %vm1619_vm0, %v1883_v23, %v1884_v36  ;;  %3018 = vrot.lane.b32.xlu0 %v3013_v15, %s6539_s10  ;;  %v1979_v33 = vadd.f32 %v5019_v8, %v5488_v52  ;;  %v3252_v28 = vrot.slane %v3817_v16, %v6540_v13  ;;  %v3256_v36 = vrot.slane %v3817_v16, %v6541_v4  ;;  %v6543_v15 = vld [vmem:[#allocation53_spill] sm:$0xff]  ;;  %v6583_v4 = vld [vmem:[#allocation95_spill] sm:$0xff] }
 0x63e   : > { %v1886_v51 = vsel %vm1870_vm9, %v1880_v25, %v1885_v32  ;;  %v1914_v50 = vpop.permute.xlu1 %1913  ;;  %v1974_v25 = vsel %vm1619_vm0, %v1972_v58, %v1973_v27  ;;  %v1942_v22 = vadd.f32 %v1939_v44, %v5493_v19  ;;  %v3085_v23 = vmul.f32 %v3083_v7, %v5199_v43 }
 0x63f   : > { %v5604_v2 = vadd.f32 %v1886_v51, %v1873_v5  ;;  %v1917_v29 = vrot.slane %v1914_v50, 4  ;;  %v1952_v48 = vpop.permute.xlu0 %1951  ;;  %v3084_v8 = vmul.f32 %v3083_v7, %v5197_v37  ;;  %v3290_v19 = vcombine.low %v3285_v40, %v3289_v10  ;;  %v6544_v51 = vld [vmem:[#allocation77_spill] sm:$0xff] }
 0x640   : > { %3016 = vrot.lane.b32.xlu1 %v3012_v55, %s6539_s10  ;;  %v1954_v53 = vrot.slane %v1952_v48, 4  ;;  %v5623_v3 = vadd.f32 %v1952_v48, %v1943_v9  ;;  %v1975_v5 = vsel %vm1870_vm9, %v5097_v39, %v1974_v25  ;;  %v2010_v43 = vsel %vm1619_vm0, %v2008_v18, %v2009_v35  ;;  %v6545_v9 = vld [vmem:[#allocation54_spill] sm:$0xff] }
 0x641   : > { %v1919_v11 = vsel %vm1619_vm0, %v1917_v29, %v1918_v59  ;;  %3052 = vrot.lane.b32.xlu0 %v3048_v30, %s6539_s10  ;;  %v2015_v32 = vadd.f32 %v5026_v14, %v5510_v20  ;;  %v3257_v21 = vcombine.low %v3252_v28, %v3256_v36  ;;  %v2045_v37 = vrot.slane %v6543_v15, 4 }
 0x642   : > { %v1920_v42 = vsel %vm1870_vm9, %v1914_v50, %v1919_v11  ;;  %v1950_v0 = vpop.permute.xlu1 %1949  ;;  %v2044_v59 = vrot.slane %v6544_v51, 4  ;;  %v1978_v50 = vadd.f32 %v1975_v5, %v5517_v34  ;;  %v2605_v58 = vstv %s5626_s8  ;;  %s3605_s8 = sld [smem:[#allocation4 + $0x63]] }
 0x643   : > { %v5628_v24 = vadd.f32 %v1920_v42, %v1906_v12  ;;  %v1953_v49 = vrot.slane %v1950_v0, 4  ;;  %v1988_v62 = vpop.permute.xlu0 %1987  ;;  %v2854_v35 = vstv %s5633_s0  ;;  %v2011_v34 = vsel %vm1870_vm9, %v6542_v26, %v2010_v43  ;;  %v6546_v12 = vld [vmem:[#allocation80_spill] sm:$0xff]  ;;  %v4031_v26 = vld [vmem:[#allocation2] sm:$0xff]  ;;  %s6647_s0 = sshll.u32 %s4345_s19, 8 }
 0x644   : > { %3054 = vrot.lane.b32.xlu1 %v3049_v57, %s6539_s10  ;;  %v1990_v17 = vrot.slane %v1988_v62, 4  ;;  %v5646_v60 = vadd.f32 %v1988_v62, %v1979_v33  ;;  %v2081_v41 = vrot.slane %v6545_v9, 4  ;;  %v2080_v11 = vrot.slane %v6546_v12, 4 }
 0x645   : > { %v1955_v1 = vsel %vm1619_vm0, %v1953_v49, %v1954_v53  ;;  %3090 = vrot.lane.b32.xlu0 %v3085_v23, %s6539_s10  ;;  %v2051_v48 = vadd.f32 %v6543_v15, %v5534_v46  ;;  %v2046_v30 = vsel %vm1619_vm0, %v2044_v59, %v2045_v37  ;;  %v2014_v7 = vadd.f32 %v2011_v34, %v5538_v31  ;;  %v4030_v53 = vld [vmem:[#allocation2 + $0x8] sm:$0xf]  ;;  %v6548_v23 = vld [vmem:[#allocation82_spill] sm:$0xff] }
 0x646   : > { %v1956_v56 = vsel %vm1870_vm9, %v1950_v0, %v1955_v1  ;;  %v1986_v54 = vpop.permute.xlu1 %1985  ;;  %v2607_v0 = vmul.f32 %v4030_v53, %v2605_v58  ;;  %v2606_v18 = vmul.f32 %v4031_v26, %v2605_v58  ;;  %v2856_v31 = vmul.f32 %v4030_v53, %v2854_v35  ;;  %v6547_v1 = vld [vmem:[#allocation55_spill] sm:$0xff] }
 0x647   : > { %v5649_v52 = vadd.f32 %v1956_v56, %v1942_v22  ;;  %v1989_v61 = vrot.slane %v1986_v54, 4  ;;  %v2024_v45 = vpop.permute.xlu0 %2023  ;;  %v2047_v28 = vsel %vm1870_vm9, %v6544_v51, %v2046_v30  ;;  %v2082_v36 = vsel %vm1619_vm0, %v2080_v11, %v2081_v41 }
 0x648   : > { %3088 = vrot.lane.b32.xlu1 %v3084_v8, %s6539_s10  ;;  %v2026_v44 = vrot.slane %v2024_v45, 4  ;;  %v5663_v29 = vadd.f32 %v2024_v45, %v2015_v32  ;;  %v2087_v25 = vadd.f32 %v6545_v9, %v5558_v6  ;;  %v2855_v22 = vmul.f32 %v4031_v26, %v2854_v35 }
 0x649   : > { %v1991_v55 = vsel %vm1619_vm0, %v1989_v61, %v1990_v17  ;;  %3291 = vrot.lane.b32.xlu0 %v3290_v19, %s4171_s29  ;;  %v2117_v62 = vrot.slane %v6547_v1, 4  ;;  %v2116_v56 = vrot.slane %v6548_v23, 4  ;;  %v2050_v17 = vadd.f32 %v2047_v28, %v5562_v47  ;;  %s3877_s29 = sshll.u32 %s4242_s28, 12 }
 0x64a   : > { %v1992_v39 = vsel %vm1870_vm9, %v1986_v54, %v1991_v55  ;;  %v2022_v27 = vpop.permute.xlu1 %2021  ;;  %v2621_v32 = vstv %s5666_s16  ;;  %v2083_v15 = vsel %vm1870_vm9, %v6546_v12, %v2082_v36  ;;  %v6552_v36 = vld [vmem:[#allocation89_spill] sm:$0xff]  ;;  %s6184_s16 = scalar_lea.vmem [#allocation9], %s6647_s0 }
 0x64b   : > { %v5668_v14 = vadd.f32 %v1992_v39, %v1978_v50  ;;  %v2025_v20 = vrot.slane %v2022_v27, 4  ;;  %v2060_v42 = vpop.permute.xlu0 %2059  ;;  %v2118_v47 = vsel %vm1619_vm0, %v2116_v56, %v2117_v62  ;;  %v2086_v37 = vadd.f32 %v2083_v15, %v5584_v38  ;;  %v4032_v50 = vld [vmem:[#allocation3 + $0x8] sm:$0xf] }
 0x64c   : > { %3258 = vrot.lane.b32.xlu1 %v3257_v21, %s4172_s18  ;;  %v2062_v49 = vrot.slane %v2060_v42, 4  ;;  %v5681_v40 = vadd.f32 %v2060_v42, %v2051_v48  ;;  %v2623_v55 = vmul.f32 %v4032_v50, %v2621_v32  ;;  %v2120_v9 = vsel %vm2119_vm10, %v6548_v23, %v2118_v47  ;;  %s3507_s18 = sshll.u32 %s6184_s16, 4  ;;  %s6233_s18 = int_to_ptr.vmem [resolvable:$true] %s3507_s18 }
 0x64d   : > { %v2027_v16 = vsel %vm1619_vm0, %v2025_v20, %v2026_v44  ;;  %2612 = vrot.lane.b32.xlu0 %v2607_v0, %s6536_s20  ;;  %v2869_v20 = vstv %s5683_s12  ;;  %v2122_v38 = vadd.f32 %v2120_v9, %v5604_v2  ;;  %v6549_v2 = vld [vmem:[#allocation59_spill] sm:$0xff] }
 0x64e   : > { %v2028_v57 = vsel %vm1870_vm9, %v2022_v27, %v2027_v16  ;;  %v2058_v10 = vpop.permute.xlu1 %2057  ;;  %v4033_v27 = vld [vmem:[#allocation3] sm:$0xff]  ;;  %v2871_v11 = vmul.f32 %v4032_v50, %v2869_v20  ;;  %v2258_v0 = vrot.slane %v6549_v2, 4 }
 0x64f   : > { %v5685_v46 = vadd.f32 %v2028_v57, %v2014_v7  ;;  %v2061_v33 = vrot.slane %v2058_v10, 4  ;;  %v2096_v8 = vpop.permute.xlu0 %2095  ;;  %v2622_v58 = vmul.f32 %v4033_v27, %v2621_v32  ;;  %v2870_v7 = vmul.f32 %v4033_v27, %v2869_v20  ;;  %v6550_v57 = vld [vmem:[#allocation88_spill] sm:$0xff]  ;;  %v6559_v27 = vld [vmem:[#allocation91_spill] sm:$0xff] }
 0x650   : > { %2610 = vrot.lane.b32.xlu1 %v2606_v18, %s6536_s20  ;;  %v2098_v19 = vrot.slane %v2096_v8, 4  ;;  %v5699_v5 = vadd.f32 %v2096_v8, %v2087_v25  ;;  %v2264_v18 = vadd.f32 %v6549_v2, %v5663_v29  ;;  %v2293_v25 = vrot.slane %v6552_v36, 4 }
 0x651   : > { %v2063_v54 = vsel %vm1619_vm0, %v2061_v33, %v2062_v49  ;;  %2861 = vrot.lane.b32.xlu0 %v2856_v31, %s6539_s10  ;;  %v2257_v49 = vrot.slane %v6550_v57, 4  ;;  %v6551_v31 = vld [vmem:[#allocation60_spill] sm:$0xff] }
 0x652   : > { %v2064_v61 = vsel %vm1870_vm9, %v2058_v10, %v2063_v54  ;;  %v2094_v43 = vpop.permute.xlu1 %2093  ;;  %v2294_v28 = vrot.slane %v6551_v31, 4  ;;  %v6554_v54 = vld [vmem:[#allocation61_spill] sm:$0xff]  ;;  %v2300_v29 = vadd.f32 %v6551_v31, %v5681_v40 }
 0x653   : > { %v5702_v21 = vadd.f32 %v2064_v61, %v2050_v17  ;;  %v2097_v6 = vrot.slane %v2094_v43, 4  ;;  %v2131_v59 = vpop.permute.xlu0 %2130  ;;  %v2259_v33 = vsel %vm1619_vm0, %v2257_v49, %v2258_v0  ;;  %v2330_v8 = vrot.slane %v6554_v54, 4  ;;  %v6555_v61 = vld [vmem:[#allocation90_spill] sm:$0xff] }
 0x654   : > { %2859 = vrot.lane.b32.xlu1 %v2855_v22, %s6539_s10  ;;  %v2133_v39 = vrot.slane %v2131_v59, 4  ;;  %v2260_v17 = vsel %vm2119_vm10, %v6550_v57, %v2259_v33 }
 0x655   : > { %v2099_v51 = vsel %vm1619_vm0, %v2097_v6, %v2098_v19  ;;  %2628 = vrot.lane.b32.xlu0 %v2623_v55, %s6536_s20  ;;  %v2329_v19 = vrot.slane %v6555_v61, 4  ;;  %v2263_v32 = vadd.f32 %v2260_v17, %v5685_v46  ;;  %v2336_v46 = vadd.f32 %v6554_v54, %v5699_v5 }
 0x656   : > { %v2100_v45 = vsel %vm1870_vm9, %v2094_v43, %v2099_v51  ;;  %v2129_v44 = vpop.permute.xlu1 %2128  ;;  %v2295_v43 = vsel %vm1619_vm0, %v2293_v25, %v2294_v28 }
 0x657   : > { %v2103_v35 = vadd.f32 %v2100_v45, %v2086_v37  ;;  %v2132_v34 = vrot.slane %v2129_v44, 4  ;;  %v5719_v12 = vpop.permute.xlu0 %2164  ;;  %v2296_v45 = vsel %vm2119_vm10, %v6552_v36, %v2295_v43  ;;  %v2331_v40 = vsel %vm1619_vm0, %v2329_v19, %v2330_v8  ;;  %v6564_v8 = vld [vmem:[#allocation49_spill] sm:$0xff]  ;;  %v6565_v19 = vld [vmem:[#allocation50_spill] sm:$0xff]  ;;  %v6566_v43 = vld [vmem:[#allocation51_spill] sm:$0xff] }
 0x658   : > { %2626 = vrot.lane.b32.xlu1 %v2622_v58, %s6536_s20  ;;  %v2365_v58 = vrot.slane %v6559_v27, 4  ;;  %v2299_v20 = vadd.f32 %v2296_v45, %v5702_v21  ;;  %v2332_v5 = vsel %vm2119_vm10, %v6555_v61, %v2331_v40  ;;  %v6416_v61 = vrot.slane %v6564_v8, 4  ;;  %v6570_v45 = vld [vmem:[#allocation86_spill] sm:$0xff]  ;;  %s4173_s20 = smov 127  }
 0x659   : > { %v2134_v41 = vsel %vm1619_vm0, %v2132_v34, %v2133_v39  ;;  %2876 = vrot.lane.b32.xlu0 %v2871_v11, %s6539_s10  ;;  %v6558_v39 = vld [vmem:[#allocation62_spill] sm:$0xff]  ;;  %v2335_v57 = vadd.f32 %v2332_v5, %v2103_v35  ;;  %v2185_v40 = vrot.slane %v6570_v45, 4  ;;  %v2167_v5 = vrot.slane %v5719_v12, 4 }
 0x65a   : > { %v2135_v48 = vsel %vm2119_vm10, %v2129_v44, %v2134_v41  ;;  %v5722_v30 = vpop.permute.xlu1 %2162  ;;  %v2366_v44 = vrot.slane %v6558_v39, 4 }
 0x65b   : > { %v2137_v16 = vadd.f32 %v2135_v48, %v2122_v38  ;;  %v5726_v42 = vpop.permute.xlu0 %2200 }
 0x65c   : > { %2874 = vrot.lane.b32.xlu1 %v2870_v7, %s6539_s10  ;;  %v2367_v0 = vsel %vm1619_vm0, %v2365_v58, %v2366_v44  ;;  %v6572_v44 = vld [vmem:[#allocation87_spill] sm:$0xff]  ;;  %s4174_s10 = smov 126  }
 0x65d   : > { %v2369_v25 = vsel %vm2368_vm11, %v6559_v27, %v2367_v0  ;;  %v2221_v27 = vrot.slane %v6572_v44, 4  ;;  %v2166_v0 = vrot.slane %v5722_v30, 4 }
 0x65e   : > { %v5728_v53 = vpop.permute.xlu1 %2198 }
 0x65f   : > { %v5732_v10 = vpop.permute.xlu0 %2236 }
 0x662   : > { %v5734_v26 = vpop.permute.xlu1 %2234 }
 0x663   : > { %v2273_v22 = vpop.permute.xlu0 %2272 }
 0x664   : > { %v2275_v1 = vrot.slane %v2273_v22, 4  ;;  %v5741_v62 = vadd.f32 %v2273_v22, %v2264_v18  ;;  %v2371_v22 = vadd.f32 %v2369_v25, %v2137_v16  ;;  %v6567_v16 = vld [vmem:[#allocation56_spill] sm:$0xff] }
 0x666   : > { %6553 = vst [vmem:[#allocation75_spill] sm:$0xff] %v5741_v62  ;;  %v2271_v23 = vpop.permute.xlu1 %2270 }
 0x667   : > { %v2274_v56 = vrot.slane %v2271_v23, 4  ;;  %v2309_v15 = vpop.permute.xlu0 %2308 }
 0x668   : > { %v2311_v37 = vrot.slane %v2309_v15, 4  ;;  %v5753_v51 = vadd.f32 %v2309_v15, %v2300_v29  ;;  %v6414_v29 = vrot.slane %v6565_v19, 4  ;;  %v2150_v15 = vrot.slane %v6567_v16, 4 }
 0x669   : > { %v2276_v6 = vsel %vm1619_vm0, %v2274_v56, %v2275_v1 }
 0x66a   : > { %v2277_v47 = vsel %vm2119_vm10, %v2271_v23, %v2276_v6  ;;  %6556 = vst [vmem:[#allocation53_spill] sm:$0xff] %v5753_v51  ;;  %v2307_v59 = vpop.permute.xlu1 %2306  ;;  %v2168_v51 = vsel %vm1619_vm0, %v2166_v0, %v2167_v5 }
 0x66b   : > { %v5755_v50 = vadd.f32 %v2277_v47, %v2263_v32  ;;  %v2310_v55 = vrot.slane %v2307_v59, 4  ;;  %v2345_v9 = vpop.permute.xlu0 %2344  ;;  %v6415_v32 = vrot.slane %v6566_v43, 4  ;;  %v6568_v47 = vld [vmem:[#allocation85_spill] sm:$0xff] }
 0x66c   : > { %v2347_v41 = vrot.slane %v2345_v9, 4  ;;  %v5767_v11 = vadd.f32 %v2345_v9, %v2336_v46  ;;  %v6571_v46 = vld [vmem:[#allocation58_spill] sm:$0xff] }
 0x66d   : > { %6557 = vst [vmem:[#allocation77_spill] sm:$0xff] %v5755_v50  ;;  %v2312_v34 = vsel %vm1619_vm0, %v2310_v55, %v2311_v37  ;;  %v2149_v37 = vrot.slane %v6568_v47, 4  ;;  %v2222_v39 = vrot.slane %v6571_v46, 4  ;;  %v5819_v9 = vsel %vm468_vm2, %v6415_v32, %v6566_v43  ;;  %v6582_v32 = vld [vmem:[#allocation66_spill] sm:$0xff] }
 0x66e   : > { %v2313_v38 = vsel %vm2119_vm10, %v2307_v59, %v2312_v34  ;;  %6560 = vst [vmem:[#allocation54_spill] sm:$0xff] %v5767_v11  ;;  %v2343_v48 = vpop.permute.xlu1 %2342  ;;  %v6569_v59 = vld [vmem:[#allocation57_spill] sm:$0xff]  ;;  %v5813_v34 = vsel %vm473_vm3, %v6414_v29, %v6565_v19  ;;  %6574 = vst [vmem:[#allocation88_spill] sm:$0xff] %v5819_v9  ;;  %v6581_v29 = vld [vmem:[#allocation94_spill] sm:$0xff]  ;;  %vm3143_vm2 = vcmask 1039360   ;;  %vm3176_vm3 = vcmask 1031168  }
 0x66f   : > { %v5769_v7 = vadd.f32 %v2313_v38, %v2299_v20  ;;  %v2346_v2 = vrot.slane %v2343_v48, 4  ;;  %v2380_v49 = vpop.permute.xlu0 %2379  ;;  %v2186_v55 = vrot.slane %v6569_v59, 4  ;;  %v5807_v20 = vsel %vm463_vm1, %v6416_v61, %v6564_v8  ;;  %6573 = vst [vmem:[#allocation59_spill] sm:$0xff] %v5813_v34  ;;  %v6587_v34 = vld [vmem:[#allocation97_spill] sm:$0xff] }
 0x670   : > { %v2382_v33 = vrot.slane %v2380_v49, 4  ;;  %v6576_v49 = vld [vmem:[#allocation63_spill] sm:$0xff]  ;;  %v2648_v61 = vrot.slane %v6582_v32, 4  ;;  %vm2617_vm1 = vcmask 392192  }
 0x671   : > { %6561 = vst [vmem:[#allocation80_spill] sm:$0xff] %v5769_v7  ;;  %v2348_v21 = vsel %vm1619_vm0, %v2346_v2, %v2347_v41  ;;  %v2151_v2 = vsel %vm1619_vm0, %v2149_v37, %v2150_v15  ;;  %v2470_v15 = vrot.slane %v6581_v29, 4  ;;  %v6586_v41 = vld [vmem:[#allocation68_spill] sm:$0xff]  ;;  %v2683_v7 = vrot.slane %v6587_v34, 4 }
 0x672   : > { %v2349_v18 = vsel %vm2119_vm10, %v2343_v48, %v2348_v21  ;;  %v2378_v31 = vpop.permute.xlu1 %2377  ;;  %v2223_v21 = vsel %vm1619_vm0, %v2221_v27, %v2222_v39  ;;  %v2156_v27 = vadd.f32 %v6567_v16, %v5597_v63  ;;  %v2152_v19 = vsel %vm2119_vm10, %v6568_v47, %v2151_v2 }
 0x673   : > { %v5776_v28 = vadd.f32 %v2349_v18, %v2335_v57  ;;  %v2381_v36 = vrot.slane %v2378_v31, 4  ;;  %v5781_v23 = vpop.permute.xlu0 %2413  ;;  %v2187_v57 = vsel %vm1619_vm0, %v2185_v40, %v2186_v55  ;;  %v2399_v18 = vrot.slane %v6576_v49, 4  ;;  %v6584_v40 = vld [vmem:[#allocation67_spill] sm:$0xff] }
 0x674   : > { %v2647_v55 = vrot.slane %v6583_v4, 4  ;;  %v2507_v39 = vrot.slane %v6584_v40, 4  ;;  %v5852_v9 = vsel %vm2119_vm10, %v6570_v45, %v2187_v57  ;;  %v2173_v63 = vadd.f32 %v5719_v12, %v2156_v27  ;;  %v6591_v40 = vld [vmem:[#allocation98_spill] sm:$0xff] }
 0x675   : > { %6562 = vst [vmem:[#allocation55_spill] sm:$0xff] %v5776_v28  ;;  %v2383_v1 = vsel %vm1619_vm0, %v2381_v36, %v2382_v33  ;;  %v6577_v33 = vld [vmem:[#allocation92_spill] sm:$0xff]  ;;  %v2684_v28 = vrot.slane %v6586_v41, 4  ;;  %v5857_v16 = vsel %vm2119_vm10, %v6572_v44, %v2223_v21  ;;  %v2416_v43 = vrot.slane %v5781_v23, 4 }
 0x676   : > { %v2384_v35 = vsel %vm2368_vm11, %v2378_v31, %v2383_v1  ;;  %v5784_v56 = vpop.permute.xlu1 %2411  ;;  %v2398_v31 = vrot.slane %v6577_v33, 4  ;;  %v6578_v36 = vld [vmem:[#allocation64_spill] sm:$0xff]  ;;  %v2649_v2 = vsel %vm1619_vm0, %v2647_v55, %v2648_v61  ;;  %v2169_v12 = vsel %vm2119_vm10, %v5722_v30, %v2168_v51  ;;  %v6594_v55 = vld [vmem:[#allocation71_spill] sm:$0xff] }
 0x677   : > { %v5786_v17 = vadd.f32 %v2384_v35, %v2371_v22  ;;  %v5788_v54 = vpop.permute.xlu0 %2449  ;;  %v2435_v25 = vrot.slane %v6578_v36, 4  ;;  %v6579_v22 = vld [vmem:[#allocation93_spill] sm:$0xff]  ;;  %v2415_v5 = vrot.slane %v5784_v56, 4  ;;  %v2685_v21 = vsel %vm1619_vm0, %v2683_v7, %v2684_v28  ;;  %v6595_v51 = vld [vmem:[#allocation100_spill] sm:$0xff] }
 0x678   : > { %v2434_v1 = vrot.slane %v6579_v22, 4  ;;  %v6580_v35 = vld [vmem:[#allocation65_spill] sm:$0xff]  ;;  %v2400_v50 = vsel %vm1619_vm0, %v2398_v31, %v2399_v18  ;;  %v2155_v27 = vadd.f32 %v2152_v19, %v5628_v24  ;;  %v2542_v62 = vrot.slane %v6591_v40, 4 }
 0x679   : > { %6563 = vst [vmem:[#allocation82_spill] sm:$0xff] %v5786_v17  ;;  %v2471_v48 = vrot.slane %v6580_v35, 4  ;;  %v6585_v17 = vld [vmem:[#allocation96_spill] sm:$0xff]  ;;  %v6590_v18 = vld [vmem:[#allocation69_spill] sm:$0xff]  ;;  %v2405_v61 = vadd.f32 %v6576_v49, %v2173_v63  ;;  %v2896_v30 = vrot.slane %v6594_v55, 4  ;;  %v2401_v24 = vsel %vm2368_vm11, %v6577_v33, %v2400_v50 }
 0x67a   : > { %v5793_v6 = vpop.permute.xlu1 %2447  ;;  %v2506_v11 = vrot.slane %v6585_v17, 4  ;;  %v2436_v47 = vsel %vm1619_vm0, %v2434_v1, %v2435_v25  ;;  %v2543_v31 = vrot.slane %v6590_v18, 4  ;;  %v6592_v25 = vld [vmem:[#allocation70_spill] sm:$0xff]  ;;  %v2203_v28 = vrot.slane %v5726_v42, 4 }
 0x67b   : > { %v5801_v58 = vpop.permute.xlu0 %2485  ;;  %v2472_v45 = vsel %vm1619_vm0, %v2470_v15, %v2471_v48  ;;  %v2720_v1 = vrot.slane %v6592_v25, 4  ;;  %v6593_v48 = vld [vmem:[#allocation99_spill] sm:$0xff]  ;;  %v2202_v19 = vrot.slane %v5728_v53, 4  ;;  %v2437_v49 = vsel %vm2368_vm11, %v6579_v22, %v2436_v47 }
 0x67c   : > { %v2508_v44 = vsel %vm1619_vm0, %v2506_v11, %v2507_v39  ;;  %v2719_v15 = vrot.slane %v6593_v48, 4  ;;  %v2417_v11 = vsel %vm1619_vm0, %v2415_v5, %v2416_v43  ;;  %v2422_v39 = vadd.f32 %v5781_v23, %v2405_v61 }
 0x67d   : > { %v5895_v63 = vsel %vm2368_vm11, %v6581_v29, %v2472_v45  ;;  %v2650_v50 = vsel %vm2617_vm1, %v6583_v4, %v2649_v2  ;;  %v5903_v33 = vsel %vm2368_vm11, %v6585_v17, %v2508_v44  ;;  %v5907_v23 = vsel %vm2617_vm1, %v6587_v34, %v2685_v21  ;;  %v6596_v4 = vld [vmem:[#allocation72_spill] sm:$0xff] }
 0x67e   : > { %v5821_v38 = vpop.permute.xlu1 %2483  ;;  %v2418_v22 = vsel %vm2368_vm11, %v5784_v56, %v2417_v11  ;;  %v2544_v29 = vsel %vm1619_vm0, %v2542_v62, %v2543_v31  ;;  %v2721_v47 = vsel %vm1619_vm0, %v2719_v15, %v2720_v1  ;;  %v2579_v2 = vrot.slane %v6596_v4, 4  ;;  %v6597_v56 = vld [vmem:[#allocation101_spill] sm:$0xff] }
 0x67f   : > { %v5835_v37 = vpop.permute.xlu0 %2662  ;;  %v2192_v17 = vadd.f32 %v6569_v59, %v5623_v3  ;;  %v2204_v34 = vsel %vm1619_vm0, %v2202_v19, %v2203_v28  ;;  %v2654_v44 = vadd.f32 %v6582_v32, %v2422_v39  ;;  %v2578_v62 = vrot.slane %v6597_v56, 4  ;;  %v6598_v31 = vld [vmem:[#allocation73_spill] sm:$0xff]  ;;  %v6601_v59 = vld [vmem:[#allocation103_spill] sm:$0xff] }
 0x680   : > { %v2665_v43 = vrot.slane %v5835_v37, 4  ;;  %v2756_v1 = vrot.slane %v6598_v31, 4  ;;  %v2931_v28 = vrot.slane %v6601_v59, 4  ;;  %v2205_v32 = vsel %vm2119_vm10, %v5728_v53, %v2204_v34 }
 0x681   : > { %v2671_v3 = vadd.f32 %v5835_v37, %v2654_v44  ;;  %v2452_v19 = vrot.slane %v5788_v54, 4  ;;  %v2451_v39 = vrot.slane %v5793_v6, 4  ;;  %v2191_v37 = vadd.f32 %v5852_v9, %v5649_v52 }
 0x682   : > { %v5842_v13 = vpop.permute.xlu1 %2660  ;;  %v2580_v34 = vsel %vm1619_vm0, %v2578_v62, %v2579_v2 }
 0x683   : > { %v5862_v0 = vpop.permute.xlu0 %2521  ;;  %v2664_v5 = vrot.slane %v5842_v13, 4  ;;  %v2902_v52 = vadd.f32 %v6594_v55, %v2671_v3  ;;  %v2453_v44 = vsel %vm1619_vm0, %v2451_v39, %v2452_v19 }
 0x684   : > { %6588 = vst [vmem:[#allocation60_spill] sm:$0xff] %v5862_v0  ;;  %v2172_v0 = vadd.f32 %v2169_v12, %v2155_v27  ;;  %v2454_v3 = vsel %vm2368_vm11, %v5793_v6, %v2453_v44 }
 0x686   : > { %v5869_v57 = vpop.permute.xlu1 %2519  ;;  %v2404_v12 = vadd.f32 %v2401_v24, %v2172_v0  ;;  %v2666_v0 = vsel %vm1619_vm0, %v2664_v5, %v2665_v43  ;;  %v2209_v24 = vadd.f32 %v5726_v42, %v2192_v17  ;;  %v5939_v43 = vsel %vm2368_vm11, %v6591_v40, %v2544_v29 }
 0x687   : > { %6589 = vst [vmem:[#allocation89_spill] sm:$0xff] %v5869_v57  ;;  %v2895_v57 = vrot.slane %v6595_v51, 4  ;;  %v5882_v7 = vpop.permute.xlu0 %2698  ;;  %v5943_v42 = vsel %vm2617_vm1, %v6593_v48, %v2721_v47  ;;  %v2667_v53 = vsel %vm2617_vm1, %v5842_v13, %v2666_v0  ;;  %v2239_v17 = vrot.slane %v5732_v10, 4 }
 0x688   : > { %v2421_v15 = vadd.f32 %v2418_v22, %v2404_v12  ;;  %v2238_v40 = vrot.slane %v5734_v26, 4  ;;  %v2208_v48 = vadd.f32 %v2205_v32, %v2191_v37  ;;  %v2441_v47 = vadd.f32 %v6578_v36, %v2209_v24  ;;  %v6603_v37 = vld [vmem:[#allocation76_spill] sm:$0xff] }
 0x689   : > { %v2897_v45 = vsel %vm1619_vm0, %v2895_v57, %v2896_v30  ;;  %v6599_v57 = vld [vmem:[#allocation102_spill] sm:$0xff]  ;;  %v2701_v55 = vrot.slane %v5882_v7, 4 }
 0x68a   : > { %v5889_v18 = vpop.permute.xlu1 %2696  ;;  %v2755_v61 = vrot.slane %v6599_v57, 4  ;;  %v6600_v30 = vld [vmem:[#allocation74_spill] sm:$0xff]  ;;  %v2898_v12 = vsel %vm505_vm8, %v6595_v51, %v2897_v45  ;;  %v2653_v29 = vadd.f32 %v2650_v50, %v2421_v15  ;;  %v2228_v45 = vadd.f32 %v6571_v46, %v5646_v60 }
 0x68b   : > { %v5914_v27 = vpop.permute.xlu0 %2557  ;;  %v2932_v11 = vrot.slane %v6600_v30, 4  ;;  %v2458_v50 = vadd.f32 %v5788_v54, %v2441_v47  ;;  %v2240_v36 = vsel %vm1619_vm0, %v2238_v40, %v2239_v17  ;;  %v2440_v24 = vadd.f32 %v2437_v49, %v2208_v48  ;;  %v6604_v48 = vld [vmem:[#allocation104_spill] sm:$0xff] }
 0x68c   : > { %v2757_v9 = vsel %vm1619_vm0, %v2755_v61, %v2756_v1  ;;  %v2670_v0 = vadd.f32 %v2667_v53, %v2653_v29  ;;  %v2700_v1 = vrot.slane %v5889_v18, 4  ;;  %v6602_v60 = vrot.slane %v6564_v8, 4 }
 0x68d   : > { %v2933_v13 = vsel %vm1619_vm0, %v2931_v28, %v2932_v11  ;;  %v2245_v11 = vadd.f32 %v5732_v10, %v2228_v45  ;;  %v2488_v54 = vrot.slane %v5801_v58, 4  ;;  %v2487_v28 = vrot.slane %v5821_v38, 4 }
 0x68e   : > { %v5921_v21 = vpop.permute.xlu1 %2555  ;;  %v2901_v32 = vadd.f32 %v2898_v12, %v2670_v0  ;;  %v2792_v53 = vrot.slane %v6603_v37, 4  ;;  %v2241_v10 = vsel %vm2119_vm10, %v5734_v26, %v2240_v36  ;;  %v2690_v49 = vadd.f32 %v6586_v41, %v2458_v50  ;;  %v6606_v26 = vld [vmem:[#allocation105_spill] sm:$0xff] }
 0x68f   : > { %v5935_v22 = vpop.permute.xlu0 %2734  ;;  %v2227_v12 = vadd.f32 %v5857_v16, %v5668_v14  ;;  %v2457_v17 = vadd.f32 %v2454_v3, %v2440_v24  ;;  %v2702_v40 = vsel %vm1619_vm0, %v2700_v1, %v2701_v55  ;;  %v2791_v47 = vrot.slane %v6604_v48, 4  ;;  %v6608_v1 = vld [vmem:[#allocation89_spill] sm:$0xff]  ;;  %v6609_v24 = vld [vmem:[#allocation79_spill] sm:$0xff] }
 0x690   : > { %v2967_v0 = vrot.slane %v6606_v26, 4  ;;  %v2707_v41 = vadd.f32 %v5882_v7, %v2690_v49  ;;  %v2477_v45 = vadd.f32 %v6580_v35, %v2245_v11  ;;  %v2489_v50 = vsel %vm1619_vm0, %v2487_v28, %v2488_v54  ;;  %v6612_v49 = vld [vmem:[#allocation107_spill] sm:$0xff] }
 0x691   : > { %v5998_v16 = vsel %vm2368_vm11, %v6597_v56, %v2580_v34  ;;  %v2934_v7 = vsel %vm505_vm8, %v6601_v59, %v2933_v13  ;;  %v2703_v35 = vsel %vm2617_vm1, %v5889_v18, %v2702_v40  ;;  %v2689_v36 = vadd.f32 %v5907_v23, %v2457_v17  ;;  %v6607_v13 = vld [vmem:[#allocation60_spill] sm:$0xff]  ;;  %v6614_v17 = vld [vmem:[#allocation67_spill] sm:$0xff] }
 0x692   : > { %v5949_v5 = vpop.permute.xlu1 %2732  ;;  %v2737_v55 = vrot.slane %v5935_v22, 4  ;;  %v2490_v59 = vsel %vm2368_vm11, %v5821_v38, %v2489_v50  ;;  %v2938_v18 = vadd.f32 %v6600_v30, %v2707_v41  ;;  %v2523_v23 = vrot.slane %v6608_v1, 4 }
 0x693   : > { %v2911_v51 = vpop.permute.xlu0 %2910  ;;  %v2736_v56 = vrot.slane %v5949_v5, 4  ;;  %v2827_v3 = vrot.slane %v6609_v24, 4 }
 0x694   : > { %v2913_v15 = vrot.slane %v2911_v51, 4  ;;  %v2919_v2 = vadd.f32 %v2911_v51, %v2902_v52  ;;  %v6605_v52 = vld [vmem:[#allocation78_spill] sm:$0xff]  ;;  %v2244_v51 = vadd.f32 %v2241_v10, %v2227_v12  ;;  %v6613_v12 = vld [vmem:[#allocation75_spill] sm:$0xff] }
 0x695   : > { %v2968_v44 = vrot.slane %v6605_v52, 4  ;;  %v2738_v30 = vsel %vm1619_vm0, %v2736_v56, %v2737_v55  ;;  %v2513_v40 = vadd.f32 %v6614_v17, %v6613_v12 }
 0x696   : > { %v2909_v62 = vpop.permute.xlu1 %2908  ;;  %v3133_v46 = vmul.f32 %v6602_v60, %v2919_v2  ;;  %v6002_v2 = vsel %vm2617_vm1, %v6599_v57, %v2757_v9  ;;  %v2793_v57 = vsel %vm1619_vm0, %v2791_v47, %v2792_v53  ;;  %v2476_v9 = vadd.f32 %v5895_v63, %v2244_v51  ;;  %v6610_v60 = vld [vmem:[#allocation106_spill] sm:$0xff]  ;;  %v6611_v63 = vld [vmem:[#allocation81_spill] sm:$0xff] }
 0x697   : > { %v2912_v61 = vrot.slane %v2909_v62, 4  ;;  %v5975_v39 = vpop.permute.xlu0 %2593  ;;  %v2969_v34 = vsel %vm1619_vm0, %v2967_v0, %v2968_v44  ;;  %v3003_v10 = vrot.slane %v6611_v63, 4  ;;  %v6039_v50 = vsel %vm2617_vm1, %v6604_v48, %v2793_v57 }
 0x698   : > { %3138 = vrot.lane.b32.xlu0 %v3133_v46, %s4173_s20  ;;  %v2828_v46 = vrot.slane %v6610_v60, 4  ;;  %v2970_v48 = vsel %vm505_vm8, %v6606_v26, %v2969_v34  ;;  %v2559_v26 = vrot.slane %v5921_v21, 4 }
 0x699   : > { %v2914_v19 = vsel %vm1619_vm0, %v2912_v61, %v2913_v15  ;;  %v2706_v61 = vadd.f32 %v2703_v35, %v2689_v36  ;;  %v2739_v35 = vsel %vm2617_vm1, %v5949_v5, %v2738_v30  ;;  %v6619_v30 = vld [vmem:[#allocation83_spill] sm:$0xff] }
 0x69a   : > { %v2915_v6 = vsel %vm505_vm8, %v2909_v62, %v2914_v19  ;;  %v5982_v8 = vpop.permute.xlu1 %2591  ;;  %v2493_v19 = vadd.f32 %v2490_v59, %v2476_v9  ;;  %v6055_v5 = vsel %vm1619_vm0, %v2827_v3, %v2828_v46 }
 0x69b   : > { %v2918_v29 = vadd.f32 %v2915_v6, %v2901_v32  ;;  %v5994_v14 = vpop.permute.xlu0 %2770  ;;  %v3004_v6 = vrot.slane %v6612_v49, 4  ;;  %v2937_v51 = vadd.f32 %v2934_v7, %v2706_v61 }
 0x69c   : > { %v2773_v7 = vrot.slane %v5994_v14, 4 }
 0x69d   : > { %v3132_v15 = vmul.f32 %v5807_v20, %v2918_v29  ;;  %v2494_v20 = vadd.f32 %v5801_v58, %v2477_v45  ;;  %v2524_v58 = vrot.slane %v6607_v13, 4  ;;  %v6615_v29 = vld [vmem:[#allocation51_spill] sm:$0xff]  ;;  %v3005_v59 = vsel %vm1619_vm0, %v3003_v10, %v3004_v6  ;;  %v6620_v6 = vld [vmem:[#allocation50_spill] sm:$0xff] }
 0x69e   : > { %v6008_v62 = vpop.permute.xlu1 %2768  ;;  %v6616_v47 = vrot.slane %v6615_v29, 4  ;;  %v6621_v12 = vrot.slane %v6620_v6, 4  ;;  %v6622_v29 = vld [vmem:[#allocation108_spill] sm:$0xff] }
 0x69f   : > { %3136 = vrot.lane.b32.xlu1 %v3132_v15, %s4173_s20  ;;  %v2947_v11 = vpop.permute.xlu0 %2946  ;;  %v2726_v38 = vadd.f32 %v6592_v25, %v2494_v20  ;;  %v2525_v0 = vsel %vm1619_vm0, %v2523_v23, %v2524_v58  ;;  %v2530_v15 = vadd.f32 %v6607_v13, %v2513_v40  ;;  %v2772_v55 = vrot.slane %v6008_v62, 4  ;;  %v6618_v13 = vld [vmem:[#allocation88_spill] sm:$0xff]  ;;  %s6231_s20 = scalar_lea.hbm %s6299_s7, %s3877_s29 }
 0x6a0   : > { %v2949_v54 = vrot.slane %v2947_v11, 4  ;;  %v2955_v28 = vadd.f32 %v2947_v11, %v2938_v18  ;;  %v2526_v57 = vsel %vm2368_vm11, %v6608_v1, %v2525_v0  ;;  %v6617_v18 = vld [vmem:[#allocation77_spill] sm:$0xff]  ;;  %v2560_v11 = vrot.slane %v5914_v27, 4 }
 0x6a1   : > { %v2743_v41 = vadd.f32 %v5935_v22, %v2726_v38  ;;  %v2725_v22 = vadd.f32 %v5943_v42, %v2493_v19  ;;  %v2512_v9 = vadd.f32 %v5903_v33, %v6617_v18  ;;  %v2762_v34 = vadd.f32 %v6598_v31, %v2530_v15  ;;  %v6625_v15 = vld [vmem:[#allocation80_spill] sm:$0xff]  ;;  %v6626_v18 = vld [vmem:[#allocation59_spill] sm:$0xff] }
 0x6a2   : > { %v2945_v32 = vpop.permute.xlu1 %2944  ;;  %v3166_v44 = vmul.f32 %v6616_v47, %v2955_v28  ;;  %v2596_v33 = vrot.slane %v5975_v39, 4  ;;  %v2595_v19 = vrot.slane %v5982_v8, 4  ;;  %v3006_v38 = vsel %vm505_vm8, %v6611_v63, %v3005_v59 }
 0x6a3   : > { %v2948_v53 = vrot.slane %v2945_v32, 4  ;;  %v6035_v45 = vpop.permute.xlu0 %2804  ;;  %v2742_v42 = vadd.f32 %v2739_v35, %v2725_v22  ;;  %v2974_v61 = vadd.f32 %v6605_v52, %v2743_v41  ;;  %v2529_v46 = vadd.f32 %v2526_v57, %v2512_v9  ;;  %v6623_v41 = vld [vmem:[#allocation53_spill] sm:$0xff] }
 0x6a4   : > { %3171 = vrot.lane.b32.xlu0 %v3166_v44, %s4174_s10  ;;  %v2779_v52 = vadd.f32 %v5994_v14, %v2762_v34  ;;  %v3039_v47 = vrot.slane %v6622_v29, 4  ;;  %v2561_v44 = vsel %vm1619_vm0, %v2559_v26, %v2560_v11  ;;  %v2548_v35 = vadd.f32 %v5939_v43, %v6625_v15  ;;  %v6628_v26 = vld [vmem:[#allocation109_spill] sm:$0xff] }
 0x6a5   : > { %v2950_v25 = vsel %vm1619_vm0, %v2948_v53, %v2949_v54  ;;  %v2774_v54 = vsel %vm1619_vm0, %v2772_v55, %v2773_v7  ;;  %v3040_v53 = vrot.slane %v6619_v30, 4  ;;  %v2973_v31 = vadd.f32 %v2970_v48, %v2742_v42 }
 0x6a6   : > { %v2951_v20 = vsel %vm505_vm8, %v2945_v32, %v2950_v25  ;;  %v6045_v36 = vpop.permute.xlu1 %2806  ;;  %v2775_v14 = vsel %vm2617_vm1, %v6008_v62, %v2774_v54  ;;  %v2597_v7 = vsel %vm1619_vm0, %v2595_v19, %v2596_v33  ;;  %v2808_v55 = vrot.slane %v6035_v45, 4  ;;  %v6630_v54 = vld [vmem:[#allocation52_spill] sm:$0xff]  ;;  %v6632_v33 = vld [vmem:[#allocation54_spill] sm:$0xff] }
 0x6a7   : > { %v2954_v56 = vadd.f32 %v2951_v20, %v2937_v51  ;;  %v2981_v23 = vpop.permute.xlu0 %2980  ;;  %v6624_v51 = vld [vmem:[#allocation69_spill] sm:$0xff]  ;;  %v2761_v20 = vadd.f32 %v6002_v2, %v2529_v46  ;;  %v2809_v62 = vrot.slane %v6045_v36, 4  ;;  %v2562_v57 = vsel %vm2368_vm11, %v5921_v21, %v2561_v44 }
 0x6a8   : > { %v2984_v1 = vrot.slane %v2981_v23, 4  ;;  %v2549_v25 = vadd.f32 %v6624_v51, %v6623_v41  ;;  %v3076_v34 = vrot.slane %v6628_v26, 4  ;;  %v2565_v21 = vadd.f32 %v2562_v57, %v2548_v35 }
 0x6a9   : > { %v3165_v58 = vmul.f32 %v6618_v13, %v2954_v56  ;;  %v3010_v56 = vadd.f32 %v6612_v49, %v2779_v52  ;;  %v2778_v59 = vadd.f32 %v2775_v14, %v2761_v20  ;;  %v2810_v46 = vsel %vm1619_vm0, %v2808_v55, %v2809_v62 }
 0x6aa   : > { %v2983_v3 = vpop.permute.xlu1 %2982  ;;  %v2566_v48 = vadd.f32 %v5914_v27, %v2549_v25  ;;  %v2598_v27 = vsel %vm2368_vm11, %v5982_v8, %v2597_v7  ;;  %v2585_v19 = vadd.f32 %v6596_v4, %v6632_v33  ;;  %v2811_v4 = vsel %vm2617_vm1, %v6035_v45, %v2810_v46 }
 0x6ab   : > { %v2985_v28 = vrot.slane %v2983_v3, 4  ;;  %v2991_v32 = vadd.f32 %v2983_v3, %v2974_v61  ;;  %3169 = vrot.lane.b32.xlu1 %v3165_v58, %s4174_s10  ;;  %v6075_v40 = vpop.permute.xlu0 %2842  ;;  %v6627_v61 = vld [vmem:[#allocation84_spill] sm:$0xff]  ;;  %v2797_v51 = vadd.f32 %v6039_v50, %v2565_v21  ;;  %v2830_v25 = vsel %vm2617_vm1, %v6609_v24, %v6055_v5  ;;  %s3493_s10 = scalar_lea.sflag [#allocation6], %s4345_s19 }
 0x6ac   : > { %v2845_v9 = vrot.slane %v6075_v40, 4  ;;  %v3075_v11 = vrot.slane %v6627_v61, 4  ;;  %v2798_v52 = vadd.f32 %v6603_v37, %v2566_v48  ;;  %v2602_v14 = vadd.f32 %v5975_v39, %v2585_v19 }
 0x6ad   : > { %v2986_v10 = vsel %vm1619_vm0, %v2984_v1, %v2985_v28  ;;  %v3199_v17 = vmul.f32 %v6621_v12, %v2991_v32  ;;  %v6629_v1 = vld [vmem:[#allocation55_spill] sm:$0xff]  ;;  %v6631_v28 = vrot.slane %v6630_v54, 4  ;;  %v3041_v15 = vsel %vm1619_vm0, %v3039_v47, %v3040_v53 }
 0x6ae   : > { %v2987_v0 = vsel %vm505_vm8, %v2981_v23, %v2986_v10  ;;  %v2841_v63 = vpop.permute.xlu1 %2840  ;;  %v2584_v3 = vadd.f32 %v5998_v16, %v6629_v1  ;;  %v2815_v39 = vadd.f32 %v6045_v36, %v2798_v52  ;;  %v2834_v50 = vadd.f32 %v6610_v60, %v2602_v14 }
 0x6af   : > { %3204 = vrot.lane.b32.xlu0 %v3199_v17, %s4175_s21  ;;  %v2990_v22 = vadd.f32 %v2987_v0, %v2973_v31  ;;  %v3019_v43 = vpop.permute.xlu0 %3018  ;;  %v2844_v42 = vrot.slane %v2841_v63, 4  ;;  %v3009_v31 = vadd.f32 %v3006_v38, %v2778_v59  ;;  %v6634_v38 = vmov %v6631_v28 }
 0x6b0   : > { %v3021_v13 = vrot.slane %v3019_v43, 4  ;;  %v3027_v58 = vadd.f32 %v3019_v43, %v3010_v56  ;;  %v2601_v6 = vadd.f32 %v2598_v27, %v2584_v3  ;;  %v3228_v41 = vsel %vm478_vm4, %v6634_v38, %v6630_v54 }
 0x6b1   : > { %v3198_v2 = vmul.f32 %v6626_v18, %v2990_v22  ;;  %v2846_v12 = vsel %vm1619_vm0, %v2844_v42, %v2845_v9  ;;  %v2814_v56 = vadd.f32 %v2811_v4, %v2797_v51  ;;  %v3077_v48 = vsel %vm1619_vm0, %v3075_v11, %v3076_v34 }
 0x6b2   : > { %v3017_v23 = vpop.permute.xlu1 %3016  ;;  %v3232_v32 = vmul.f32 %v6631_v28, %v3027_v58  ;;  %v2847_v35 = vsel %vm2617_vm1, %v2841_v63, %v2846_v12  ;;  %v2833_v22 = vadd.f32 %v2830_v25, %v2601_v6  ;;  %v3042_v24 = vsel %vm505_vm8, %v6622_v29, %v3041_v15 }
 0x6b3   : > { %v3020_v49 = vrot.slane %v3017_v23, 4  ;;  %3202 = vrot.lane.b32.xlu1 %v3198_v2, %s4175_s21  ;;  %v3053_v8 = vpop.permute.xlu0 %3052  ;;  %v2851_v5 = vadd.f32 %v6075_v40, %v2834_v50  ;;  %v3046_v53 = vadd.f32 %v6619_v30, %v2815_v39  ;;  %v3078_v60 = vsel %vm505_vm8, %v6627_v61, %v3077_v48  ;;  %v3100_v39 = vld [vmem:[%s6293_s1] ss:$8 sm:$0x3]  ;;  %s4077_s21 = scalar_lea.vmem %s6233_s18, 4096 }
 0x6b4   : > { %v3056_v16 = vrot.slane %v3053_v8, 4  ;;  %3237 = vrot.lane.b32.xlu0 %v3232_v32, %s6633_s23  ;;  %v2850_v36 = vadd.f32 %v2847_v35, %v2833_v22  ;;  %v3045_v18 = vadd.f32 %v3042_v24, %v2814_v56  ;;  %v6636_v22 = vld [vmem:[#allocation15_spill] sm:$0xff]  ;;  %vm3209_vm4 = vcmask 1022976   ;;  %p4078_p13 = scmp.ne.s32.totalorder %s6233_s18, %s4077_s21 }
 0x6b5   : > { %v3022_v10 = vsel %vm1619_vm0, %v3020_v49, %v3021_v13  ;;  %v3082_v40 = vadd.f32 %v6628_v26, %v2851_v5 }
 0x6b6   : > { %v3023_v17 = vsel %vm505_vm8, %v3017_v23, %v3022_v10  ;;  %v3055_v44 = vpop.permute.xlu1 %3054  ;;  %v3081_v13 = vadd.f32 %v3078_v60, %v2850_v36  ;;  %p4079_p2 = pnand %p4078_p13, %p6672_p3 }
 0x6b7   : > { %v3026_v0 = vadd.f32 %v3023_v17, %v3009_v31  ;;  %v3057_v37 = vrot.slane %v3055_v44, 4  ;;  %v3091_v20 = vpop.permute.xlu0 %3090  ;;  %v3063_v2 = vadd.f32 %v3055_v44, %v3046_v53 }
 0x6b8   : > { %v3093_v55 = vrot.slane %v3091_v20, 4  ;;  %v3099_v27 = vadd.f32 %v3091_v20, %v3082_v40  ;;  %p4080_p7 = pneg %p4079_p2 }
 0x6b9   : > { %v3231_v45 = vmul.f32 %v3228_v41, %v3026_v0  ;;  %v3058_v7 = vsel %vm1619_vm0, %v3056_v16, %v3057_v37  ;;  %v6635_v0 = vld [vmem:[#allocation82_spill] sm:$0xff] }
 0x6ba   : > { %v3089_v62 = vpop.permute.xlu1 %3088  ;;  %v3059_v59 = vsel %vm505_vm8, %v3053_v8, %v3058_v7  ;;  %v3105_v7 = vrot.slane %v3100_v39, %v6636_v22 }
 0x6bb   : > { %v3092_v57 = vrot.slane %v3089_v62, 4  ;;  %3235 = vrot.lane.b32.xlu1 %v3231_v45, %s6633_s23  ;;  %v3292_v63 = vpop.permute.xlu0 %3291  ;;  %v3062_v58 = vadd.f32 %v3059_v59, %v3045_v18  ;;  %s4178_s23 = smov [#allocation9]  }
 0x6bc   : > { %v3293_v42 = vrot.slane %v3292_v63, 4 }
 0x6bd   : > { %v3094_v47 = vsel %vm1619_vm0, %v3092_v57, %v3093_v55  ;;  %v6637_v55 = vld [vmem:[#allocation16_spill] sm:$0xff] }
 0x6be   : > { %v3259_v43 = vpop.permute.xlu1 %3258  ;;  %v3095_v9 = vsel %vm505_vm8, %v3089_v62, %v3094_v47  ;;  %v3294_v49 = vsel %vm488_vm6, %v3293_v42, %v3292_v63  ;;  %v3298_v61 = vmul.f32 %v3293_v42, %v3099_v27  ;;  %v3109_v62 = vrot.slane %v3100_v39, %v6637_v55 }
 0x6bf   : > { %v3260_v29 = vrot.slane %v3259_v43, 4  ;;  %v3098_v11 = vadd.f32 %v3095_v9, %v3081_v13  ;;  %v2613_v3 = vpop.permute.xlu0 %2612  ;;  %vm3275_vm6 = vcmask 1006592  }
 0x6c0   : > { %v2615_v32 = vrot.slane %v2613_v3, 4  ;;  %v3110_v53 = vcombine.low %v3105_v7, %v3109_v62 }
 0x6c1   : > { %v3261_v30 = vsel %vm483_vm5, %v3260_v29, %v3259_v43  ;;  %v3265_v23 = vmul.f32 %v3260_v29, %v3063_v2  ;;  %v3297_v21 = vmul.f32 %v3294_v49, %v3098_v11  ;;  %vm3242_vm5 = vcmask 1014784  }
 0x6c2   : > { %v3264_v34 = vmul.f32 %v3261_v30, %v3062_v58  ;;  %v2611_v1 = vpop.permute.xlu1 %2610 }
 0x6c3   : > { %3270 = vrot.lane.b32.xlu0 %v3265_v23, %s4176_s22  ;;  %v2862_v26 = vpop.permute.xlu0 %2861  ;;  %v2614_v33 = vrot.slane %v2611_v1, 4 }
 0x6c4   : > { %3268 = vrot.lane.b32.xlu1 %v3264_v34, %s4176_s22  ;;  %v2864_v16 = vrot.slane %v2862_v26, 4  ;;  %s4081_s22 = sshll.u32 %s4178_s23, 4  ;;  %s4082_s22 = int_to_ptr.vmem [resolvable:$false] %s4081_s22 }
 0x6c5   : > { %v2616_v10 = vsel %vm1619_vm0, %v2614_v33, %v2615_v32  ;;  %p4084_p8 = scmp.lt.s32.totalorder %s6233_s18, %s4082_s22 }
 0x6c6   : > { %v2860_v46 = vpop.permute.xlu1 %2859  ;;  %v2618_v12 = vsel %vm2617_vm1, %v2611_v1, %v2616_v10 }
 0x6c7   : > { %3303 = vrot.lane.b32.xlu0 %v3298_v61, %s4177_s11  ;;  %v2629_v28 = vpop.permute.xlu0 %2628  ;;  %v2863_v44 = vrot.slane %v2860_v46, 4  ;;  %v2620_v37 = vadd.f32 %v2618_v12, %v6635_v0 }
 0x6c8   : > { %3301 = vrot.lane.b32.xlu1 %v3297_v21, %s4177_s11  ;;  %v2631_v19 = vrot.slane %v2629_v28, 4  ;;  %s4083_s11 = scalar_lea.vmem %s4082_s22, 8192 }
 0x6c9   : > { %v2865_v25 = vsel %vm1619_vm0, %v2863_v44, %v2864_v16  ;;  %p4085_p9 = scmp.lt.s32.totalorder %s4083_s11, %s4077_s21 }
 0x6ca   : > { %v2627_v54 = vpop.permute.xlu1 %2626  ;;  %v2866_v20 = vsel %vm505_vm8, %v2860_v46, %v2865_v25 }
 0x6cb   : > { %v2630_v52 = vrot.slane %v2627_v54, 4  ;;  %v2877_v8 = vpop.permute.xlu0 %2876  ;;  %p4086_p10 = por %p4085_p9, %p4084_p8 }
 0x6cc   : > { %v2879_v38 = vrot.slane %v2877_v8, 4  ;;  %v3312_v8 = vstv %s3604_s9 }
 0x6cd   : > { %v2632_v6 = vsel %vm1619_vm0, %v2630_v52, %v2631_v19  ;;  %p4087_p1 = pnand %p4086_p10, %p4080_p7 }
 0x6ce   : > { %v2875_v31 = vpop.permute.xlu1 %2874  ;;  %v2633_v14 = vsel %vm2617_vm1, %v2627_v54, %v2632_v6 }
 0x6cf   : > { %v2878_v41 = vrot.slane %v2875_v31, 4  ;;  %v2635_v15 = vadd.f32 %v2633_v14, %v2620_v37 }
 0x6d1   : > { %v2880_v45 = vsel %vm1619_vm0, %v2878_v41, %v2879_v38  ;;  %v2868_v50 = vadd.f32 %v2866_v20, %v2635_v15  ;;  %v6638_v38 = vld [vmem:[#allocation14_spill] sm:$0xff] }
 0x6d2   : > { %v2881_v57 = vsel %vm505_vm8, %v2875_v31, %v2880_v45  ;;  %vm3308_vm8 = vcmask 998400   ;;  %v3338_v41 = vsub.s32 4, %v6638_v38  ;;  %v3418_v25 = vsub.s32 2, %v6638_v38 }
 0x6d3   : > { %v2883_v63 = vadd.f32 %v2881_v57, %v2868_v50  ;;  %v3422_v15 = vsub.s32 6, %v6638_v38  ;;  %v3460_v39 = vsub.s32 3, %v6638_v38 }
 0x6d5   : > { %v3112_v13 = vmul.f32 %v3110_v53, %v2883_v63 }
 0x70a   : > { %v3139_v4 = vpop.permute.xlu0 %3138 }
 0x70b   : > { %v3141_v36 = vrot.slane %v3139_v4, 4 }
 0x711   : > { %v3137_v17 = vpop.permute.xlu1 %3136 }
 0x712   : > { %v3140_v48 = vrot.slane %v3137_v17, 4 }
 0x714   : > { %v3142_v59 = vsel %vm1619_vm0, %v3140_v48, %v3141_v36 }
 0x715   : > { %v3144_v29 = vsel %vm3143_vm2, %v3137_v17, %v3142_v59  ;;  %v3314_v17 = vstv %s3605_s8 }
 0x716   : > { %v3172_v35 = vpop.permute.xlu0 %3171  ;;  %v3146_v23 = vadd.f32 %v3144_v29, %v3112_v13  ;;  %v6641_v29 = vld [vmem:[#allocation21_spill] sm:$0xff] }
 0x717   : > { %v3174_v60 = vrot.slane %v3172_v35, 4  ;;  %v3464_v35 = vsub.s32 7, %v6638_v38 }
 0x71d   : > { %v3170_v51 = vpop.permute.xlu1 %3169 }
 0x71e   : > { %v3173_v5 = vrot.slane %v3170_v51, 4 }
 0x720   : > { %v3175_v2 = vsel %vm1619_vm0, %v3173_v5, %v3174_v60 }
 0x721   : > { %v3205_v24 = vpop.permute.xlu0 %3204  ;;  %v3177_v30 = vsel %vm3176_vm3, %v3170_v51, %v3175_v2  ;;  %v3380_v51 = vsub.s32 5, %v6638_v38  ;;  %v6660_v38 = vld [vmem:[#allocation45_spill] sm:$0xff] }
 0x722   : > { %v3207_v9 = vrot.slane %v3205_v24, 4  ;;  %v3179_v21 = vadd.f32 %v3177_v30, %v3146_v23  ;;  %v6643_v30 = vld [vmem:[#allocation29_spill] sm:$0xff] }
 0x725   : > { %v3203_v56 = vpop.permute.xlu1 %3202 }
 0x726   : > { %v3206_v43 = vrot.slane %v3203_v56, 4  ;;  %v3238_v18 = vpop.permute.xlu0 %3237 }
 0x727   : > { %v3240_v40 = vrot.slane %v3238_v18, 4  ;;  %v6639_v18 = vld [vmem:[#allocation25_spill] sm:$0xff] }
 0x728   : > { %v3208_v58 = vsel %vm1619_vm0, %v3206_v43, %v3207_v9  ;;  %v6640_v9 = vld [vmem:[#allocation26_spill] sm:$0xff] }
 0x729   : > { %v3210_v27 = vsel %vm3209_vm4, %v3203_v56, %v3208_v58  ;;  %v6642_v58 = vld [vmem:[#allocation22_spill] sm:$0xff] }
 0x72a   : > { %v3212_v46 = vadd.f32 %v3210_v27, %v3179_v21 }
 0x72d   : > { %v3236_v47 = vpop.permute.xlu1 %3235 }
 0x72e   : > { %v3239_v42 = vrot.slane %v3236_v47, 4 }
 0x730   : > { %v3241_v11 = vsel %vm1619_vm0, %v3239_v42, %v3240_v40 }
 0x731   : > { %v3243_v3 = vsel %vm3242_vm5, %v3236_v47, %v3241_v11  ;;  %v6644_v11 = vld [vmem:[#allocation30_spill] sm:$0xff] }
 0x732   : > { %v3245_v19 = vadd.f32 %v3243_v3, %v3212_v46  ;;  %v6650_v46 = vld [vmem:[#allocation23_spill] sm:$0xff] }
 0x735   : > { %v3271_v34 = vpop.permute.xlu0 %3270 }
 0x736   : > { %v3273_v49 = vrot.slane %v3271_v34, 4  ;;  %v3269_v61 = vpop.permute.xlu1 %3268  ;;  %v6645_v34 = vld [vmem:[#allocation17_spill] sm:$0xff] }
 0x737   : > { %v3272_v1 = vrot.slane %v3269_v61, 4 }
 0x739   : > { %v3274_v26 = vsel %vm1619_vm0, %v3272_v1, %v3273_v49  ;;  %v3304_v54 = vpop.permute.xlu0 %3303  ;;  %v6646_v49 = vld [vmem:[#allocation18_spill] sm:$0xff]  ;;  %v6649_v1 = vld [vmem:[#allocation28_spill] sm:$0xff] }
 0x73a   : > { %v3276_v28 = vsel %vm3275_vm6, %v3269_v61, %v3274_v26  ;;  %v3306_v32 = vrot.slane %v3304_v54, 4  ;;  %v3302_v33 = vpop.permute.xlu1 %3301  ;;  %v6648_v61 = vld [vmem:[#allocation27_spill] sm:$0xff]  ;;  %v6651_v54 = vld [vmem:[#allocation24_spill] sm:$0xff] }
 0x73b   : > { %v3305_v52 = vrot.slane %v3302_v33, 4  ;;  %v3278_v31 = vadd.f32 %v3276_v28, %v3245_v19  ;;  %v6653_v19 = vld [vmem:[#allocation32_spill] sm:$0xff] }
 0x73d   : > { %v3307_v10 = vsel %vm1619_vm0, %v3305_v52, %v3306_v32  ;;  %v6652_v32 = vld [vmem:[#allocation31_spill] sm:$0xff] }
 0x73e   : > { %v3309_v6 = vsel %vm3308_vm8, %v3302_v33, %v3307_v10 }
 0x73f   : > { %v3311_v12 = vadd.f32 %v3309_v6, %v3278_v31  ;;  %v6654_v31 = vld [vmem:[#allocation19_spill] sm:$0xff] }
 0x741   : > { %v3313_v16 = vmul.f32 %v3312_v8, %v3311_v12  ;;  %v6655_v8 = vld [vmem:[#allocation20_spill] sm:$0xff]  ;;  %v6656_v12 = vld [vmem:[#allocation43_spill] sm:$0xff] }
 0x743   : > { %v3315_v44 = vadd.f32 %v3314_v17, %v3313_v16  ;;  %v6657_v16 = vld [vmem:[#allocation44_spill] sm:$0xff] }
 0x745   : > { %v3316_v14 = vmax.f32 %v3315_v44, 0.0 }
 0x747   : > { %v3819_v4 = vmul.f32 -1.442695, %v3316_v14  ;;  %v6658_v14 = vld [vmem:[#allocation35_spill] sm:$0xff] }
 0x749   : > { %4026 = vpow2.f32 %v3819_v4 }
 0x756   : > { %v4027_v0 = vpop.eup %4026 }
 0x757   : > { %v3320_v37 = vadd.f32 1.0, %v4027_v0  ;;  %v6659_v0 = vld [vmem:[#allocation36_spill] sm:$0xff] }
 0x759   : > { %4028 = vrcp.f32 %v3320_v37 }
 0x766   : > { %v4029_v45 = vpop.eup %4028 }
 0x767   : > { %v3335_v20 = vrot.slane %v4029_v45, %v6636_v22  ;;  %v3339_v7 = vrot.slane %v4029_v45, %v3338_v41  ;;  %v3377_v62 = vrot.slane %v4029_v45, %v6637_v55  ;;  %v3381_v56 = vrot.slane %v4029_v45, %v3380_v51  ;;  %v6661_v51 = vld [vmem:[#allocation46_spill] sm:$0xff] }
 0x768   : > { %v3419_v50 = vrot.slane %v4029_v45, %v3418_v25  ;;  %v3423_v48 = vrot.slane %v4029_v45, %v3422_v15  ;;  %v3461_v57 = vrot.slane %v4029_v45, %v3460_v39  ;;  %v3465_v24 = vrot.slane %v4029_v45, %v3464_v35  ;;  %v6662_v15 = vld [vmem:[#allocation33_spill] sm:$0xff]  ;;  %v6663_v35 = vld [vmem:[#allocation34_spill] sm:$0xff] }
 0x769   : > { %v3345_v36 = vrot.slane %v3335_v20, %v6636_v22  ;;  %v3349_v5 = vrot.slane %v3339_v7, %v6636_v22  ;;  %v3387_v53 = vrot.slane %v3377_v62, %v6637_v55  ;;  %v3391_v47 = vrot.slane %v3381_v56, %v6637_v55  ;;  %v6664_v20 = vld [vmem:[#allocation47_spill] sm:$0xff]  ;;  %v6665_v62 = vld [vmem:[#allocation48_spill] sm:$0xff] }
 0x76a   : > { %v3429_v63 = vrot.slane %v3419_v50, %v3418_v25  ;;  %v3433_v59 = vrot.slane %v3423_v48, %v3418_v25  ;;  %v3471_v60 = vrot.slane %v3461_v57, %v3460_v39  ;;  %v3475_v43 = vrot.slane %v3465_v24, %v3460_v39  ;;  %v6666_v50 = vld [vmem:[#allocation42_spill] sm:$0xff]  ;;  %v6667_v57 = vld [vmem:[#allocation39_spill] sm:$0xff] }
 0x76b   : > { %v3350_v2 = vmul.f32 %v3345_v36, %v6639_v18  ;;  %v3351_v42 = vmul.f32 %v3349_v5, %v6640_v9  ;;  %v3352_v13 = vmul.f32 %v3345_v36, %v6641_v29  ;;  %v3353_v40 = vmul.f32 %v3349_v5, %v6642_v58  ;;  %v6671_v18 = vld [vmem:[#allocation38_spill] sm:$0xff] }
 0x76c   : > { %v3354_v23 = vmul.f32 %v3345_v36, %v6643_v30  ;;  %v3355_v22 = vmul.f32 %v3349_v5, %v6644_v11  ;;  %v3356_v27 = vmul.f32 %v3345_v36, %v6645_v34  ;;  %v3357_v55 = vmul.f32 %v3349_v5, %v6646_v49  ;;  %v6668_v36 = vld [vmem:[#allocation40_spill] sm:$0xff] }
 0x76d   : > { %3358 = vst [vmem:[%s6184_s16] sm:$0xff] %v3350_v2  ;;  %3359 = vst [vmem:[%s6184_s16 + $0x8] sm:$0xff] %v3351_v42  ;;  %v3392_v21 = vmul.f32 %v3387_v53, %v6648_v61  ;;  %v3393_v3 = vmul.f32 %v3391_v47, %v6649_v1  ;;  %v3394_v26 = vmul.f32 %v3387_v53, %v6650_v46 }
 0x76e   : > { %3360 = vst [vmem:[%s6184_s16 + $0x10] sm:$0xff] %v3352_v13  ;;  %3361 = vst [vmem:[%s6184_s16 + $0x18] sm:$0xff] %v3353_v40  ;;  %v3395_v28 = vmul.f32 %v3391_v47, %v6651_v54  ;;  %v3396_v33 = vmul.f32 %v3387_v53, %v6652_v32  ;;  %v3397_v52 = vmul.f32 %v3391_v47, %v6653_v19 }
 0x76f   : > { %3362 = vst [vmem:[%s6184_s16 + $0x20] sm:$0xff] %v3354_v23  ;;  %3363 = vst [vmem:[%s6184_s16 + $0x28] sm:$0xff] %v3355_v22  ;;  %v3398_v10 = vmul.f32 %v3387_v53, %v6654_v31  ;;  %v3399_v6 = vmul.f32 %v3391_v47, %v6655_v8  ;;  %v3434_v17 = vmul.f32 %v3429_v63, %v6656_v12  ;;  %v6669_v53 = vld [vmem:[#allocation41_spill] sm:$0xff] }
 0x770   : > { %3364 = vst [vmem:[%s6184_s16 + $0x30] sm:$0xff] %v3356_v27  ;;  %3365 = vst [vmem:[%s6184_s16 + $0x38] sm:$0xff] %v3357_v55  ;;  %v3435_v44 = vmul.f32 %v3433_v59, %v6657_v16  ;;  %v3436_v4 = vmul.f32 %v3429_v63, %v6658_v14  ;;  %v3437_v37 = vmul.f32 %v3433_v59, %v6659_v0 }
 0x771   : > { %3828 = vst [vmem:[%s6184_s16 + $0x40] sm:$0xff] %v3392_v21  ;;  %3829 = vst [vmem:[%s6184_s16 + $0x48] sm:$0xff] %v3393_v3  ;;  %v3438_v41 = vmul.f32 %v3429_v63, %v6660_v38  ;;  %v3439_v25 = vmul.f32 %v3433_v59, %v6661_v51  ;;  %v3440_v39 = vmul.f32 %v3429_v63, %v6662_v15  ;;  %v6670_v63 = vld [vmem:[#allocation37_spill] sm:$0xff] }
 0x772   : > { %3830 = vst [vmem:[%s6184_s16 + $0x50] sm:$0xff] %v3394_v26  ;;  %3831 = vst [vmem:[%s6184_s16 + $0x58] sm:$0xff] %v3395_v28  ;;  %v3441_v45 = vmul.f32 %v3433_v59, %v6663_v35  ;;  %v3476_v7 = vmul.f32 %v3471_v60, %v6664_v20  ;;  %v3477_v56 = vmul.f32 %v3475_v43, %v6665_v62 }
 0x773   : > { %3832 = vst [vmem:[%s6184_s16 + $0x60] sm:$0xff] %v3396_v33  ;;  %3833 = vst [vmem:[%s6184_s16 + $0x68] sm:$0xff] %v3397_v52  ;;  %v3478_v48 = vmul.f32 %v3471_v60, %v6666_v50  ;;  %v3479_v24 = vmul.f32 %v3475_v43, %v6667_v57  ;;  %v3480_v5 = vmul.f32 %v3471_v60, %v6668_v36 }
 0x774   : > { %3834 = vst [vmem:[%s6184_s16 + $0x70] sm:$0xff] %v3398_v10  ;;  %3835 = vst [vmem:[%s6184_s16 + $0x78] sm:$0xff] %v3399_v6  ;;  %v3481_v47 = vmul.f32 %v3475_v43, %v6669_v53  ;;  %v3482_v59 = vmul.f32 %v3471_v60, %v6670_v63  ;;  %v3483_v2 = vmul.f32 %v3475_v43, %v6671_v18 }
 0x775   : > { %3844 = vst [vmem:[%s6184_s16 + $0x80] sm:$0xff] %v3434_v17  ;;  %3845 = vst [vmem:[%s6184_s16 + $0x88] sm:$0xff] %v3435_v44 }
 0x776   : > { %3846 = vst [vmem:[%s6184_s16 + $0x90] sm:$0xff] %v3436_v4  ;;  %3847 = vst [vmem:[%s6184_s16 + $0x98] sm:$0xff] %v3437_v37 }
 0x777   : > { %3848 = vst [vmem:[%s6184_s16 + $0xa0] sm:$0xff] %v3438_v41  ;;  %3849 = vst [vmem:[%s6184_s16 + $0xa8] sm:$0xff] %v3439_v25 }
 0x778   : > { %3850 = vst [vmem:[%s6184_s16 + $0xb0] sm:$0xff] %v3440_v39  ;;  %3851 = vst [vmem:[%s6184_s16 + $0xb8] sm:$0xff] %v3441_v45 }
 0x779   : > { %3860 = vst [vmem:[%s6184_s16 + $0xc0] sm:$0xff] %v3476_v7  ;;  %3861 = vst [vmem:[%s6184_s16 + $0xc8] sm:$0xff] %v3477_v56 }
 0x77a   : > { %3862 = vst [vmem:[%s6184_s16 + $0xd0] sm:$0xff] %v3478_v48  ;;  %3863 = vst [vmem:[%s6184_s16 + $0xd8] sm:$0xff] %v3479_v24 }
 0x77b   : > { %3864 = vst [vmem:[%s6184_s16 + $0xe0] sm:$0xff] %v3480_v5  ;;  %3865 = vst [vmem:[%s6184_s16 + $0xe8] sm:$0xff] %v3481_v47 }
 0x77c   : > { %3866 = vst [vmem:[%s6184_s16 + $0xf0] sm:$0xff] %v3482_v59  ;;  %3867 = vst [vmem:[%s6184_s16 + $0xf8] sm:$0xff] %v3483_v2 }
 0x77d   : > { %4090 = shalt.err (!%p4087_p1)
}
 0x77e   : > { %s4091_s15 = scalar_lea.hbm %s6231_s20, 4096  ;;  %s4095_s8 = scalar_lea.hbm %s6299_s7, 8192 }
 0x77f   : > { %p4092_p4 = scmp.ne.s32.totalorder %s6231_s20, %s4091_s15  ;;  %p4096_p12 = scmp.lt.s32.totalorder %s6231_s20, %s6299_s7 }
 0x780   : > { %p4097_p0 = scmp.lt.s32.totalorder %s4095_s8, %s4091_s15 }
 0x781   : > { %p4093_p11 = pnand %p4092_p4, %p6672_p3 }
 0x782   : > { %p4098_p6 = por %p4097_p0, %p4096_p12 }
 0x783   : > { %p4094_p5 = pneg %p4093_p11 }
 0x785   : > { %p4099_p13 = pnand %p4098_p6, %p4094_p5 }
 0x787   : > { %4102 = shalt.err (!%p4099_p13)
}
 0x788   : > { %s4179_s29 = smov 256   ;;  %s4180_s28 = smov 16  }
 0x789   : > { %3913 = dma.vmem_to_hbm [thread:$0]  (%p6672_p3), %s6233_s18, 4096, %s6231_s20, %s3493_s10, %s4179_s29, %s4179_s29, %s4180_s28  }
 0x78a PF: > { %s3522_s12 = sand.u32 1, %s4133_s24   ;;  %p6673_p2 = scmp.ne.s32.totalorder %s6428_s14, 0 }
 0x78b   : > { %p6674_p7 = scmp.ge.s32.totalorder %s4145_s27, 2  ;;  %s3523_s21 = scalar_lea.sflag [#allocation6], %s3522_s12 }
 0x78d   : > { %p3924_p8 = pnand %p6674_p7, %p6673_p2 }
 0x78f   : > { %p3925_p9 = pneg %p3924_p8 }
 0x791   : > { %4128 = dma.done.wait (%p3925_p9), %s3523_s21, 4096  }
 0x792   : > { %4130 = vsyncadd (%p3925_p9), %s3523_s21, 4294963200  ;;  %s6675_s23 = sld [smem:[#allocation13_spill]]  ;;  %p21_p10 = scmp.ge.s32.totalorder %s4246_s30, 4  }
 0x793   : > { %s6676_s24 = smov %s4137_s25  ;;  %s6677_s25 = smov %s4141_s26 }
 0x794   : > { %s6679_s27 = smov %s4246_s30  ;;  %23 = sbr.rel (!%p21_p10) target bundleno = 8 (0x8), region = 116 }
 0x798   : > { %s6678_s26 = smov %s6675_s23 }
 0x799   :  { %3528 = vsyncpa [#allocation5], 1 }
 0x79a   :  { %3530 = vsyncpa [#allocation5 + $0x1], 1 }
 0x79b   :  { %3531 = vsyncpa [#allocation6], 1 }
 0x79c   :  { %3533 = vsyncpa [#allocation6 + $0x1], 1 }
 0x79d   :  { %3534 = vsyncpa [#allocation7], 1 }
 0x79e   :  { %3536 = vsyncpa [#allocation7 + $0x1], 1 }

</bundles_post_ra>
